<compile_context>
chip_gen: v7x
topology: tpu7x:2x2x1
jax: 0.10.0
libtpu: 0.0.40
codegen_flags: <defaults>
</compile_context>

<pallas_src>
import jax
import jax.numpy as jnp
from jax import lax
from jax.experimental import pallas as pl
from jax.experimental.pallas import tpu as pltpu

CP = 128   # lane-dense channel padding (one 128-lane granule)


def bottleneck_kernel(xpad_ref, xres_ref, mask_ref,
                      w1_ref, b1_ref, w2_ref, b2_ref, w3_ref, b3_ref,
                      out_ref, mid_ref):
    """One batch element per grid step.

    xpad_ref: (1, (H+2)*(W+2), CP) bf16  spatially padded input, flattened NHWC
    xres_ref: (1, H*W, CP)         bf16  unpadded input (residual), flattened NHWC
    mask_ref: ((H+2)*(W+2), 1)     f32   1 on interior pixels, 0 on the halo ring
    w1_ref:   (CP, CP)             bf16  conv1 1x1 weight, bn1 scale folded
    b1_ref:   (1, CP)              f32   bn1 folded bias
    w2_ref:   (3, 3*CP, CP)        bf16  conv2 3x3 weight, dx taps fused along K, bn2 folded
    b2_ref:   (1, CP)              f32
    w3_ref:   (CP, CP)             bf16  conv3 1x1 weight, bn3 scale folded
    b3_ref:   (1, CP)              f32
    out_ref:  (1, H*W, CP)         f32
    mid_ref:  (H+2, W+2, CP)       bf16  VMEM scratch: halo-padded conv2 input
    """
    HP, WP, CPk = mid_ref.shape
    H, W = HP - 2, WP - 2

    # ---- conv1 (1x1) + bn1 + relu over the padded extent; mask zeros the halo ring ----
    a1 = jnp.dot(xpad_ref[0], w1_ref[...], preferred_element_type=jnp.float32)
    h1 = jnp.maximum(a1 + b1_ref[...], 0.0) * mask_ref[...]
    mid_ref[...] = h1.reshape(HP, WP, CPk).astype(mid_ref.dtype)   # fully aligned store

    # ---- conv2 (3x3) + bn2 + relu: dx taps fused into K -> 3 MXU passes of K = 3*CP ----
    acc2 = jnp.zeros((H * W, CPk), jnp.float32)
    for dy in range(3):
        slab = jnp.concatenate(
            [mid_ref[dy:dy + H, dx:dx + W, :].reshape(H * W, CPk) for dx in range(3)],
            axis=1)                                                 # (H*W, 3*CP)
        acc2 = acc2 + jnp.dot(slab, w2_ref[dy],
                              preferred_element_type=jnp.float32)
    h2 = jnp.maximum(acc2 + b2_ref[...], 0.0).astype(mid_ref.dtype)

    # ---- conv3 (1x1) + bn3 + identity residual + relu ----
    a3 = jnp.dot(h2, w3_ref[...], preferred_element_type=jnp.float32)
    out = jnp.maximum(a3 + b3_ref[...] + xres_ref[0].astype(jnp.float32), 0.0)
    out_ref[0] = out.astype(out_ref.dtype)


def fold_bn(gamma, beta, mean, var, eps=1e-5):
    scale = gamma / jnp.sqrt(var + eps)
    bias = beta - mean * scale
    return scale, bias


def bottleneck_forward(x_nchw, w1_t, w2_t, w3_t, bn1, bn2, bn3, eps=1e-5):
    """NCHW in / NCHW out. w*_t in torch layout (Cout, Cin, kh, kw); bn* = (gamma, beta, mean, var)."""
    N, Cin, H, W = x_nchw.shape
    C1, C2, C3 = w1_t.shape[0], w2_t.shape[0], w3_t.shape[0]
    assert C3 == Cin, "identity residual requires conv3 out-channels == input channels"
    assert max(Cin, C1, C2, C3) <= CP, "channel tiling for >128 channels not implemented"
    HP, WP = H + 2, W + 2

    s1, b1 = fold_bn(*bn1, eps=eps)
    s2, b2 = fold_bn(*bn2, eps=eps)
    s3, b3 = fold_bn(*bn3, eps=eps)

    # Fold BN scales into the conv weights, zero-pad channels to CP, cast to bf16.
    w1p = jnp.zeros((CP, CP), jnp.float32).at[:Cin, :C1].set(
        w1_t[:, :, 0, 0].T * s1[None, :]).astype(jnp.bfloat16)
    w2_hwio = jnp.transpose(w2_t, (2, 3, 1, 0)) * s2[None, None, None, :]   # (kh, kw, C1, C2)
    w2p = jnp.zeros((3, 3 * CP, CP), jnp.float32)
    for dx in range(3):                          # dx taps laid out contiguously along K
        w2p = w2p.at[:, dx * CP:dx * CP + C1, :C2].set(w2_hwio[:, dx])
    w2p = w2p.astype(jnp.bfloat16)
    w3p = jnp.zeros((CP, CP), jnp.float32).at[:C2, :C3].set(
        w3_t[:, :, 0, 0].T * s3[None, :]).astype(jnp.bfloat16)

    b1p = jnp.zeros((1, CP), jnp.float32).at[0, :C1].set(b1)
    b2p = jnp.zeros((1, CP), jnp.float32).at[0, :C2].set(b2)
    b3p = jnp.zeros((1, CP), jnp.float32).at[0, :C3].set(b3)

    # NCHW -> NHWC, channel-pad to CP (lane-dense), bf16 for the MXU.
    x = jnp.transpose(x_nchw, (0, 2, 3, 1)).astype(jnp.bfloat16)
    x = jnp.pad(x, ((0, 0), (0, 0), (0, 0), (0, CP - Cin)))
    xres = x.reshape(N, H * W, CP)
    xpad = jnp.pad(x, ((0, 0), (1, 1), (1, 1), (0, 0))).reshape(N, HP * WP, CP)

    # Interior mask: 1 on real pixels, 0 on the conv2 halo ring.
    ys = (jnp.arange(HP) >= 1) & (jnp.arange(HP) <= H)
    xs = (jnp.arange(WP) >= 1) & (jnp.arange(WP) <= W)
    mask = (ys[:, None] & xs[None, :]).astype(jnp.float32).reshape(HP * WP, 1)

    out = pl.pallas_call(
        bottleneck_kernel,
        out_shape=jax.ShapeDtypeStruct((N, H * W, CP), jnp.float32),
        grid_spec=pltpu.PrefetchScalarGridSpec(
            num_scalar_prefetch=0,
            grid=(N,),
            in_specs=[
                pl.BlockSpec((1, HP * WP, CP), lambda n: (n, 0, 0)),   # xpad
                pl.BlockSpec((1, H * W, CP), lambda n: (n, 0, 0)),     # xres (residual)
                pl.BlockSpec((HP * WP, 1), lambda n: (0, 0)),          # interior mask
                pl.BlockSpec((CP, CP), lambda n: (0, 0)),              # w1
                pl.BlockSpec((1, CP), lambda n: (0, 0)),               # b1
                pl.BlockSpec((3, 3 * CP, CP), lambda n: (0, 0, 0)),    # w2
                pl.BlockSpec((1, CP), lambda n: (0, 0)),               # b2
                pl.BlockSpec((CP, CP), lambda n: (0, 0)),              # w3
                pl.BlockSpec((1, CP), lambda n: (0, 0)),               # b3
            ],
            out_specs=pl.BlockSpec((1, H * W, CP), lambda n: (n, 0, 0)),
            scratch_shapes=[pltpu.VMEM((HP, WP, CP), jnp.bfloat16)],
        ),
        compiler_params=pltpu.CompilerParams(
            dimension_semantics=("parallel",),
            vmem_limit_bytes=32 * 1024 * 1024),
    )(xpad, xres, mask, w1p, b1p, w2p, b2p, w3p, b3p)

    out = out.reshape(N, H, W, CP)[..., :C3]
    return jnp.transpose(out, (0, 3, 1, 2))          # NHWC -> NCHW


def reference_forward(x_nchw, w1_t, w2_t, w3_t, bn1, bn2, bn3, eps=1e-5):
    """Pure-JAX (f32) reference mirroring the PyTorch Bottleneck forward (inference-mode BN)."""
    x = jnp.transpose(x_nchw, (0, 2, 3, 1))
    dn = ('NHWC', 'HWIO', 'NHWC')

    def conv(y, w_t, pad):
        k = jnp.transpose(w_t, (2, 3, 1, 0))        # (Cout,Cin,kh,kw) -> (kh,kw,Cin,Cout)
        return lax.conv_general_dilated(y, k, (1, 1), pad, dimension_numbers=dn)

    def bn(y, p):
        g, b, m, v = p
        return (y - m) / jnp.sqrt(v + eps) * g + b

    out = jax.nn.relu(bn(conv(x, w1_t, 'VALID'), bn1))
    out = jax.nn.relu(bn(conv(out, w2_t, 'SAME'), bn2))
    out = bn(conv(out, w3_t, 'VALID'), bn3)
    out = jax.nn.relu(out + x)
    return jnp.transpose(out, (0, 3, 1, 2))


if __name__ == "__main__":
    key = jax.random.PRNGKey(0)
    N, H, W = 2, 16, 16
    planes = 4                        # bottleneck width
    Cin = C3 = planes * 4             # expansion = 4; identity residual needs C3 == Cin
    C1 = C2 = planes

    ks = jax.random.split(key, 8)
    rnd_bf16 = lambda a: a.astype(jnp.bfloat16).astype(jnp.float32)  # kernel & ref see same data

    x = rnd_bf16(jax.random.normal(ks[0], (N, Cin, H, W), jnp.float32))
    w1 = rnd_bf16(0.2 * jax.random.normal(ks[1], (C1, Cin, 1, 1), jnp.float32))
    w2 = rnd_bf16(0.2 * jax.random.normal(ks[2], (C2, C1, 3, 3), jnp.float32))
    w3 = rnd_bf16(0.2 * jax.random.normal(ks[3], (C3, C2, 1, 1), jnp.float32))

    def bn_params(k, c):
        k1, k2, k3, k4 = jax.random.split(k, 4)
        return (1.0 + 0.1 * jax.random.normal(k1, (c,), jnp.float32),
                0.1 * jax.random.normal(k2, (c,), jnp.float32),
                0.1 * jax.random.normal(k3, (c,), jnp.float32),
                1.0 + 0.1 * jax.random.uniform(k4, (c,), jnp.float32))

    bn1, bn2, bn3 = bn_params(ks[4], C1), bn_params(ks[5], C2), bn_params(ks[6], C3)

    out = bottleneck_forward(x, w1, w2, w3, bn1, bn2, bn3)
    out = jax.block_until_ready(out)

    ref = reference_forward(x, w1, w2, w3, bn1, bn2, bn3)
    assert out.shape == (N, Cin, H, W)
    err = float(jnp.max(jnp.abs(out - ref)))
    assert jnp.allclose(out, ref, atol=5e-2, rtol=5e-2), err
    print("KERNEL_OK")
</pallas_src>

<mosaic_0001>
module attributes {stable_mosaic.version = 11 : i64} {
  func.func @bottleneck_kernel(%arg0: i32, %arg1: memref<1x324x128xbf16, #tpu.memory_space<vmem>>, %arg2: memref<1x256x128xbf16, #tpu.memory_space<vmem>>, %arg3: memref<324x1xf32, #tpu.memory_space<vmem>>, %arg4: memref<128x128xbf16, #tpu.memory_space<vmem>>, %arg5: memref<1x128xf32, #tpu.memory_space<vmem>>, %arg6: memref<3x384x128xbf16, #tpu.memory_space<vmem>>, %arg7: memref<1x128xf32, #tpu.memory_space<vmem>>, %arg8: memref<128x128xbf16, #tpu.memory_space<vmem>>, %arg9: memref<1x128xf32, #tpu.memory_space<vmem>>, %arg10: memref<1x256x128xf32, #tpu.memory_space<vmem>>, %arg11: memref<18x18x128xbf16, #tpu.memory_space<vmem>>) attributes {dimension_semantics = [#tpu.dimension_semantics<parallel>], iteration_bounds = array<i64: 2>, scalar_prefetch = 0 : i64, scratch_operands = 1 : i64, tpu.core_type = #tpu.core_type<tc>, window_params = [{transform_indices = @transform_0, window_bounds = array<i64: 1, 324, 128>}, {transform_indices = @transform_1, window_bounds = array<i64: 1, 256, 128>}, {pipeline_mode = #tpu.pipeline_mode<synchronous>, transform_indices = @transform_2, window_bounds = array<i64: 324, 1>}, {pipeline_mode = #tpu.pipeline_mode<synchronous>, transform_indices = @transform_3, window_bounds = array<i64: 128, 128>}, {pipeline_mode = #tpu.pipeline_mode<synchronous>, transform_indices = @transform_4, window_bounds = array<i64: 1, 128>}, {pipeline_mode = #tpu.pipeline_mode<synchronous>, transform_indices = @transform_5, window_bounds = array<i64: 3, 384, 128>}, {pipeline_mode = #tpu.pipeline_mode<synchronous>, transform_indices = @transform_6, window_bounds = array<i64: 1, 128>}, {pipeline_mode = #tpu.pipeline_mode<synchronous>, transform_indices = @transform_7, window_bounds = array<i64: 128, 128>}, {pipeline_mode = #tpu.pipeline_mode<synchronous>, transform_indices = @transform_8, window_bounds = array<i64: 1, 128>}, {transform_indices = @transform_9, window_bounds = array<i64: 1, 256, 128>}]} {
    %c0 = arith.constant 0 : index
    %c0_0 = arith.constant 0 : index
    %c0_1 = arith.constant 0 : index
    %0 = vector.load %arg1[%c0, %c0_0, %c0_1] : memref<1x324x128xbf16, #tpu.memory_space<vmem>>, vector<1x324x128xbf16>
    %1 = vector.shape_cast %0 : vector<1x324x128xbf16> to vector<324x128xbf16>
    %c0_2 = arith.constant 0 : index
    %c0_3 = arith.constant 0 : index
    %2 = vector.load %arg4[%c0_2, %c0_3] : memref<128x128xbf16, #tpu.memory_space<vmem>>, vector<128x128xbf16>
    %cst = arith.constant dense<0.000000e+00> : vector<324x128xf32>
    %3 = tpu.matmul %1, %2, %cst {dimension_numbers = #tpu.dot_dimension_numbers<[1], [0], [0], [1], [0, 0, 1, 1], [], []>} : vector<324x128xbf16>, vector<128x128xbf16>, vector<324x128xf32> -> vector<324x128xf32>
    %c0_4 = arith.constant 0 : index
    %c0_5 = arith.constant 0 : index
    %4 = vector.load %arg5[%c0_4, %c0_5] : memref<1x128xf32, #tpu.memory_space<vmem>>, vector<1x128xf32>
    %5 = vector.broadcast %4 : vector<1x128xf32> to vector<324x128xf32>
    %6 = arith.addf %3, %5 : vector<324x128xf32>
    %cst_6 = arith.constant 0.000000e+00 : f32
    %7 = vector.broadcast %cst_6 : f32 to vector<324x128xf32>
    %8 = arith.maximumf %6, %7 : vector<324x128xf32>
    %c0_7 = arith.constant 0 : index
    %c0_8 = arith.constant 0 : index
    %9 = vector.load %arg3[%c0_7, %c0_8] : memref<324x1xf32, #tpu.memory_space<vmem>>, vector<324x1xf32>
    %10 = vector.broadcast %9 : vector<324x1xf32> to vector<324x128xf32>
    %11 = arith.mulf %8, %10 : vector<324x128xf32>
    %12 = vector.shape_cast %11 : vector<324x128xf32> to vector<18x18x128xf32>
    %13 = arith.truncf %12 : vector<18x18x128xf32> to vector<18x18x128xbf16>
    %c0_9 = arith.constant 0 : index
    %c0_10 = arith.constant 0 : index
    %c0_11 = arith.constant 0 : index
    %14 = vector.load %arg11[%c0_9, %c0_10, %c0_11] : memref<18x18x128xbf16, #tpu.memory_space<vmem>>, vector<18x18x128xbf16>
    tpu.vector_store %arg11[%c0_9, %c0_10, %c0_11], %13 {strides = array<i32>} : memref<18x18x128xbf16, #tpu.memory_space<vmem>>, vector<18x18x128xbf16>,
    %cst_12 = arith.constant 0.000000e+00 : f32
    %15 = vector.broadcast %cst_12 : f32 to vector<256x128xf32>
    %c0_13 = arith.constant 0 : index
    %c0_14 = arith.constant 0 : index
    %c0_15 = arith.constant 0 : index
    %16 = vector.load %arg11[%c0_13, %c0_14, %c0_15] : memref<18x18x128xbf16, #tpu.memory_space<vmem>>, vector<16x16x128xbf16>
    %17 = vector.shape_cast %16 : vector<16x16x128xbf16> to vector<256x128xbf16>
    %c0_16 = arith.constant 0 : index
    %c1 = arith.constant 1 : index
    %c0_17 = arith.constant 0 : index
    %18 = vector.load %arg11[%c0_16, %c1, %c0_17] : memref<18x18x128xbf16, #tpu.memory_space<vmem>>, vector<16x16x128xbf16>
    %19 = vector.shape_cast %18 : vector<16x16x128xbf16> to vector<256x128xbf16>
    %c0_18 = arith.constant 0 : index
    %c2 = arith.constant 2 : index
    %c0_19 = arith.constant 0 : index
    %20 = vector.load %arg11[%c0_18, %c2, %c0_19] : memref<18x18x128xbf16, #tpu.memory_space<vmem>>, vector<16x16x128xbf16>
    %21 = vector.shape_cast %20 : vector<16x16x128xbf16> to vector<256x128xbf16>
    %22 = tpu.concatenate %17, %19, %21 in 1 : vector<256x128xbf16>, vector<256x128xbf16>, vector<256x128xbf16> -> vector<256x384xbf16>
    %c0_20 = arith.constant 0 : index
    %c0_21 = arith.constant 0 : index
    %c0_22 = arith.constant 0 : index
    %23 = vector.load %arg6[%c0_20, %c0_21, %c0_22] : memref<3x384x128xbf16, #tpu.memory_space<vmem>>, vector<1x384x128xbf16>
    %24 = vector.shape_cast %23 : vector<1x384x128xbf16> to vector<384x128xbf16>
    %cst_23 = arith.constant dense<0.000000e+00> : vector<256x128xf32>
    %25 = tpu.matmul %22, %24, %cst_23 {dimension_numbers = #tpu.dot_dimension_numbers<[1], [0], [0], [1], [0, 0, 1, 1], [], []>} : vector<256x384xbf16>, vector<384x128xbf16>, vector<256x128xf32> -> vector<256x128xf32>
    %26 = arith.addf %15, %25 : vector<256x128xf32>
    %c1_24 = arith.constant 1 : index
    %c0_25 = arith.constant 0 : index
    %c0_26 = arith.constant 0 : index
    %27 = vector.load %arg11[%c1_24, %c0_25, %c0_26] : memref<18x18x128xbf16, #tpu.memory_space<vmem>>, vector<16x16x128xbf16>
    %28 = vector.shape_cast %27 : vector<16x16x128xbf16> to vector<256x128xbf16>
    %c1_27 = arith.constant 1 : index
    %c1_28 = arith.constant 1 : index
    %c0_29 = arith.constant 0 : index
    %29 = vector.load %arg11[%c1_27, %c1_28, %c0_29] : memref<18x18x128xbf16, #tpu.memory_space<vmem>>, vector<16x16x128xbf16>
    %30 = vector.shape_cast %29 : vector<16x16x128xbf16> to vector<256x128xbf16>
    %c1_30 = arith.constant 1 : index
    %c2_31 = arith.constant 2 : index
    %c0_32 = arith.constant 0 : index
    %31 = vector.load %arg11[%c1_30, %c2_31, %c0_32] : memref<18x18x128xbf16, #tpu.memory_space<vmem>>, vector<16x16x128xbf16>
    %32 = vector.shape_cast %31 : vector<16x16x128xbf16> to vector<256x128xbf16>
    %33 = tpu.concatenate %28, %30, %32 in 1 : vector<256x128xbf16>, vector<256x128xbf16>, vector<256x128xbf16> -> vector<256x384xbf16>
    %c1_33 = arith.constant 1 : index
    %c0_34 = arith.constant 0 : index
    %c0_35 = arith.constant 0 : index
    %34 = vector.load %arg6[%c1_33, %c0_34, %c0_35] : memref<3x384x128xbf16, #tpu.memory_space<vmem>>, vector<1x384x128xbf16>
    %35 = vector.shape_cast %34 : vector<1x384x128xbf16> to vector<384x128xbf16>
    %cst_36 = arith.constant dense<0.000000e+00> : vector<256x128xf32>
    %36 = tpu.matmul %33, %35, %cst_36 {dimension_numbers = #tpu.dot_dimension_numbers<[1], [0], [0], [1], [0, 0, 1, 1], [], []>} : vector<256x384xbf16>, vector<384x128xbf16>, vector<256x128xf32> -> vector<256x128xf32>
    %37 = arith.addf %26, %36 : vector<256x128xf32>
    %c2_37 = arith.constant 2 : index
    %c0_38 = arith.constant 0 : index
    %c0_39 = arith.constant 0 : index
    %38 = vector.load %arg11[%c2_37, %c0_38, %c0_39] : memref<18x18x128xbf16, #tpu.memory_space<vmem>>, vector<16x16x128xbf16>
    %39 = vector.shape_cast %38 : vector<16x16x128xbf16> to vector<256x128xbf16>
    %c2_40 = arith.constant 2 : index
    %c1_41 = arith.constant 1 : index
    %c0_42 = arith.constant 0 : index
    %40 = vector.load %arg11[%c2_40, %c1_41, %c0_42] : memref<18x18x128xbf16, #tpu.memory_space<vmem>>, vector<16x16x128xbf16>
    %41 = vector.shape_cast %40 : vector<16x16x128xbf16> to vector<256x128xbf16>
    %c2_43 = arith.constant 2 : index
    %c2_44 = arith.constant 2 : index
    %c0_45 = arith.constant 0 : index
    %42 = vector.load %arg11[%c2_43, %c2_44, %c0_45] : memref<18x18x128xbf16, #tpu.memory_space<vmem>>, vector<16x16x128xbf16>
    %43 = vector.shape_cast %42 : vector<16x16x128xbf16> to vector<256x128xbf16>
    %44 = tpu.concatenate %39, %41, %43 in 1 : vector<256x128xbf16>, vector<256x128xbf16>, vector<256x128xbf16> -> vector<256x384xbf16>
    %c2_46 = arith.constant 2 : index
    %c0_47 = arith.constant 0 : index
    %c0_48 = arith.constant 0 : index
    %45 = vector.load %arg6[%c2_46, %c0_47, %c0_48] : memref<3x384x128xbf16, #tpu.memory_space<vmem>>, vector<1x384x128xbf16>
    %46 = vector.shape_cast %45 : vector<1x384x128xbf16> to vector<384x128xbf16>
    %cst_49 = arith.constant dense<0.000000e+00> : vector<256x128xf32>
    %47 = tpu.matmul %44, %46, %cst_49 {dimension_numbers = #tpu.dot_dimension_numbers<[1], [0], [0], [1], [0, 0, 1, 1], [], []>} : vector<256x384xbf16>, vector<384x128xbf16>, vector<256x128xf32> -> vector<256x128xf32>
    %48 = arith.addf %37, %47 : vector<256x128xf32>
    %c0_50 = arith.constant 0 : index
    %c0_51 = arith.constant 0 : index
    %49 = vector.load %arg7[%c0_50, %c0_51] : memref<1x128xf32, #tpu.memory_space<vmem>>, vector<1x128xf32>
    %50 = vector.broadcast %49 : vector<1x128xf32> to vector<256x128xf32>
    %51 = arith.addf %48, %50 : vector<256x128xf32>
    %cst_52 = arith.constant 0.000000e+00 : f32
    %52 = vector.broadcast %cst_52 : f32 to vector<256x128xf32>
    %53 = arith.maximumf %51, %52 : vector<256x128xf32>
    %54 = arith.truncf %53 : vector<256x128xf32> to vector<256x128xbf16>
    %c0_53 = arith.constant 0 : index
    %c0_54 = arith.constant 0 : index
    %55 = vector.load %arg8[%c0_53, %c0_54] : memref<128x128xbf16, #tpu.memory_space<vmem>>, vector<128x128xbf16>
    %cst_55 = arith.constant dense<0.000000e+00> : vector<256x128xf32>
    %56 = tpu.matmul %54, %55, %cst_55 {dimension_numbers = #tpu.dot_dimension_numbers<[1], [0], [0], [1], [0, 0, 1, 1], [], []>} : vector<256x128xbf16>, vector<128x128xbf16>, vector<256x128xf32> -> vector<256x128xf32>
    %c0_56 = arith.constant 0 : index
    %c0_57 = arith.constant 0 : index
    %57 = vector.load %arg9[%c0_56, %c0_57] : memref<1x128xf32, #tpu.memory_space<vmem>>, vector<1x128xf32>
    %58 = vector.broadcast %57 : vector<1x128xf32> to vector<256x128xf32>
    %59 = arith.addf %56, %58 : vector<256x128xf32>
    %c0_58 = arith.constant 0 : index
    %c0_59 = arith.constant 0 : index
    %c0_60 = arith.constant 0 : index
    %60 = vector.load %arg2[%c0_58, %c0_59, %c0_60] : memref<1x256x128xbf16, #tpu.memory_space<vmem>>, vector<1x256x128xbf16>
    %61 = vector.shape_cast %60 : vector<1x256x128xbf16> to vector<256x128xbf16>
    %62 = arith.extf %61 : vector<256x128xbf16> to vector<256x128xf32>
    %63 = arith.addf %59, %62 : vector<256x128xf32>
    %cst_61 = arith.constant 0.000000e+00 : f32
    %64 = vector.broadcast %cst_61 : f32 to vector<256x128xf32>
    %65 = arith.maximumf %63, %64 : vector<256x128xf32>
    %c0_62 = arith.constant 0 : index
    %c0_63 = arith.constant 0 : index
    %c0_64 = arith.constant 0 : index
    %66 = vector.load %arg10[%c0_62, %c0_63, %c0_64] : memref<1x256x128xf32, #tpu.memory_space<vmem>>, vector<1x256x128xf32>
    %67 = vector.shape_cast %66 : vector<1x256x128xf32> to vector<256x128xf32>
    %68 = vector.shape_cast %65 : vector<256x128xf32> to vector<1x256x128xf32>
    tpu.vector_store %arg10[%c0_62, %c0_63, %c0_64], %68 {strides = array<i32>} : memref<1x256x128xf32, #tpu.memory_space<vmem>>, vector<1x256x128xf32>,
    return
  }
  func.func @transform_0(%arg0: i32) -> (i32, i32, i32) {
    %c0_i32 = arith.constant 0 : i32
    %c0_i32_0 = arith.constant 0 : i32
    %c0_i32_1 = arith.constant 0 : i32
    return %arg0, %c0_i32, %c0_i32_0 : i32, i32, i32
  }
  func.func @transform_1(%arg0: i32) -> (i32, i32, i32) {
    %c0_i32 = arith.constant 0 : i32
    %c0_i32_0 = arith.constant 0 : i32
    %c0_i32_1 = arith.constant 0 : i32
    return %arg0, %c0_i32, %c0_i32_0 : i32, i32, i32
  }
  func.func @transform_2(%arg0: i32) -> (i32, i32) {
    %c0_i32 = arith.constant 0 : i32
    %c0_i32_0 = arith.constant 0 : i32
    %c0_i32_1 = arith.constant 0 : i32
    return %c0_i32, %c0_i32_0 : i32, i32
  }
  func.func @transform_3(%arg0: i32) -> (i32, i32) {
    %c0_i32 = arith.constant 0 : i32
    %c0_i32_0 = arith.constant 0 : i32
    %c0_i32_1 = arith.constant 0 : i32
    return %c0_i32, %c0_i32_0 : i32, i32
  }
  func.func @transform_4(%arg0: i32) -> (i32, i32) {
    %c0_i32 = arith.constant 0 : i32
    %c0_i32_0 = arith.constant 0 : i32
    %c0_i32_1 = arith.constant 0 : i32
    return %c0_i32, %c0_i32_0 : i32, i32
  }
  func.func @transform_5(%arg0: i32) -> (i32, i32, i32) {
    %c0_i32 = arith.constant 0 : i32
    %c0_i32_0 = arith.constant 0 : i32
    %c0_i32_1 = arith.constant 0 : i32
    %c0_i32_2 = arith.constant 0 : i32
    return %c0_i32, %c0_i32_0, %c0_i32_1 : i32, i32, i32
  }
  func.func @transform_6(%arg0: i32) -> (i32, i32) {
    %c0_i32 = arith.constant 0 : i32
    %c0_i32_0 = arith.constant 0 : i32
    %c0_i32_1 = arith.constant 0 : i32
    return %c0_i32, %c0_i32_0 : i32, i32
  }
  func.func @transform_7(%arg0: i32) -> (i32, i32) {
    %c0_i32 = arith.constant 0 : i32
    %c0_i32_0 = arith.constant 0 : i32
    %c0_i32_1 = arith.constant 0 : i32
    return %c0_i32, %c0_i32_0 : i32, i32
  }
  func.func @transform_8(%arg0: i32) -> (i32, i32) {
    %c0_i32 = arith.constant 0 : i32
    %c0_i32_0 = arith.constant 0 : i32
    %c0_i32_1 = arith.constant 0 : i32
    return %c0_i32, %c0_i32_0 : i32, i32
  }
  func.func @transform_9(%arg0: i32) -> (i32, i32, i32) {
    %c0_i32 = arith.constant 0 : i32
    %c0_i32_0 = arith.constant 0 : i32
    %c0_i32_1 = arith.constant 0 : i32
    return %arg0, %c0_i32, %c0_i32_0 : i32, i32, i32
  }
}

</mosaic_0001>

<bundles_post_ra>
// kernel: tpu_custom_call.1
= control target key start
LH: loop header
LB: loop body
LE: loop exit
PB: predicated region body
PF: predicated region fallthrough
CT: control target
= control target key end

     0   :  { %14 = vsyncpa [#allocation4], 0  ;;  %s12195_s0 = inlined_call_operand.vmem [shape: bf16[2,324,128], index: 0, kind: input, shape index: {}]   ;;  %s12196_s1 = inlined_call_operand.vmem [shape: bf16[2,256,128], index: 1, kind: input, shape index: {}]   ;;  %s12197_s2 = inlined_call_operand.vmem [shape: f32[324,1], index: 2, kind: input, shape index: {}]   ;;  %s12198_s3 = inlined_call_operand.vmem [shape: bf16[128,128], index: 3, kind: input, shape index: {}]   ;;  %s12199_s4 = inlined_call_operand.vmem [shape: f32[1,128], index: 4, kind: input, shape index: {}]   ;;  %s12200_s5 = inlined_call_operand.vmem [shape: bf16[3,384,128], index: 5, kind: input, shape index: {}]   ;;  %s12201_s6 = inlined_call_operand.vmem [shape: f32[1,128], index: 6, kind: input, shape index: {}]   ;;  %s12202_s7 = inlined_call_operand.vmem [shape: bf16[128,128], index: 7, kind: input, shape index: {}]   ;;  %s12203_s8 = inlined_call_operand.vmem [shape: f32[1,128], index: 8, kind: input, shape index: {}]   ;;  %s12204_s9 = inlined_call_operand.hbm [shape: f32[2,256,128], index: 9, kind: output, shape index: {}]  }
   0x1   :  { %16 = vsyncpa [#allocation4 + $0x1], 0  ;;  %s9499_s30 = smov 0   ;;  %s9501_s10 = smov 0  }
   0x2   :  { %s9503_s11 = smov 0   ;;  %s9505_s12 = smov 0  }
   0x3 LB: > { %s9520_s13 = sadd.s32 4294967295, %s9440_s12   ;;  %s7524_s14 = sadd.s32 4294967294, %s9440_s12   ;;  %s9440_s12 = sphi %s9505_s12, %s12306_s12   ;;  %s9436_s11 = sphi %s9503_s11, %s12305_s11   ;;  %s9432_s10 = sphi %s9501_s10, %s12304_s10   ;;  %s9428_s30 = sphi %s9499_s30, %s12303_s30  }
   0x4   : > { %s9524_s15 = sadd.s32 1, %s9440_s12   ;;  %s228_s16 = sadd.s32 1, %s9436_s11 }
   0x5   : > { %s225_s17 = ssub.s32 %s9440_s12, %s9524_s15  ;;  %p238_p0 = scmp.ne.s32.totalorder %s9436_s11, %s9432_s10 }
   0x6   : > { %p226_p1 = scmp.eq.s32.totalorder %s225_s17, 0  ;;  %p239_p2 = scmp.eq.s32.totalorder %s9520_s13, 1 }
   0x7   : > { %p244_p3 = scmp.ne.s32.totalorder %s9432_s10, %s9428_s30  ;;  %p245_p4 = scmp.eq.s32.totalorder %s7524_s14, 1 }
   0x8   : > { %s9535_s18 = scalar_select %p226_p1, %s9436_s11, %s228_s16  }
   0x9   : > { %p9537_p5 = por %p239_p2, %p238_p0  ;;  %p9541_p6 = por %p245_p4, %p244_p3 }
   0xa   : > { %12218 = sst [smem:[#allocation6_spill]] %s9535_s18  ;;  %p7527_p7 = scmp.ge.s32.totalorder %s9440_s12, 1 }
   0xb   : > { %p300_p8 = scmp.lt.s32.totalorder %s9440_s12, 3 }
   0xd   : > { %p301_p9 = pnand %p7527_p7, %p300_p8 }
   0xf   : > { %304 = sbr.rel (%p301_p9) target bundleno = 1333 (0x535), region = 56 }
  0x16   : > { %v9156_v0 = vld [vmem:[%s12198_s3] sm:$0xff]   ;;  %v9442_v1 = vmov 0.0   ;;  %v9157_v2 = vld [vmem:[%s12198_s3 + $0x8] sm:$0xff]   ;;  %vm9443_vm0 = vmmov 0   ;;  %p341_p10 = scmp.lt.s32.totalorder %s9520_s13, 1  ;;  %v9444_v3 = vmov 0  }
  0x17   : > { %8640 = vmatprep.subr.bf16.mxu0 %v9442_v1  ;;  %8656 = vmatprep.mubr.msk.bf16.mxu0 %vm9443_vm0, %v9442_v1  ;;  %v9158_v4 = vld [vmem:[%s12198_s3 + $0x10] sm:$0xff]   ;;  %v842_v5 = vld [vmem:[%s12197_s2 + $0x68] sm:$0xff]  ;;  %v844_v6 = vld [vmem:[%s12197_s2 + $0x78] sm:$0xff]  ;;  %vm2973_vm1 = vsmask.f32 3328  ;;  %vm3424_vm4 = vcmask 1042432  }
  0x18   : > { %8641 = vmatpush3.bf16.msra.mxu0 %v9156_v0  ;;  %s9559_s25 = scalar_select %p341_p10, %s9520_s13, 1  ;;  %9154 = vset.pattern.permute.xlu0 %v9444_v3  ;;  %v9159_v7 = vld [vmem:[%s12198_s3 + $0x18] sm:$0xff]   ;;  %v843_v8 = vld [vmem:[%s12197_s2 + $0x70] sm:$0xff]  ;;  %v845_v9 = vld [vmem:[%s12197_s2 + $0x80] sm:$0xff]  ;;  %vm2974_vm2 = vsmask.f32 7440 }
  0x19   : > { %8642 = vmatprep.subr.bf16.mxu0 %v9442_v1  ;;  %9155 = vset.pattern.permute.xlu1 %v9444_v3  ;;  %v9160_v10 = vld [vmem:[%s12198_s3 + $0x20] sm:$0xff]   ;;  %v846_v11 = vld [vmem:[%s12197_s2 + $0x88] sm:$0xff]  ;;  %v847_v12 = vld [vmem:[%s12197_s2 + $0x90] sm:$0xff]  ;;  %vm3425_vm5 = vcmask 1046532   ;;  %s338_s22 = sand.u32 1, %s9432_s10   ;;  %s8046_s26 = sshll.u32 %s9520_s13, 12 }
  0x1a   : > { %s9108_s28 = smul.u32 164, %s9559_s25  ;;  %937 = vperm.xlu0 %9154, %v842_v5   ;;  %947 = vperm.xlu1 %9155, %v844_v6   ;;  %v9161_v13 = vld [vmem:[%s12198_s3 + $0x28] sm:$0xff]   ;;  %v848_v14 = vld [vmem:[%s12197_s2 + $0x98] sm:$0xff]  ;;  %v849_v15 = vld [vmem:[%s12197_s2 + $0xa0] sm:$0xff]  ;;  %s7991_s14 = sshll.u32 %s9559_s25, 7 }
  0x1b   : > { %v9162_v16 = vld [vmem:[%s12198_s3 + $0x30] sm:$0xff]   ;;  %v850_v17 = vld [vmem:[%s12197_s2 + $0xa8] sm:$0xff]  ;;  %v9163_v19 = vld [vmem:[%s12198_s3 + $0x38] sm:$0xff]   ;;  %s12051_s21 = scalar_lea.vmem %s12196_s1, %s7991_s14  ;;  %s7528_s25 = sshll.u32 %s338_s22, 8 }
  0x1c   : > { %8643 = vmatpush3.bf16.msra.mxu0 %v9157_v2  ;;  %s9569_s16 = scalar_lea.vmem %s12195_s0, %s9108_s28  ;;  %v851_v18 = vld [vmem:[%s12197_s2 + $0xb0] sm:$0xff]  ;;  %v852_v20 = vld [vmem:[%s12197_s2 + $0xb8] sm:$0xff]  ;;  %v853_v21 = vld [vmem:[%s12197_s2 + $0xc0] sm:$0xff]  ;;  %s12069_s24 = scalar_lea.vmem [#allocation3], %s7528_s25 }
  0x1d   : > { %8644 = vmatprep.subr.bf16.mxu0 %v9442_v1  ;;  %v9164_v22 = vld [vmem:[%s9569_s16] sm:$0xff]   ;;  %v854_v23 = vld [vmem:[%s12197_s2 + $0xc8] sm:$0xff]  ;;  %v855_v24 = vld [vmem:[%s12197_s2 + $0xd0] sm:$0xff]  ;;  %s7450_s27 = sshll.u32 %s12069_s24, 4  ;;  %s12145_s14 = scalar_lea.hbm %s12204_s9, %s8046_s26  ;;  %s12147_s27 = int_to_ptr.vmem [resolvable:$true] %s7450_s27 }
  0x1e   : > { %942 = vperm.xlu0 %9154, %v843_v8   ;;  %952 = vperm.xlu1 %9155, %v845_v9   ;;  %v856_v25 = vld [vmem:[%s12197_s2 + $0xd8] sm:$0xff]  ;;  %v857_v26 = vld [vmem:[%s12197_s2 + $0xe0] sm:$0xff]  ;;  %v9165_v27 = vld [vmem:[%s9569_s16 + $0x8] sm:$0xff]   ;;  %s12154_s13 = scalar_lea.sflag [#allocation4], %s338_s22  ;;  %s9378_s17 = scalar_lea.vmem %s12147_s27, 4096 }
  0x1f   : > { %v858_v28 = vld [vmem:[%s12197_s2 + $0xe8] sm:$0xff]  ;;  %v859_v29 = vld [vmem:[%s12197_s2 + $0xf0] sm:$0xff]  ;;  %v860_v30 = vld [vmem:[%s12197_s2 + $0xf8] sm:$0xff]  ;;  %p9379_p11 = scmp.ne.s32.totalorder %s12147_s27, %s9378_s17  ;;  %s9446_s18 = smov [#allocation3]  }
  0x20   : > { %8645 = vmatpush3.bf16.msra.mxu0 %v9158_v4  ;;  %v861_v31 = vld [vmem:[%s12197_s2 + $0x100] sm:$0xff]  ;;  %v9166_v32 = vld [vmem:[%s9569_s16 + $0x10] sm:$0xff]   ;;  %v862_v33 = vld [vmem:[%s12197_s2 + $0x108] sm:$0xff] }
  0x21   : > { %8646 = vmatprep.subr.bf16.mxu0 %v9442_v1  ;;  %v863_v34 = vld [vmem:[%s12197_s2 + $0x110] sm:$0xff]  ;;  %v864_v35 = vld [vmem:[%s12197_s2 + $0x118] sm:$0xff]  ;;  %v865_v36 = vld [vmem:[%s12197_s2 + $0x120] sm:$0xff]  ;;  %p9380_p12 = pnand %p9379_p11, %p9537_p5 }
  0x22   : > { %957 = vperm.xlu0 %9154, %v846_v11   ;;  %962 = vperm.xlu1 %9155, %v847_v12   ;;  %v9167_v37 = vld [vmem:[%s9569_s16 + $0x18] sm:$0xff]   ;;  %v866_v38 = vld [vmem:[%s12197_s2 + $0x128] sm:$0xff]  ;;  %v867_v40 = vld [vmem:[%s12197_s2 + $0x130] sm:$0xff] }
  0x23   : > { %v832_v39 = vld [vmem:[%s12197_s2 + $0x18] sm:$0xff]  ;;  %v833_v41 = vld [vmem:[%s12197_s2 + $0x20] sm:$0xff]  ;;  %v834_v43 = vld [vmem:[%s12197_s2 + $0x28] sm:$0xff]  ;;  %p9381_p13 = pneg %p9380_p12 }
  0x24   : > { %8647 = vmatpush3.bf16.msra.mxu0 %v9159_v7  ;;  %v9168_v42 = vld [vmem:[%s9569_s16 + $0x20] sm:$0xff]   ;;  %v831_v44 = vld [vmem:[%s12197_s2 + $0x10] sm:$0xff]  ;;  %v836_v46 = vld [vmem:[%s12197_s2 + $0x38] sm:$0xff] }
  0x25   : > { %8648 = vmatprep.subr.bf16.mxu0 %v9442_v1  ;;  %v835_v45 = vld [vmem:[%s12197_s2 + $0x30] sm:$0xff]  ;;  %v9169_v47 = vld [vmem:[%s9569_s16 + $0x28] sm:$0xff]   ;;  %v837_v50 = vld [vmem:[%s12197_s2 + $0x40] sm:$0xff] }
  0x26   : > { %967 = vperm.xlu0 %9154, %v848_v14   ;;  %972 = vperm.xlu1 %9155, %v849_v15   ;;  %v838_v48 = vld [vmem:[%s12197_s2 + $0x48] sm:$0xff]  ;;  %v839_v49 = vld [vmem:[%s12197_s2 + $0x50] sm:$0xff]  ;;  %v841_v51 = vld [vmem:[%s12197_s2 + $0x60] sm:$0xff] }
  0x27   : > { %v9170_v52 = vld [vmem:[%s9569_s16 + $0x30] sm:$0xff]   ;;  %v840_v53 = vld [vmem:[%s12197_s2 + $0x58] sm:$0xff]  ;;  %v829_v54 = vld [vmem:[%s12197_s2] sm:$0xff] }
  0x28   : > { %8649 = vmatpush3.bf16.msra.mxu0 %v9160_v10  ;;  %v830_v55 = vld [vmem:[%s12197_s2 + $0x8] sm:$0xff]  ;;  %v868_v56 = vld [vmem:[%s12197_s2 + $0x138] sm:$0xff]  ;;  %v869_v58 = vld [vmem:[%s12197_s2 + $0x140] sm:$0xf] }
  0x29   : > { %8650 = vmatprep.subr.bf16.mxu0 %v9442_v1  ;;  %v9171_v57 = vld [vmem:[%s9569_s16 + $0x38] sm:$0xff]   ;;  %v9172_v59 = vld [vmem:[%s9569_s16 + $0x40] sm:$0xff]   ;;  %v9173_v60 = vld [vmem:[%s9569_s16 + $0x48] sm:$0xff]  }
  0x2a   : > { %977 = vperm.xlu0 %9154, %v850_v17   ;;  %982 = vperm.xlu1 %9155, %v851_v18   ;;  %v9174_v61 = vld [vmem:[%s9569_s16 + $0x50] sm:$0xff]   ;;  %v9175_v62 = vld [vmem:[%s9569_s16 + $0x58] sm:$0xff]   ;;  %v9176_v63 = vld [vmem:[%s9569_s16 + $0x60] sm:$0xff]  }
  0x2b   : > { %v9177_v0 = vld [vmem:[%s9569_s16 + $0x68] sm:$0xff]   ;;  %v9185_v3 = vld [vmem:[%s12200_s5 + $0x100] sm:$0xff]   ;;  %v9178_v7 = vld [vmem:[%s9569_s16 + $0x70] sm:$0xff]  }
  0x2c   : > { %8651 = vmatpush3.bf16.msra.mxu0 %v9161_v13  ;;  %v9186_v5 = vld [vmem:[%s12200_s5 + $0xc0] sm:$0xff]   ;;  %8932 = vmatprep.subr.bf16.mxu1 %v9185_v3  ;;  %v9187_v8 = vld [vmem:[%s12200_s5 + $0x108] sm:$0xff]   ;;  %v9189_v11 = vld [vmem:[%s12200_s5 + $0x110] sm:$0xff]  }
  0x2d   : > { %8652 = vmatprep.subr.bf16.mxu0 %v9442_v1  ;;  %8940 = vmatpush3.bf16.msra.mxu1 %v9186_v5  ;;  %v9188_v9 = vld [vmem:[%s12200_s5 + $0xc8] sm:$0xff]   ;;  %v9190_v13 = vld [vmem:[%s12200_s5 + $0xd0] sm:$0xff]   ;;  %v9179_v14 = vld [vmem:[%s9569_s16 + $0x78] sm:$0xff]  }
  0x2e   : > { %987 = vperm.xlu0 %9154, %v852_v20   ;;  %992 = vperm.xlu1 %9155, %v853_v21   ;;  %v9191_v15 = vld [vmem:[%s12200_s5 + $0x118] sm:$0xff]   ;;  %v9194_v20 = vld [vmem:[%s12200_s5 + $0xe0] sm:$0xff]   ;;  %vm9998_vm3 = vmor %vm2973_vm1, %vm2974_vm2 }
  0x2f   : > { %8933 = vmatprep.subr.bf16.mxu1 %v9187_v8  ;;  %v9192_v17 = vld [vmem:[%s12200_s5 + $0xd8] sm:$0xff]   ;;  %vm10793_vm6 = vmor %vm3424_vm4, %vm3425_vm5 }
  0x30   : > { %8653 = vmatpush3.bf16.msra.mxu0 %v9162_v16 }
  0x31   : > { %8654 = vmatprep.subr.bf16.mxu0 %v9442_v1  ;;  %8941 = vmatpush3.bf16.msra.mxu1 %v9188_v9 }
  0x32   : > { %997 = vperm.xlu0 %9154, %v854_v23   ;;  %1002 = vperm.xlu1 %9155, %v855_v24   ;;  %v9195_v23 = vld [vmem:[%s12200_s5 + $0x128] sm:$0xff]  }
  0x33   : > { %8934 = vmatprep.subr.bf16.mxu1 %v9189_v11 }
  0x34   : > { %8655 = vmatpush3.bf16.msra.mxu0 %v9163_v19  ;;  %v9193_v19 = vld [vmem:[%s12200_s5 + $0x120] sm:$0xff]  }
  0x35   : > { %8208 = vmatprep.subr.bf16.mxu0 %v9185_v3  ;;  %8942 = vmatpush3.bf16.msra.mxu1 %v9190_v13 }
  0x36   : > { %1007 = vperm.xlu0 %9154, %v856_v25   ;;  %1012 = vperm.xlu1 %9155, %v857_v26   ;;  %v9196_v25 = vld [vmem:[%s12200_s5 + $0xe8] sm:$0xff]   ;;  %v9197_v26 = vld [vmem:[%s12200_s5 + $0x130] sm:$0xff]  }
  0x37   : > { %8657 = vmatmul.mubr.bf16.vlgmr.msra.gmra.mrb[0].mxu0 %v9164_v22  ;;  %8935 = vmatprep.subr.bf16.mxu1 %v9191_v15  ;;  %v9180_v22 = vld [vmem:[%s9569_s16 + $0x80] sm:$0xff]  }
  0x38   : > { %8660 = vmatprep.mubr.msk.bf16.mxu0 %vm9443_vm0, %v9442_v1  ;;  %8209 = vmatpush3.bf16.msra.mxu0 %v9186_v5 }
  0x39   : > { %8210 = vmatprep.subr.bf16.mxu0 %v9187_v8  ;;  %8943 = vmatpush3.bf16.msra.mxu1 %v9192_v17 }
  0x3a   : > { %1017 = vperm.xlu0 %9154, %v858_v28   ;;  %1022 = vperm.xlu1 %9155, %v859_v29   ;;  %v9198_v28 = vld [vmem:[%s12200_s5 + $0xf0] sm:$0xff]  }
  0x3b   : > { %8936 = vmatprep.subr.bf16.mxu1 %v9193_v19 }
  0x3c   : > { %8211 = vmatpush3.bf16.msra.mxu0 %v9188_v9 }
  0x3d   : > { %8212 = vmatprep.subr.bf16.mxu0 %v9189_v11  ;;  %8944 = vmatpush3.bf16.msra.mxu1 %v9194_v20 }
  0x3e   : > { %1027 = vperm.xlu0 %9154, %v860_v30   ;;  %1032 = vperm.xlu1 %9155, %v861_v31   ;;  %v9181_v30 = vld [vmem:[%s9569_s16 + $0x88] sm:$0xff]   ;;  %v9199_v31 = vld [vmem:[%s12200_s5 + $0x138] sm:$0xff]  }
  0x3f   : > { %8661 = vmatmul.mubr.bf16.gmra.mrb[4].mxu0 %v9165_v27  ;;  %8937 = vmatprep.subr.bf16.mxu1 %v9195_v23 }
  0x40   : > { %8664 = vmatprep.mubr.msk.bf16.mxu0 %vm9443_vm0, %v9442_v1  ;;  %8213 = vmatpush3.bf16.msra.mxu0 %v9190_v13 }
  0x41   : > { %8214 = vmatprep.subr.bf16.mxu0 %v9191_v15  ;;  %8945 = vmatpush3.bf16.msra.mxu1 %v9196_v25 }
  0x42   : > { %1037 = vperm.xlu0 %9154, %v862_v33   ;;  %1042 = vperm.xlu1 %9155, %v863_v34  }
  0x43   : > { %8938 = vmatprep.subr.bf16.mxu1 %v9197_v26 }
  0x44   : > { %8215 = vmatpush3.bf16.msra.mxu0 %v9192_v17 }
  0x45   : > { %8216 = vmatprep.subr.bf16.mxu0 %v9193_v19  ;;  %8946 = vmatpush3.bf16.msra.mxu1 %v9198_v28 }
  0x46   : > { %1047 = vperm.xlu0 %9154, %v864_v35   ;;  %1052 = vperm.xlu1 %9155, %v865_v36   ;;  %v9182_v35 = vld [vmem:[%s9569_s16 + $0x90] sm:$0xff]  }
  0x47   : > { %8665 = vmatmul.mubr.bf16.gmra.mrb[8].mxu0 %v9166_v32  ;;  %v9200_v32 = vld [vmem:[%s12200_s5 + $0xf8] sm:$0xff]   ;;  %8939 = vmatprep.subr.bf16.mxu1 %v9199_v31 }
  0x48   : > { %8668 = vmatprep.mubr.msk.bf16.mxu0 %vm9443_vm0, %v9442_v1  ;;  %8217 = vmatpush3.bf16.msra.mxu0 %v9194_v20 }
  0x49   : > { %8218 = vmatprep.subr.bf16.mxu0 %v9195_v23  ;;  %8947 = vmatpush3.bf16.msra.mxu1 %v9200_v32 }
  0x4a   : > { %1057 = vperm.xlu0 %9154, %v866_v38   ;;  %887 = vperm.xlu1 %9155, %v832_v39   ;;  %v9183_v39 = vld [vmem:[%s9569_s16 + $0x98] sm:$0xff]  }
  0x4c   : > { %8219 = vmatpush3.bf16.msra.mxu0 %v9196_v25 }
  0x4d   : > { %8220 = vmatprep.subr.bf16.mxu0 %v9197_v26 }
  0x4e   : > { %1062 = vperm.xlu0 %9154, %v867_v40   ;;  %892 = vperm.xlu1 %9155, %v833_v41  }
  0x4f   : > { %8669 = vmatmul.mubr.bf16.gmra.mrb[12].mxu0 %v9167_v37 }
  0x50   : > { %8672 = vmatprep.mubr.msk.bf16.mxu0 %vm9443_vm0, %v9442_v1  ;;  %8221 = vmatpush3.bf16.msra.mxu0 %v9198_v28 }
  0x51   : > { %8222 = vmatprep.subr.bf16.mxu0 %v9199_v31 }
  0x52   : > { %897 = vperm.xlu0 %9154, %v834_v43   ;;  %882 = vperm.xlu1 %9155, %v831_v44   ;;  %v9184_v43 = vld [vmem:[%s9569_s16 + $0xa0] ss:$0 sps:$4 sm:$0x33]  }
  0x54   : > { %8223 = vmatpush3.bf16.msra.mxu0 %v9200_v32 }
  0x56   : > { %902 = vperm.xlu0 %9154, %v835_v45   ;;  %907 = vperm.xlu1 %9155, %v836_v46  }
  0x57   : > { %8673 = vmatmul.mubr.bf16.gmra.mrb[16].mxu0 %v9168_v42 }
  0x58   : > { %8676 = vmatprep.mubr.msk.bf16.mxu0 %vm9443_vm0, %v9442_v1 }
  0x5a   : > { %917 = vperm.xlu0 %9154, %v838_v48   ;;  %922 = vperm.xlu1 %9155, %v839_v49  }
  0x5e   : > { %912 = vperm.xlu0 %9154, %v837_v50   ;;  %932 = vperm.xlu1 %9155, %v841_v51  }
  0x5f   : > { %8677 = vmatmul.mubr.bf16.gmra.mrb[20].mxu0 %v9169_v47  ;;  %v9203_v47 = vld [vmem:[%s12200_s5 + $0x40] sm:$0xff]  }
  0x60   : > { %8680 = vmatprep.mubr.msk.bf16.mxu0 %vm9443_vm0, %v9442_v1  ;;  %8344 = vmatprep.subr.bf16.mxu0 %v9203_v47 }
  0x62   : > { %927 = vperm.xlu0 %9154, %v840_v53   ;;  %872 = vperm.xlu1 %9155, %v829_v54  }
  0x66   : > { %877 = vperm.xlu0 %9154, %v830_v55   ;;  %1067 = vperm.xlu1 %9155, %v868_v56  }
  0x67   : > { %8681 = vmatmul.mubr.bf16.gmra.mrb[24].mxu0 %v9170_v52 }
  0x68   : > { %8684 = vmatprep.mubr.msk.bf16.mxu0 %vm9443_vm0, %v9442_v1 }
  0x6a   : > { %1072 = vperm.xlu0 %9154, %v869_v58  }
  0x6f   : > { %8685 = vmatmul.mubr.bf16.gmra.mrb[28].mxu0 %v9171_v57 }
  0x70   : > { %8688 = vmatprep.mubr.msk.bf16.mxu0 %vm9443_vm0, %v9442_v1 }
  0x77   : > { %8689 = vmatmul.mubr.bf16.gmra.mrb[32].mxu0 %v9172_v59 }
  0x78   : > { %8692 = vmatprep.mubr.msk.bf16.mxu0 %vm9443_vm0, %v9442_v1 }
  0x7f   : > { %8693 = vmatmul.mubr.bf16.gmra.mrb[36].mxu0 %v9173_v60  ;;  %v9445_v60 = vmov 1983009808  }
  0x80   : > { %8696 = vmatprep.mubr.msk.bf16.mxu0 %vm9443_vm0, %v9442_v1 }
  0x87   : > { %8697 = vmatmul.mubr.bf16.gmra.mrb[40].mxu0 %v9174_v61  ;;  %v1159_v61 = vunpack.c.l.s4 %v9445_v60 }
  0x88   : > { %8700 = vmatprep.mubr.msk.bf16.mxu0 %vm9443_vm0, %v9442_v1 }
  0x89   : > { %v1160_v5 = vunpack.c.0.s8 %v1159_v61 }
  0x8f   : > { %8701 = vmatmul.mubr.bf16.gmra.mrb[44].mxu0 %v9175_v62  ;;  %v1161_v62 = vlaneseq }
  0x90   : > { %8704 = vmatprep.mubr.msk.bf16.mxu0 %vm9443_vm0, %v9442_v1 }
  0x97   : > { %8705 = vmatmul.mubr.bf16.gmra.mrb[48].mxu0 %v9176_v63 }
  0x98   : > { %8708 = vmatprep.mubr.msk.bf16.mxu0 %vm9443_vm0, %v9442_v1 }
  0x99   : > { %v9754_v2 = vpop.permute.xlu0 %937  ;;  %v9761_v4 = vpop.permute.xlu1 %947 }
  0x9d   : > { %v9766_v6 = vpop.permute.xlu0 %942  ;;  %v9775_v10 = vpop.permute.xlu1 %952 }
  0x9f   : > { %8709 = vmatmul.mubr.bf16.gmra.mrb[52].mxu0 %v9177_v0  ;;  %v9897_v0 = vld [vmem:[%s12199_s4] ss:$0 sm:$0xff] }
  0xa0   : > { %8712 = vmatprep.mubr.msk.bf16.mxu0 %vm9443_vm0, %v9442_v1 }
  0xa1   : > { %v9782_v12 = vpop.permute.xlu0 %957  ;;  %v9791_v16 = vpop.permute.xlu1 %962 }
  0xa5   : > { %v9796_v18 = vpop.permute.xlu0 %967  ;;  %v9806_v21 = vpop.permute.xlu1 %972 }
  0xa7   : > { %8713 = vmatmul.mubr.bf16.gmra.mrb[56].mxu0 %v9178_v7  ;;  %v1162_v7 = vshrl.u32 %v1161_v62, 7 }
  0xa8   : > { %8716 = vmatprep.mubr.msk.bf16.mxu0 %vm9443_vm0, %v9442_v1 }
  0xa9   : > { %v9812_v24 = vpop.permute.xlu0 %977  ;;  %v9822_v27 = vpop.permute.xlu1 %982  ;;  %v9903_v20 = vsub.s32 %v1160_v5, %v1162_v7 }
  0xad   : > { %v9827_v29 = vpop.permute.xlu0 %987  ;;  %v9836_v33 = vpop.permute.xlu1 %992 }
  0xaf   : > { %8717 = vmatmul.mubr.bf16.gmra.mrb[60].mxu0 %v9179_v14 }
  0xb0   : > { %8720 = vmatprep.mubr.msk.bf16.mxu0 %vm9443_vm0, %v9442_v1 }
  0xb1   : > { %v9840_v34 = vpop.permute.xlu0 %997  ;;  %v9843_v36 = vpop.permute.xlu1 %1002 }
  0xb5   : > { %v9845_v37 = vpop.permute.xlu0 %1007  ;;  %v9849_v38 = vpop.permute.xlu1 %1012 }
  0xb7   : > { %8721 = vmatmul.mubr.bf16.gmra.mrb[64].mxu0 %v9180_v22 }
  0xb8   : > { %8724 = vmatprep.mubr.msk.bf16.mxu0 %vm9443_vm0, %v9442_v1 }
  0xb9   : > { %v9852_v40 = vpop.permute.xlu0 %1017  ;;  %v9856_v41 = vpop.permute.xlu1 %1022 }
  0xbd   : > { %v9858_v42 = vpop.permute.xlu0 %1027  ;;  %v9861_v44 = vpop.permute.xlu1 %1032 }
  0xbf   : > { %8725 = vmatmul.mubr.bf16.gmra.mrb[68].mxu0 %v9181_v30 }
  0xc0   : > { %8728 = vmatprep.mubr.msk.bf16.mxu0 %vm9443_vm0, %v9442_v1 }
  0xc1   : > { %v9863_v45 = vpop.permute.xlu0 %1037  ;;  %v9865_v46 = vpop.permute.xlu1 %1042 }
  0xc5   : > { %v9870_v48 = vpop.permute.xlu0 %1047 }
  0xc7   : > { %8729 = vmatmul.mubr.bf16.gmra.mrb[72].mxu0 %v9182_v35 }
  0xc8   : > { %8732 = vmatprep.mubr.msk.bf16.mxu0 %vm9443_vm0, %v9442_v1 }
  0xc9   : > { %v9874_v49 = vpop.permute.xlu0 %1057 }
  0xcd   : > { %v9876_v51 = vpop.permute.xlu0 %1062 }
  0xcf   : > { %8733 = vmatmul.mubr.bf16.gmra.mrb[76].mxu0 %v9183_v39 }
  0xd0   : > { %8736 = vmatprep.mubr.msk.bf16.mxu0 %vm9443_vm0, %v9442_v1  ;;  %v9872_v1 = vpop.permute.xlu1 %1052 }
  0xd1   : > { %v9880_v53 = vpop.permute.xlu0 %897 }
  0xd4   : > { %v888_v50 = vpop.permute.xlu1 %887 }
  0xd5   : > { %v9882_v55 = vpop.permute.xlu0 %902 }
  0xd7   : > { %8737 = vmatmul.mubr.bf16.gmra.mrb[80].mxu0 %v9184_v43 }
  0xd8   : > { %v9878_v52 = vpop.permute.xlu1 %892 }
  0xd9   : > { %v9886_v57 = vpop.permute.xlu0 %917 }
  0xdc   : > { %v883_v54 = vpop.permute.xlu1 %882 }
  0xdd   : > { %v9890_v59 = vpop.permute.xlu0 %912 }
  0xe0   : > { %v9884_v56 = vpop.permute.xlu1 %907 }
  0xe1   : > { %v9899_v3 = vpop.permute.xlu0 %927 }
  0xe4   : > { %v9888_v58 = vpop.permute.xlu1 %922 }
  0xe5   : > { %v878_v22 = vpop.permute.xlu0 %877 }
  0xe8   : > { %v9892_v63 = vpop.permute.xlu1 %932 }
  0xec   : > { %v873_v14 = vpop.permute.xlu1 %872 }
 0x10a   : > { %v622_v8 = vpop.f32.mrb[0].mxu0 }
 0x10b   : > { %v623_v9 = vadd.f32 %v9897_v0, %v622_v8  ;;  %v8658_v11 = vpop.f32.mrb[1].mxu0 }
 0x10c   : > { %v625_v13 = vpop.f32.mrb[2].mxu0 }
 0x10d   : > { %v788_v15 = vmax.f32 %v623_v9, 0.0  ;;  %v626_v17 = vadd.f32 %v9897_v0, %v625_v13  ;;  %v8659_v19 = vpop.f32.mrb[3].mxu0 }
 0x10f   : > { %v789_v23 = vmax.f32 %v626_v17, 0.0  ;;  %v1075_v25 = vmul.f32 %v873_v14, %v788_v15 }
 0x111   : > { %v1157_v26 = vcombine.high %v1075_v25, %v1075_v25  ;;  %v1164_v28 = vrot.slane %v1075_v25, %v9903_v20  ;;  %v1076_v30 = vmul.f32 %v878_v22, %v789_v23 }
 0x112   : > { %v630_v31 = vpop.f32.mrb[4].mxu0 }
 0x113   : > { %v1171_v32 = vrot.slane %v1157_v26, %v9903_v20  ;;  %v1172_v35 = vcombine.high %v1164_v28, %v1164_v28  ;;  %v1174_v39 = vcombine.high %v1076_v30, %v1076_v30  ;;  %v1181_v43 = vrot.slane %v1076_v30, %v9903_v20  ;;  %v8662_v47 = vpop.f32.mrb[5].mxu0 }
 0x114   : > { %v631_v60 = vadd.f32 %v9897_v0, %v630_v31  ;;  %v633_v61 = vpop.f32.mrb[6].mxu0 }
 0x115   : > { %v1173_v62 = vcombine.high %v1171_v32, %v1171_v32  ;;  %v1845_v5 = vcombine.low %v1164_v28, %v1172_v35  ;;  %v1188_v7 = vrot.slane %v1174_v39, %v9903_v20  ;;  %v1189_v8 = vcombine.high %v1181_v43, %v1181_v43  ;;  %v8663_v9 = vpop.f32.mrb[7].mxu0 }
 0x116   : > { %v790_v11 = vmax.f32 %v631_v60, 0.0  ;;  %v634_v13 = vadd.f32 %v9897_v0, %v633_v61 }
 0x117   : > { %v1846_v14 = vcombine.low %v1171_v32, %v1173_v62  ;;  %v1190_v15 = vcombine.high %v1188_v7, %v1188_v7  ;;  %v1862_v17 = vcombine.low %v1181_v43, %v1189_v8  ;;  %v1853_v23 = vrot.slane %v1845_v5, %v9903_v20 }
 0x118   : > { %v1077_v19 = vmul.f32 %v883_v54, %v790_v11  ;;  %v791_v22 = vmax.f32 %v634_v13, 0.0 }
 0x119   : > { %v1860_v25 = vrot.slane %v1846_v14, %v9903_v20  ;;  %v1863_v26 = vcombine.low %v1188_v7, %v1190_v15  ;;  %v1870_v47 = vrot.slane %v1862_v17, %v9903_v20 }
 0x11a   : > { %v1191_v30 = vcombine.high %v1077_v19, %v1077_v19  ;;  %v1198_v28 = vrot.slane %v1077_v19, %v9903_v20  ;;  %v1078_v31 = vmul.f32 %v888_v50, %v791_v22  ;;  %v638_v35 = vpop.f32.mrb[8].mxu0 }
 0x11b   : > { %v1861_v39 = vcombine.low %v1853_v23, %v1860_v25  ;;  %v1877_v60 = vrot.slane %v1863_v26, %v9903_v20  ;;  %v639_v32 = vadd.f32 %v9897_v0, %v638_v35  ;;  %v8666_v43 = vpop.f32.mrb[9].mxu0 }
 0x11c   : > { %v1205_v54 = vrot.slane %v1191_v30, %v9903_v20  ;;  %v1206_v61 = vcombine.high %v1198_v28, %v1198_v28  ;;  %v1885_v62 = vrot.slane %v1198_v28, %v9903_v20  ;;  %v1208_v5 = vcombine.high %v1078_v31, %v1078_v31  ;;  %v641_v7 = vpop.f32.mrb[10].mxu0 }
 0x11d   : > { %v1878_v8 = vcombine.low %v1870_v47, %v1877_v60  ;;  %v1215_v9 = vrot.slane %v1078_v31, %v9903_v20  ;;  %v792_v50 = vmax.f32 %v639_v32, 0.0  ;;  %v642_v11 = vadd.f32 %v9897_v0, %v641_v7  ;;  %v8667_v13 = vpop.f32.mrb[11].mxu0 }
 0x11e   : > { %v1886_v14 = vcombine.low %v1206_v61, %v1205_v54  ;;  %v7994_v15 = vpack.c.bf16 %v1885_v62, %v1885_v62  ;;  %v1207_v17 = vcombine.high %v1205_v54, %v1205_v54  ;;  %v1222_v19 = vrot.slane %v1208_v5, %v9903_v20 }
 0x11f   : > { %v8050_v22 = vpack.c.bf16 %v1878_v8, %v1861_v39  ;;  %v1223_v23 = vcombine.high %v1215_v9, %v1215_v9  ;;  %v1079_v25 = vmul.f32 %v9878_v52, %v792_v50  ;;  %v793_v26 = vmax.f32 %v642_v11, 0.0 }
 0x120   : > { %2873 = vst [vmem:[#allocation2 + $0x8] sm:$0x1] %v7994_v15  ;;  %v1887_v30 = vcombine.low %v1207_v17, %v1215_v9  ;;  %v1224_v28 = vcombine.high %v1222_v19, %v1222_v19  ;;  %v1894_v32 = vrot.slane %v1886_v14, %v9903_v20 }
 0x121   : > { %8051 = vst [vmem:[#allocation2] sm:$0xff] %v8050_v22   ;;  %v1903_v35 = vcombine.low %v1223_v23, %v1222_v19  ;;  %v1225_v31 = vcombine.high %v1079_v25, %v1079_v25  ;;  %v1232_v47 = vrot.slane %v1079_v25, %v9903_v20  ;;  %v1080_v60 = vmul.f32 %v9880_v53, %v793_v26 }
 0x122   : > { %v1901_v43 = vrot.slane %v1887_v30, %v9903_v20  ;;  %v646_v54 = vpop.f32.mrb[12].mxu0 }
 0x123   : > { %v1911_v39 = vrot.slane %v1903_v35, %v9903_v20  ;;  %v1239_v52 = vrot.slane %v1225_v31, %v9903_v20  ;;  %v1240_v61 = vcombine.high %v1232_v47, %v1232_v47  ;;  %v1904_v62 = vcombine.low %v1224_v28, %v1232_v47  ;;  %v8670_v5 = vpop.f32.mrb[13].mxu0 }
 0x124   : > { %v1902_v7 = vcombine.low %v1894_v32, %v1901_v43  ;;  %v1242_v8 = vcombine.high %v1080_v60, %v1080_v60  ;;  %v1249_v9 = vrot.slane %v1080_v60, %v9903_v20  ;;  %v647_v50 = vadd.f32 %v9897_v0, %v646_v54  ;;  %v649_v11 = vpop.f32.mrb[14].mxu0 }
 0x125   : > { %v1241_v53 = vcombine.high %v1239_v52, %v1239_v52  ;;  %v1918_v13 = vrot.slane %v1904_v62, %v9903_v20  ;;  %v1926_v14 = vrot.slane %v1240_v61, %v9903_v20  ;;  %v650_v15 = vadd.f32 %v9897_v0, %v649_v11  ;;  %v8671_v17 = vpop.f32.mrb[15].mxu0 }
 0x126   : > { %v7995_v19 = vpack.c.bf16 %v1902_v7, %v1902_v7  ;;  %v1256_v22 = vrot.slane %v1242_v8, %v9903_v20  ;;  %v1257_v23 = vcombine.high %v1249_v9, %v1249_v9  ;;  %v794_v25 = vmax.f32 %v647_v50, 0.0 }
 0x127   : > { %v1919_v26 = vcombine.low %v1911_v39, %v1918_v13  ;;  %v1927_v30 = vcombine.low %v1239_v52, %v1241_v53  ;;  %v7997_v28 = vpack.c.bf16 %v1926_v14, %v1926_v14  ;;  %v795_v35 = vmax.f32 %v650_v15, 0.0  ;;  %v9938_v43 = vld [vmem:[#allocation2 + $0x8] sm:$0x1] }
 0x128   : > { %2874 = vst [vmem:[#allocation2 + $0xc] sm:$0xf] %v7995_v19  ;;  %v1258_v31 = vcombine.high %v1256_v22, %v1256_v22  ;;  %v1928_v47 = vcombine.low %v1249_v9, %v1257_v23  ;;  %v1081_v60 = vmul.f32 %v9882_v55, %v794_v25  ;;  %v9936_v32 = vld [vmem:[#allocation2] sm:$0xf]  ;;  %v2996_v13 = vshll.u32 %v9938_v43, 16 }
 0x129   : > { %v1935_v54 = vrot.slane %v1927_v30, %v9903_v20  ;;  %v7996_v61 = vpack.c.bf16 %v1919_v26, %v1919_v26  ;;  %2876 = vst [vmem:[#allocation2 + $0x14] sm:$0x1] %v7997_v28  ;;  %v1082_v62 = vmul.f32 %v9884_v56, %v795_v35  ;;  %v2977_v39 = vshrl.u32 %v9936_v32, 16  ;;  %v9226_v55 = vld [vmem:[%s12200_s5 + $0x140] sm:$0xff]  }
 0x12a   : > { %v1942_v52 = vrot.slane %v1928_v47, %v9903_v20  ;;  %v1944_v5 = vcombine.low %v1256_v22, %v1258_v31  ;;  %v1259_v7 = vcombine.high %v1081_v60, %v1081_v60  ;;  %v1266_v8 = vrot.slane %v1081_v60, %v9903_v20  ;;  %v654_v9 = vpop.f32.mrb[16].mxu0  ;;  %8740 = vmatprep.subr.bf16.mxu1 %v9226_v55 }
 0x12b   : > { %2875 = vst [vmem:[#allocation2 + $0x10] sm:$0xf] %v7996_v61  ;;  %v1276_v50 = vcombine.high %v1082_v62, %v1082_v62  ;;  %v1283_v11 = vrot.slane %v1082_v62, %v9903_v20  ;;  %v655_v53 = vadd.f32 %v9897_v0, %v654_v9  ;;  %v8674_v56 = vpop.f32.mrb[17].mxu0  ;;  %v9952_v22 = vrot.slane %v2977_v39, 4 }
 0x12c   : > { %v1943_v14 = vcombine.low %v1935_v54, %v1942_v52  ;;  %v1273_v15 = vrot.slane %v1259_v7, %v9903_v20  ;;  %v1274_v17 = vcombine.high %v1266_v8, %v1266_v8  ;;  %v657_v19 = vpop.f32.mrb[18].mxu0  ;;  %v1952_v35 = vrot.slane %v1944_v5, %v9903_v20 }
 0x12d   : > { %v1290_v23 = vrot.slane %v1276_v50, %v9903_v20  ;;  %v1291_v25 = vcombine.high %v1283_v11, %v1283_v11  ;;  %v796_v26 = vmax.f32 %v655_v53, 0.0  ;;  %v658_v30 = vadd.f32 %v9897_v0, %v657_v19  ;;  %v8675_v28 = vpop.f32.mrb[19].mxu0 }
 0x12e   : > { %v1945_v31 = vcombine.low %v1266_v8, %v1274_v17  ;;  %v1967_v47 = vrot.slane %v1273_v15, %v9903_v20  ;;  %v1275_v60 = vcombine.high %v1273_v15, %v1273_v15 }
 0x12f   : > { %v1969_v54 = vcombine.low %v1291_v25, %v1290_v23  ;;  %v1083_v61 = vmul.f32 %v9890_v59, %v796_v26  ;;  %v1292_v62 = vcombine.high %v1290_v23, %v1290_v23  ;;  %v797_v39 = vmax.f32 %v658_v30, 0.0  ;;  %v9959_v52 = vld [vmem:[#allocation2 + $0xc] sm:$0xf] }
 0x130   : > { %v1959_v7 = vrot.slane %v1945_v31, %v9903_v20  ;;  %v8000_v9 = vpack.c.bf16 %v1967_v47, %v1967_v47  ;;  %v1968_v55 = vcombine.low %v1275_v60, %v1283_v11  ;;  %v3845_v50 = vshrl.u32 %v9959_v52, 16 }
 0x131   : > { %v1983_v53 = vrot.slane %v1969_v54, %v9903_v20  ;;  %v1293_v5 = vcombine.high %v1083_v61, %v1083_v61  ;;  %v1300_v8 = vrot.slane %v1083_v61, %v9903_v20  ;;  %v1084_v56 = vmul.f32 %v9886_v57, %v797_v39 }
 0x132   : > { %v1960_v15 = vcombine.low %v1952_v35, %v1959_v7  ;;  %2879 = vst [vmem:[#allocation2 + $0x20] sm:$0x1] %v8000_v9  ;;  %v1976_v59 = vrot.slane %v1968_v55, %v9903_v20  ;;  %v662_v17 = vpop.f32.mrb[20].mxu0  ;;  %v3847_v19 = vrot.slane %v3845_v50, 4  ;;  %v3848_v23 = vshll.u32 %v9959_v52, 16 }
 0x133   : > { %v1307_v25 = vrot.slane %v1293_v5, %v9903_v20  ;;  %v1308_v11 = vcombine.high %v1300_v8, %v1300_v8  ;;  %v1985_v26 = vcombine.low %v1292_v62, %v1300_v8  ;;  %v1310_v30 = vcombine.high %v1084_v56, %v1084_v56  ;;  %v8678_v28 = vpop.f32.mrb[21].mxu0  ;;  %v9973_v55 = vld [vmem:[#allocation2 + $0x10] sm:$0xf] }
 0x134   : > { %v8055_v31 = vpack.c.bf16 %v1960_v15, %v1943_v14  ;;  %v1984_v47 = vcombine.low %v1976_v59, %v1983_v53  ;;  %v1317_v60 = vrot.slane %v1084_v56, %v9903_v20  ;;  %v663_v57 = vadd.f32 %v9897_v0, %v662_v17  ;;  %v665_v35 = vpop.f32.mrb[22].mxu0 }
 0x135   : > { %v1309_v54 = vcombine.high %v1307_v25, %v1307_v25  ;;  %v1986_v61 = vcombine.low %v1308_v11, %v1307_v25  ;;  %v1993_v39 = vrot.slane %v1985_v26, %v9903_v20  ;;  %v1324_v7 = vrot.slane %v1310_v30, %v9903_v20  ;;  %v8679_v9 = vpop.f32.mrb[23].mxu0 }
 0x136   : > { %8156 = vst [vmem:[#allocation2 + $0x18] sm:$0xff] %v8055_v31   ;;  %v8001_v62 = vpack.c.bf16 %v1984_v47, %v1984_v47  ;;  %v1325_v14 = vcombine.high %v1317_v60, %v1317_v60  ;;  %v798_v50 = vmax.f32 %v663_v57, 0.0  ;;  %v666_v53 = vadd.f32 %v9897_v0, %v665_v35 }
 0x137   : > { %v2000_v5 = vrot.slane %v1986_v61, %v9903_v20  ;;  %v2008_v8 = vrot.slane %v1309_v54, %v9903_v20  ;;  %v1326_v56 = vcombine.high %v1324_v7, %v1324_v7  ;;  %v3850_v15 = vrot.slane %v3848_v23, 5 }
 0x138   : > { %2880 = vst [vmem:[#allocation2 + $0x24] sm:$0xf] %v8001_v62  ;;  %v2009_v59 = vcombine.low %v1317_v60, %v1325_v14  ;;  %v1085_v17 = vmul.f32 %v9888_v58, %v798_v50  ;;  %v799_v25 = vmax.f32 %v666_v53, 0.0  ;;  %v3854_v11 = vshll.u32 %v9973_v55, 16 }
 0x139   : > { %v2001_v26 = vcombine.low %v1993_v39, %v2000_v5  ;;  %v8003_v30 = vpack.c.bf16 %v2008_v8, %v2008_v8  ;;  %v2010_v28 = vcombine.low %v1324_v7, %v1326_v56  ;;  %v3851_v31 = vor.u32 %v3850_v15, %v3847_v19 }
 0x13a   : > { %v1327_v47 = vcombine.high %v1085_v17, %v1085_v17  ;;  %v1334_v57 = vrot.slane %v1085_v17, %v9903_v20  ;;  %v1086_v35 = vmul.f32 %v9899_v3, %v799_v25  ;;  %v670_v61 = vpop.f32.mrb[24].mxu0  ;;  %v2980_v54 = vshll.u32 %v9936_v32, 16 }
 0x13b   : > { %v8002_v23 = vpack.c.bf16 %v2001_v26, %v2001_v26  ;;  %2882 = vst [vmem:[#allocation2 + $0x2c] sm:$0x1] %v8003_v30  ;;  %v2024_v60 = vrot.slane %v2010_v28, %v9903_v20  ;;  %v671_v58 = vadd.f32 %v9897_v0, %v670_v61  ;;  %v8682_v9 = vpop.f32.mrb[25].mxu0  ;;  %v9985_v62 = vrot.slane %v3851_v31, 4 }
 0x13c   : > { %v1341_v39 = vrot.slane %v1327_v47, %v9903_v20  ;;  %v1342_v19 = vcombine.high %v1334_v57, %v1334_v57  ;;  %v1344_v7 = vcombine.high %v1086_v35, %v1086_v35  ;;  %v1351_v14 = vrot.slane %v1086_v35, %v9903_v20  ;;  %v673_v50 = vpop.f32.mrb[26].mxu0  ;;  %v3828_v35 = vld [vmem:[#allocation2 + $0x14] sm:$0x1] }
 0x13d   : > { %2881 = vst [vmem:[#allocation2 + $0x28] sm:$0xf] %v8002_v23  ;;  %v2017_v3 = vrot.slane %v2009_v59, %v9903_v20  ;;  %v800_v53 = vmax.f32 %v671_v58, 0.0  ;;  %v674_v5 = vadd.f32 %v9897_v0, %v673_v50  ;;  %v8683_v8 = vpop.f32.mrb[27].mxu0  ;;  %v9991_v56 = vrot.slane %v3854_v11, 5 }
 0x13e   : > { %v1343_v15 = vcombine.high %v1341_v39, %v1341_v39  ;;  %v2026_v17 = vcombine.low %v1334_v57, %v1342_v19  ;;  %v1358_v25 = vrot.slane %v1344_v7, %v9903_v20  ;;  %v1359_v26 = vcombine.high %v1351_v14, %v1351_v14 }
 0x13f   : > { %v2025_v30 = vcombine.low %v2017_v3, %v2024_v60  ;;  %v2049_v28 = vrot.slane %v1351_v14, %v9903_v20  ;;  %v1087_v31 = vmul.f32 %v9892_v63, %v800_v53  ;;  %v801_v47 = vmax.f32 %v674_v5, 0.0 }
 0x140   : > { %v2027_v11 = vcombine.low %v1341_v39, %v1343_v15  ;;  %v2050_v61 = vcombine.low %v1359_v26, %v1358_v25  ;;  %v1360_v23 = vcombine.high %v1358_v25, %v1358_v25  ;;  %v3857_v57 = vsel %vm9998_vm3, %v9985_v62, %v9991_v56 }
 0x141   : > { %v8006_v60 = vpack.c.bf16 %v2049_v28, %v2049_v28  ;;  %v1361_v58 = vcombine.high %v1087_v31, %v1087_v31  ;;  %v1368_v63 = vrot.slane %v1087_v31, %v9903_v20  ;;  %v1088_v9 = vmul.f32 %v9754_v2, %v801_v47 }
 0x142   : > { %v2034_v19 = vrot.slane %v2026_v17, %v9903_v20  ;;  %v2041_v7 = vrot.slane %v2027_v11, %v9903_v20  ;;  %v3858_v14 = vshrl.u32 %v9973_v55, 16  ;;  %v3864_v39 = vshll.u32 %v3828_v35, 16  ;;  %v678_v50 = vpop.f32.mrb[28].mxu0 }
 0x143   : > { %2885 = vst [vmem:[#allocation2 + $0x38] sm:$0x1] %v8006_v60  ;;  %v1375_v3 = vrot.slane %v1361_v58, %v9903_v20  ;;  %v1376_v53 = vcombine.high %v1368_v63, %v1368_v63  ;;  %v2051_v5 = vcombine.low %v1360_v23, %v1368_v63  ;;  %v1378_v62 = vcombine.high %v1088_v9, %v1088_v9  ;;  %v8686_v8 = vpop.f32.mrb[29].mxu0 }
 0x144   : > { %v2042_v15 = vcombine.low %v2034_v19, %v2041_v7  ;;  %v2058_v25 = vrot.slane %v2050_v61, %v9903_v20  ;;  %v1385_v2 = vrot.slane %v1088_v9, %v9903_v20  ;;  %v3860_v26 = vrot.slane %v3858_v14, 4  ;;  %v681_v17 = vpop.f32.mrb[30].mxu0  ;;  %v10017_v8 = vld [vmem:[#allocation2 + $0x18] sm:$0xf] }
 0x145   : > { %v2065_v28 = vrot.slane %v2051_v5, %v9903_v20  ;;  %v2067_v31 = vcombine.low %v1376_v53, %v1375_v3  ;;  %v1377_v47 = vcombine.high %v1375_v3, %v1375_v3  ;;  %v1392_v35 = vrot.slane %v1378_v62, %v9903_v20  ;;  %v8687_v11 = vpop.f32.mrb[31].mxu0 }
 0x146   : > { %v8060_v60 = vpack.c.bf16 %v2042_v15, %v2025_v30  ;;  %v1393_v58 = vcombine.high %v1385_v2, %v1385_v2  ;;  %v3861_v23 = vor.u32 %v3860_v26, %v9991_v56  ;;  %v3866_v63 = vrot.slane %v3864_v39, 5  ;;  %v10026_v39 = vld [vmem:[#allocation2 + $0x1c] sm:$0xf] }
 0x147   : > { %v2066_v19 = vcombine.low %v2058_v25, %v2065_v28  ;;  %v2075_v61 = vrot.slane %v2067_v31, %v9903_v20  ;;  %v1394_v9 = vcombine.high %v1392_v35, %v1392_v35  ;;  %v2068_v7 = vcombine.low %v1377_v47, %v1385_v2  ;;  %v3829_v31 = vld [vmem:[#allocation2 + $0x20] sm:$0x1] }
 0x148   : > { %8157 = vst [vmem:[#allocation2 + $0x30] sm:$0xff] %v8060_v60   ;;  %v2090_v14 = vrot.slane %v1393_v58, %v9903_v20  ;;  %v3862_v53 = vrot.slane %v3861_v23, 4  ;;  %v679_v3 = vadd.f32 %v9897_v0, %v678_v50  ;;  %v682_v5 = vadd.f32 %v9897_v0, %v681_v17  ;;  %v9204_v58 = vld [vmem:[%s12200_s5] sm:$0xff]  }
 0x149   : > { %v8007_v30 = vpack.c.bf16 %v2066_v19, %v2066_v19  ;;  %v2082_v62 = vrot.slane %v2068_v7, %v9903_v20  ;;  %v10024_v56 = vcombine.low %v1392_v35, %v1394_v9  ;;  %v3869_v15 = vshrl.u32 %v10017_v8, 16 }
 0x14a   : > { %v8009_v25 = vpack.c.bf16 %v2090_v14, %v2090_v14  ;;  %v3867_v2 = vsel %vm9998_vm3, %v3862_v53, %v3866_v63  ;;  %v802_v26 = vmax.f32 %v679_v3, 0.0  ;;  %v803_v28 = vmax.f32 %v682_v5, 0.0  ;;  %v686_v47 = vpop.f32.mrb[32].mxu0 }
 0x14b   : > { %2886 = vst [vmem:[#allocation2 + $0x3c] sm:$0xf] %v8007_v30  ;;  %v2083_v50 = vcombine.low %v2075_v61, %v2082_v62  ;;  %v2099_v17 = vrot.slane %v10024_v56, %v9903_v20  ;;  %v7712_v11 = vcombine.low %v3857_v57, %v3867_v2  ;;  %v7696_v35 = vcombine.low %v9959_v52, %v9973_v55  ;;  %v8690_v60 = vpop.f32.mrb[33].mxu0  ;;  %v9205_v57 = vld [vmem:[%s12200_s5 + $0x48] sm:$0xff]  }
 0x14c   : > { %2888 = vst [vmem:[#allocation2 + $0x44] sm:$0x1] %v8009_v25  ;;  %v1089_v23 = vmul.f32 %v9766_v6, %v802_v26  ;;  %v1090_v63 = vmul.f32 %v9761_v4, %v803_v28  ;;  %v3872_v19 = vshll.u32 %v10017_v8, 16  ;;  %v3878_v61 = vshll.u32 %v10026_v39, 16  ;;  %v689_v9 = vpop.f32.mrb[34].mxu0 }
 0x14d   : > { %v8008_v52 = vpack.c.bf16 %v2083_v50, %v2083_v50  ;;  %4837 = vmatprep.mubr.bf16.mxu0 %v7712_v11  ;;  %v3871_v55 = vrot.slane %v3869_v15, 4  ;;  %v3882_v7 = vshrl.u32 %v10026_v39, 16  ;;  %v3888_v14 = vshll.u32 %v3829_v31, 16  ;;  %v8691_v53 = vpop.f32.mrb[35].mxu0  ;;  %v9206_v15 = vld [vmem:[%s12200_s5 + $0x8] sm:$0xff]   ;;  %v9208_v11 = vld [vmem:[%s12200_s5 + $0x50] sm:$0xff]  }
 0x14e   : > { %4838 = vmatmul.mubr.bf16.vlgmr.msra.gmra.mrb[84].mxu0 %v7696_v35  ;;  %v1395_v6 = vcombine.high %v1089_v23, %v1089_v23  ;;  %v1402_v4 = vrot.slane %v1089_v23, %v9903_v20  ;;  %v1412_v3 = vcombine.high %v1090_v63, %v1090_v63  ;;  %v1419_v5 = vrot.slane %v1090_v63, %v9903_v20 }
 0x14f   : > { %2887 = vst [vmem:[#allocation2 + $0x40] sm:$0xf] %v8008_v52  ;;  %v3874_v30 = vrot.slane %v3872_v19, 5  ;;  %v3880_v62 = vrot.slane %v3878_v61, 5  ;;  %v3884_v25 = vrot.slane %v3882_v7, 4  ;;  %v3890_v2 = vrot.slane %v3888_v14, 5  ;;  %8345 = vmatpush3.bf16.msra.mxu0 %v9204_v58 }
 0x150   : > { %v1409_v26 = vrot.slane %v1395_v6, %v9903_v20  ;;  %v1410_v28 = vcombine.high %v1402_v4, %v1402_v4  ;;  %v1426_v31 = vrot.slane %v1412_v3, %v9903_v20  ;;  %v1427_v50 = vcombine.high %v1419_v5, %v1419_v5  ;;  %8346 = vmatprep.subr.bf16.mxu0 %v9205_v57  ;;  %v9209_v57 = vld [vmem:[%s12200_s5 + $0x10] sm:$0xff]   ;;  %v10065_v3 = vld [vmem:[#allocation2 + $0x24] sm:$0xf] }
 0x151   : > { %v3875_v35 = vor.u32 %v3874_v30, %v3871_v55  ;;  %v3885_v60 = vor.u32 %v3884_v25, %v3880_v62  ;;  %v7697_v58 = vcombine.low %v10017_v8, %v10026_v39  ;;  %v687_v23 = vadd.f32 %v9897_v0, %v686_v47  ;;  %v9210_v25 = vld [vmem:[%s12200_s5 + $0x58] sm:$0xff]  }
 0x152   : > { %v1411_v63 = vcombine.high %v1409_v26, %v1409_v26  ;;  %v2092_v19 = vcombine.low %v1402_v4, %v1410_v28  ;;  %v2109_v61 = vcombine.low %v1419_v5, %v1427_v50  ;;  %v2131_v52 = vrot.slane %v1426_v31, %v9903_v20  ;;  %v10060_v7 = vpop.f32.mrb[36].mxu0  ;;  %v10080_v50 = vld [vmem:[#allocation2 + $0x28] sm:$0xf] }
 0x153   : > { %v3876_v14 = vrot.slane %v3875_v35, 4  ;;  %v3886_v53 = vrot.slane %v3885_v60, 4  ;;  %v804_v55 = vmax.f32 %v687_v23, 0.0  ;;  %v1428_v6 = vcombine.high %v1426_v31, %v1426_v31  ;;  %8347 = vmatpush3.bf16.msra.mxu0 %v9206_v15  ;;  %v8694_v8 = vpop.f32.mrb[37].mxu0 }
 0x154   : > { %v2106_v39 = vrot.slane %v2092_v19, %v9903_v20  ;;  %v2108_v47 = vcombine.low %v1409_v26, %v1411_v63  ;;  %v2123_v4 = vrot.slane %v2109_v61, %v9903_v20  ;;  %v8012_v5 = vpack.c.bf16 %v2131_v52, %v2131_v52  ;;  %8348 = vmatprep.subr.bf16.mxu0 %v9208_v11  ;;  %v10069_v30 = vpop.f32.mrb[38].mxu0 }
 0x155   : > { %v3881_v28 = vsel %vm9998_vm3, %v3876_v14, %v3880_v62  ;;  %v3891_v15 = vsel %vm9998_vm3, %v3886_v53, %v3890_v2  ;;  %v1091_v31 = vmul.f32 %v9775_v10, %v804_v55  ;;  %v690_v26 = vadd.f32 %v9897_v0, %v689_v9  ;;  %v8695_v35 = vpop.f32.mrb[39].mxu0  ;;  %v9211_v9 = vld [vmem:[%s12200_s5 + $0x18] sm:$0xff]   ;;  %v9213_v14 = vld [vmem:[%s12200_s5 + $0x60] sm:$0xff]  }
 0x156   : > { %v2107_v11 = vcombine.low %v2099_v17, %v2106_v39  ;;  %v2116_v60 = vrot.slane %v2108_v47, %v9903_v20  ;;  %2891 = vst [vmem:[#allocation2 + $0x50] sm:$0x1] %v8012_v5  ;;  %v7713_v23 = vcombine.low %v3881_v28, %v3891_v15  ;;  %v3893_v62 = vshrl.u32 %v10065_v3, 16  ;;  %v3830_v39 = vld [vmem:[#allocation2 + $0x2c] sm:$0x1] }
 0x157   : > { %v1429_v63 = vcombine.high %v1091_v31, %v1091_v31  ;;  %v1436_v2 = vrot.slane %v1091_v31, %v9903_v20  ;;  %v805_v19 = vmax.f32 %v690_v26, 0.0  ;;  %v3896_v10 = vshll.u32 %v10065_v3, 16  ;;  %8349 = vmatpush3.bf16.msra.mxu0 %v9209_v57 }
 0x158   : > { %v2124_v61 = vcombine.low %v2116_v60, %v2123_v4  ;;  %4845 = vmatprep.mubr.bf16.mxu0 %v7713_v23  ;;  %v3895_v56 = vrot.slane %v3893_v62, 4  ;;  %v3902_v17 = vshll.u32 %v10080_v50, 16  ;;  %v3906_v52 = vshrl.u32 %v10080_v50, 16  ;;  %8350 = vmatprep.subr.bf16.mxu0 %v9210_v25 }
 0x159   : > { %4846 = vmatmul.mubr.bf16.gmra.mrb[88].mxu0 %v7697_v58  ;;  %v1443_v53 = vrot.slane %v1429_v63, %v9903_v20  ;;  %v1444_v57 = vcombine.high %v1436_v2, %v1436_v2  ;;  %v2132_v55 = vcombine.low %v1428_v6, %v1436_v2  ;;  %v1092_v8 = vmul.f32 %v9782_v12, %v805_v19  ;;  %v9214_v58 = vld [vmem:[%s12200_s5 + $0x20] sm:$0xff]   ;;  %v9215_v63 = vld [vmem:[%s12200_s5 + $0x68] sm:$0xff]  }
 0x15a   : > { %v8065_v47 = vpack.c.bf16 %v2124_v61, %v2107_v11  ;;  %v3898_v4 = vrot.slane %v3896_v10, 5  ;;  %v3904_v5 = vrot.slane %v3902_v17, 5  ;;  %v3908_v28 = vrot.slane %v3906_v52, 4  ;;  %v702_v15 = vpop.f32.mrb[40].mxu0 }
 0x15b   : > { %v2133_v31 = vcombine.low %v1444_v57, %v1443_v53  ;;  %v2140_v25 = vrot.slane %v2132_v55, %v9903_v20  ;;  %v1445_v26 = vcombine.high %v1443_v53, %v1443_v53  ;;  %v1446_v35 = vcombine.high %v1092_v8, %v1092_v8  ;;  %8351 = vmatpush3.bf16.msra.mxu0 %v9211_v9  ;;  %v8698_v60 = vpop.f32.mrb[41].mxu0 }
 0x15c   : > { %8158 = vst [vmem:[#allocation2 + $0x48] sm:$0xff] %v8065_v47   ;;  %v1453_v12 = vrot.slane %v1092_v8, %v9903_v20  ;;  %v3899_v6 = vor.u32 %v3898_v4, %v3895_v56  ;;  %v3909_v11 = vor.u32 %v3908_v28, %v3904_v5  ;;  %v3912_v23 = vshll.u32 %v3830_v39, 16  ;;  %8352 = vmatprep.subr.bf16.mxu0 %v9213_v14  ;;  %v10104_v62 = vpop.f32.mrb[42].mxu0  ;;  %v9216_v39 = vld [vmem:[%s12200_s5 + $0x28] sm:$0xff]   ;;  %v10123_v4 = vld [vmem:[#allocation2 + $0x30] sm:$0xf] }
 0x15d   : > { %v2147_v2 = vrot.slane %v2133_v31, %v9903_v20  ;;  %v1460_v19 = vrot.slane %v1446_v35, %v9903_v20  ;;  %v7698_v10 = vcombine.low %v10065_v3, %v10080_v50  ;;  %v695_v9 = vadd.f32 %v9897_v0, %v10060_v7  ;;  %v8699_v61 = vpop.f32.mrb[43].mxu0  ;;  %v9218_v28 = vld [vmem:[%s12200_s5 + $0x70] sm:$0xff]  }
 0x15e   : > { %v1461_v56 = vcombine.high %v1453_v12, %v1453_v12  ;;  %v2149_v17 = vcombine.low %v1445_v26, %v1453_v12  ;;  %v3900_v52 = vrot.slane %v3899_v6, 4  ;;  %v3910_v14 = vrot.slane %v3909_v11, 4  ;;  %v10134_v12 = vld [vmem:[#allocation2 + $0x34] sm:$0xf] }
 0x15f   : > { %v2148_v53 = vcombine.low %v2140_v25, %v2147_v2  ;;  %v1462_v57 = vcombine.high %v1460_v19, %v1460_v19  ;;  %v3914_v55 = vrot.slane %v3912_v23, 5  ;;  %v806_v8 = vmax.f32 %v695_v9, 0.0  ;;  %8353 = vmatpush3.bf16.msra.mxu0 %v9214_v58 }
 0x160   : > { %v2150_v47 = vcombine.low %v1461_v56, %v1460_v19  ;;  %v2157_v3 = vrot.slane %v2149_v17, %v9903_v20  ;;  %v3905_v7 = vsel %vm9998_vm3, %v3900_v52, %v3904_v5  ;;  %v698_v50 = vadd.f32 %v9897_v0, %v10069_v30  ;;  %8354 = vmatprep.subr.bf16.mxu0 %v9215_v63  ;;  %v9220_v52 = vld [vmem:[%s12200_s5 + $0x78] sm:$0xff]  }
 0x161   : > { %v8013_v31 = vpack.c.bf16 %v2148_v53, %v2148_v53  ;;  %v2172_v25 = vrot.slane %v1462_v57, %v9903_v20  ;;  %v3915_v26 = vsel %vm9998_vm3, %v3910_v14, %v3914_v55  ;;  %v1093_v35 = vmul.f32 %v9791_v16, %v806_v8  ;;  %v9219_v16 = vld [vmem:[%s12200_s5 + $0x30] sm:$0xff]  }
 0x162   : > { %v2164_v5 = vrot.slane %v2150_v47, %v9903_v20  ;;  %v7714_v60 = vcombine.low %v3905_v7, %v3915_v26  ;;  %v807_v58 = vmax.f32 %v698_v50, 0.0  ;;  %v703_v30 = vadd.f32 %v9897_v0, %v702_v15  ;;  %v10136_v6 = vpop.f32.mrb[44].mxu0 }
 0x163   : > { %2892 = vst [vmem:[#allocation2 + $0x54] sm:$0xf] %v8013_v31  ;;  %v8015_v11 = vpack.c.bf16 %v2172_v25, %v2172_v25  ;;  %v1463_v23 = vcombine.high %v1093_v35, %v1093_v35  ;;  %v1470_v63 = vrot.slane %v1093_v35, %v9903_v20  ;;  %v3917_v2 = vshrl.u32 %v10123_v4, 16  ;;  %8355 = vmatpush3.bf16.msra.mxu0 %v9216_v39  ;;  %v8702_v19 = vpop.f32.mrb[45].mxu0 }
 0x164   : > { %v2165_v9 = vcombine.low %v2157_v3, %v2164_v5  ;;  %4853 = vmatprep.mubr.bf16.mxu0 %v7714_v60  ;;  %v1094_v15 = vmul.f32 %v9796_v18, %v807_v58  ;;  %v808_v61 = vmax.f32 %v703_v30, 0.0  ;;  %v3920_v56 = vshll.u32 %v10123_v4, 16  ;;  %8356 = vmatprep.subr.bf16.mxu0 %v9218_v28  ;;  %v10145_v17 = vpop.f32.mrb[46].mxu0  ;;  %v3831_v58 = vld [vmem:[#allocation2 + $0x38] sm:$0x1] }
 0x165   : > { %2894 = vst [vmem:[#allocation2 + $0x5c] sm:$0x1] %v8015_v11  ;;  %4854 = vmatmul.mubr.bf16.gmra.mrb[92].mxu0 %v7698_v10  ;;  %v1477_v14 = vrot.slane %v1463_v23, %v9903_v20  ;;  %v1478_v53 = vcombine.high %v1470_v63, %v1470_v63  ;;  %v3919_v57 = vrot.slane %v3917_v2, 4  ;;  %v3926_v55 = vshll.u32 %v10134_v12, 16  ;;  %v8703_v8 = vpop.f32.mrb[47].mxu0  ;;  %v9221_v10 = vld [vmem:[%s12200_s5 + $0x38] sm:$0xff]  }
 0x166   : > { %v8014_v18 = vpack.c.bf16 %v2165_v9, %v2165_v9  ;;  %v1480_v39 = vcombine.high %v1094_v15, %v1094_v15  ;;  %v1487_v47 = vrot.slane %v1094_v15, %v9903_v20  ;;  %v1095_v3 = vmul.f32 %v9806_v21, %v808_v61 }
 0x167   : > { %v1479_v7 = vcombine.high %v1477_v14, %v1477_v14  ;;  %v2173_v50 = vcombine.low %v1470_v63, %v1478_v53  ;;  %v3922_v28 = vrot.slane %v3920_v56, 5  ;;  %v3928_v31 = vrot.slane %v3926_v55, 5  ;;  %8357 = vmatpush3.bf16.msra.mxu0 %v9219_v16 }
 0x168   : > { %2893 = vst [vmem:[#allocation2 + $0x58] sm:$0xf] %v8014_v18  ;;  %v1494_v25 = vrot.slane %v1480_v39, %v9903_v20  ;;  %v1495_v26 = vcombine.high %v1487_v47, %v1487_v47  ;;  %v1497_v35 = vcombine.high %v1095_v3, %v1095_v3  ;;  %v1504_v5 = vrot.slane %v1095_v3, %v9903_v20 }
 0x169   : > { %8358 = vmatprep.subr.bf16.mxu0 %v9220_v52  ;;  %v2174_v60 = vcombine.low %v1477_v14, %v1479_v7  ;;  %v2181_v21 = vrot.slane %v2173_v50, %v9903_v20  ;;  %v3923_v30 = vor.u32 %v3922_v28, %v3919_v57  ;;  %v3930_v11 = vshrl.u32 %v10134_v12, 16  ;;  %v10176_v7 = vld [vmem:[#allocation2 + $0x3c] sm:$0xf]  ;;  %v10178_v50 = vld [vmem:[#allocation2 + $0x40] sm:$0xf] }
 0x16a   : > { %v1496_v23 = vcombine.high %v1494_v25, %v1494_v25  ;;  %v2190_v63 = vcombine.low %v1487_v47, %v1495_v26  ;;  %v10162_v2 = vrot.slane %v1497_v35, %v9903_v20  ;;  %v1512_v19 = vcombine.high %v1504_v5, %v1504_v5  ;;  %v10164_v16 = vpop.f32.mrb[48].mxu0 }
 0x16b   : > { %v2188_v9 = vrot.slane %v2174_v60, %v9903_v20  ;;  %v2213_v15 = vrot.slane %v1504_v5, %v9903_v20  ;;  %v3924_v61 = vrot.slane %v3923_v30, 4  ;;  %v3932_v56 = vrot.slane %v3930_v11, 4  ;;  %8359 = vmatpush3.bf16.msra.mxu0 %v9221_v10  ;;  %v8706_v52 = vpop.f32.mrb[49].mxu0 }
 0x16c   : > { %v2191_v14 = vcombine.low %v1494_v25, %v1496_v23  ;;  %v2198_v53 = vrot.slane %v2190_v63, %v9903_v20  ;;  %v10170_v57 = vcombine.low %v1512_v19, %v10162_v2  ;;  %v3936_v55 = vshll.u32 %v3831_v58, 16  ;;  %v10172_v8 = vpop.f32.mrb[50].mxu0  ;;  %v3832_v19 = vld [vmem:[#allocation2 + $0x44] sm:$0x1] }
 0x16d   : > { %v2189_v18 = vcombine.low %v2181_v21, %v2188_v9  ;;  %v8018_v39 = vpack.c.bf16 %v2213_v15, %v2213_v15  ;;  %v3929_v47 = vsel %vm9998_vm3, %v3924_v61, %v3928_v31  ;;  %v3933_v3 = vor.u32 %v3932_v56, %v3928_v31  ;;  %v8707_v28 = vpop.f32.mrb[51].mxu0 }
 0x16e   : > { %v2205_v10 = vrot.slane %v2191_v14, %v9903_v20  ;;  %v2222_v25 = vrot.slane %v10170_v57, %v9903_v20  ;;  %v3938_v26 = vrot.slane %v3936_v55, 5  ;;  %v7699_v35 = vcombine.low %v10123_v4, %v10134_v12 }
 0x16f   : > { %2897 = vst [vmem:[#allocation2 + $0x68] sm:$0x1] %v8018_v39  ;;  %v3934_v5 = vrot.slane %v3933_v3, 4  ;;  %v706_v60 = vadd.f32 %v9897_v0, %v10104_v62  ;;  %v1513_v31 = vcombine.high %v10162_v2, %v10162_v2  ;;  %v711_v21 = vadd.f32 %v9897_v0, %v10136_v6 }
 0x170   : > { %v2206_v58 = vcombine.low %v2198_v53, %v2205_v10  ;;  %v3941_v30 = vshrl.u32 %v10176_v7, 16  ;;  %v3944_v11 = vshll.u32 %v10176_v7, 16  ;;  %v3950_v23 = vshll.u32 %v10178_v50, 16 }
 0x171   : > { %v3939_v4 = vsel %vm9998_vm3, %v3934_v5, %v3938_v26  ;;  %v809_v12 = vmax.f32 %v706_v60, 0.0  ;;  %v810_v63 = vmax.f32 %v711_v21, 0.0  ;;  %v3954_v62 = vshrl.u32 %v10178_v50, 16 }
 0x172   : > { %v8070_v9 = vpack.c.bf16 %v2206_v58, %v2189_v18  ;;  %v7715_v2 = vcombine.low %v3929_v47, %v3939_v4  ;;  %v3943_v15 = vrot.slane %v3941_v30, 4  ;;  %v3946_v61 = vrot.slane %v3944_v11, 5  ;;  %v10197_v0 = vpop.f32.mrb[52].mxu0  ;;  %v10206_v18 = vld [vmem:[%s12199_s4] ss:$0 sm:$0xff] }
 0x173   : > { %v1096_v6 = vmul.f32 %v9812_v24, %v809_v12  ;;  %v1097_v56 = vmul.f32 %v9822_v27, %v810_v63  ;;  %v3952_v52 = vrot.slane %v3950_v23, 5  ;;  %v3956_v14 = vrot.slane %v3954_v62, 4  ;;  %v8710_v53 = vpop.f32.mrb[53].mxu0 }
 0x174   : > { %8159 = vst [vmem:[#allocation2 + $0x60] sm:$0xff] %v8070_v9   ;;  %4861 = vmatprep.mubr.bf16.mxu0 %v7715_v2  ;;  %v3947_v57 = vor.u32 %v3946_v61, %v3943_v15  ;;  %v3960_v55 = vshll.u32 %v3832_v19, 16  ;;  %v7700_v39 = vcombine.low %v10176_v7, %v10178_v50  ;;  %v714_v24 = vadd.f32 %v10206_v18, %v10145_v17  ;;  %v10210_v47 = vpop.f32.mrb[54].mxu0 }
 0x175   : > { %4862 = vmatmul.mubr.bf16.gmra.mrb[96].mxu0 %v7699_v35  ;;  %v1514_v27 = vcombine.high %v1096_v6, %v1096_v6  ;;  %v1521_v3 = vrot.slane %v1096_v6, %v9903_v20  ;;  %v1531_v28 = vcombine.high %v1097_v56, %v1097_v56  ;;  %v1538_v10 = vrot.slane %v1097_v56, %v9903_v20  ;;  %v8711_v26 = vpop.f32.mrb[55].mxu0 }
 0x176   : > { %v3948_v5 = vrot.slane %v3947_v57, 4  ;;  %v3957_v7 = vor.u32 %v3956_v14, %v3952_v52  ;;  %v3962_v50 = vrot.slane %v3960_v55, 5  ;;  %v811_v60 = vmax.f32 %v714_v24, 0.0  ;;  %v10227_v14 = vld [vmem:[#allocation2 + $0x4] sm:$0xf] }
 0x177   : > { %v1528_v21 = vrot.slane %v1514_v27, %v9903_v20  ;;  %v1529_v58 = vcombine.high %v1521_v3, %v1521_v3  ;;  %v2215_v30 = vcombine.low %v1513_v31, %v1521_v3  ;;  %v1545_v17 = vrot.slane %v1531_v28, %v9903_v20 }
 0x178   : > { %v1546_v11 = vcombine.high %v1538_v10, %v1538_v10  ;;  %v3953_v35 = vsel %vm9998_vm3, %v3948_v5, %v3952_v52  ;;  %v3958_v23 = vrot.slane %v3957_v7, 4  ;;  %v1098_v4 = vmul.f32 %v9827_v29, %v811_v60 }
 0x179   : > { %v2229_v12 = vrot.slane %v2215_v30, %v9903_v20  ;;  %v2231_v63 = vcombine.low %v1529_v58, %v1528_v21  ;;  %v1530_v19 = vcombine.high %v1528_v21, %v1528_v21  ;;  %v1547_v62 = vcombine.high %v1545_v17, %v1545_v17  ;;  %v10238_v58 = vld [vmem:[#allocation2 + $0x48] sm:$0xf] }
 0x17a   : > { %v2254_v9 = vrot.slane %v1546_v11, %v9903_v20  ;;  %v3963_v2 = vsel %vm9998_vm3, %v3958_v23, %v3962_v50  ;;  %v1548_v31 = vcombine.high %v1098_v4, %v1098_v4  ;;  %v1555_v15 = vrot.slane %v1098_v4, %v9903_v20  ;;  %v10224_v61 = vpop.f32.mrb[56].mxu0  ;;  %v10246_v4 = vld [vmem:[#allocation2 + $0x4c] sm:$0xf] }
 0x17b   : > { %v2230_v6 = vcombine.low %v2222_v25, %v2229_v12  ;;  %v2239_v56 = vrot.slane %v2231_v63, %v9903_v20  ;;  %v2232_v52 = vcombine.low %v1530_v19, %v1538_v10  ;;  %v2255_v29 = vcombine.low %v1545_v17, %v1547_v62  ;;  %v8714_v53 = vpop.f32.mrb[57].mxu0  ;;  %v3833_v62 = vld [vmem:[#allocation2 + $0x50] sm:$0x1] }
 0x17c   : > { %v8021_v57 = vpack.c.bf16 %v2254_v9, %v2254_v9  ;;  %v7716_v55 = vcombine.low %v3953_v35, %v3963_v2  ;;  %v1562_v24 = vrot.slane %v1548_v31, %v9903_v20  ;;  %v1563_v27 = vcombine.high %v1555_v15, %v1555_v15  ;;  %v10230_v3 = vpop.f32.mrb[58].mxu0 }
 0x17d   : > { %v8019_v28 = vpack.c.bf16 %v2230_v6, %v2230_v6  ;;  %v2246_v26 = vrot.slane %v2232_v52, %v9903_v20  ;;  %v2263_v5 = vrot.slane %v2255_v29, %v9903_v20  ;;  %v2982_v25 = vrot.slane %v2980_v54, 5  ;;  %v8715_v10 = vpop.f32.mrb[59].mxu0 }
 0x17e   : > { %2900 = vst [vmem:[#allocation2 + $0x74] sm:$0x1] %v8021_v57  ;;  %4869 = vmatprep.mubr.bf16.mxu0 %v7716_v55  ;;  %v1564_v7 = vcombine.high %v1562_v24, %v1562_v24  ;;  %v2256_v50 = vcombine.low %v1555_v15, %v1563_v27  ;;  %v2986_v60 = vshll.u32 %v10227_v14, 16  ;;  %v2990_v21 = vshrl.u32 %v10227_v14, 16 }
 0x17f   : > { %2898 = vst [vmem:[#allocation2 + $0x6c] sm:$0xf] %v8019_v28  ;;  %v2247_v30 = vcombine.low %v2239_v56, %v2246_v26  ;;  %4870 = vmatmul.mubr.bf16.gmra.mrb[100].mxu0 %v7700_v39  ;;  %v2983_v17 = vor.u32 %v2982_v25, %v9952_v22  ;;  %v719_v32 = vadd.f32 %v10206_v18, %v10164_v16  ;;  %v3965_v9 = vshrl.u32 %v10238_v58, 16 }
 0x180   : > { %v2270_v54 = vrot.slane %v2256_v50, %v9903_v20  ;;  %v10244_v11 = vcombine.low %v1562_v24, %v1564_v7  ;;  %v2988_v35 = vrot.slane %v2986_v60, 5  ;;  %v2992_v23 = vrot.slane %v2990_v21, 4  ;;  %v10268_v50 = vld [vmem:[#allocation2 + $0xc] sm:$0xf] }
 0x181   : > { %v8020_v12 = vpack.c.bf16 %v2247_v30, %v2247_v30  ;;  %v2984_v63 = vrot.slane %v2983_v17, 4  ;;  %v812_v19 = vmax.f32 %v719_v32, 0.0  ;;  %v2998_v16 = vrot.slane %v2996_v13, 5 }
 0x182   : > { %v10249_v39 = vcombine.low %v2263_v5, %v2270_v54  ;;  %v2993_v22 = vor.u32 %v2992_v23, %v2988_v35  ;;  %v3968_v2 = vshll.u32 %v10238_v58, 16  ;;  %v10254_v31 = vpop.f32.mrb[60].mxu0  ;;  %v3967_v56 = vrot.slane %v3965_v9, 4 }
 0x183   : > { %2899 = vst [vmem:[#allocation2 + $0x70] sm:$0xf] %v8020_v12  ;;  %v2989_v15 = vsel %vm9998_vm3, %v2984_v63, %v2988_v35  ;;  %v1099_v6 = vmul.f32 %v9836_v33, %v812_v19  ;;  %v3974_v52 = vshll.u32 %v10246_v4, 16  ;;  %v8718_v29 = vpop.f32.mrb[61].mxu0  ;;  %v3978_v55 = vshrl.u32 %v10246_v4, 16 }
 0x184   : > { %v2994_v53 = vrot.slane %v2993_v22, 4  ;;  %v3970_v57 = vrot.slane %v3968_v2, 5  ;;  %v3984_v43 = vshll.u32 %v3833_v62, 16  ;;  %v10261_v13 = vpop.f32.mrb[62].mxu0  ;;  %v2280_v24 = vrot.slane %v10244_v11, %v9903_v20  ;;  %v9314_v11 = vld [vmem:[#allocation2] sm:$0xf] }
 0x185   : > { %v1565_v27 = vcombine.high %v1099_v6, %v1099_v6  ;;  %v1572_v28 = vrot.slane %v1099_v6, %v9903_v20  ;;  %v3976_v26 = vrot.slane %v3974_v52, 5  ;;  %v8719_v5 = vpop.f32.mrb[63].mxu0  ;;  %v3980_v10 = vrot.slane %v3978_v55, 4  ;;  %v10276_v12 = vld [vmem:[#allocation2 + $0x10] sm:$0xf] }
 0x186   : > { %v2999_v33 = vsel %vm9998_vm3, %v2994_v53, %v2998_v16  ;;  %v3971_v25 = vor.u32 %v3970_v57, %v3967_v56  ;;  %v3986_v7 = vrot.slane %v3984_v43, 5  ;;  %v7701_v17 = vcombine.low %v10238_v58, %v10246_v4  ;;  %v2958_v16 = vld [vmem:[#allocation2 + $0x14] sm:$0x1] }
 0x187   : > { %v7648_v60 = vcombine.low %v2989_v15, %v2999_v33  ;;  %v1579_v21 = vrot.slane %v1565_v27, %v9903_v20  ;;  %v1580_v30 = vcombine.high %v1572_v28, %v1572_v28  ;;  %v3981_v54 = vor.u32 %v3980_v10, %v3976_v26 }
 0x188   : > { %v3972_v32 = vrot.slane %v3971_v25, 4  ;;  %v7632_v35 = vcombine.low %v9314_v11, %v10227_v14  ;;  %v722_v23 = vadd.f32 %v10206_v18, %v10172_v8  ;;  %v3001_v9 = vshrl.u32 %v10268_v50, 16 }
 0x189   : > { %5303 = vmatprep.mubr.bf16.mxu0 %v7648_v60  ;;  %v2273_v63 = vcombine.low %v1572_v28, %v1580_v30  ;;  %v2295_v19 = vrot.slane %v1579_v21, %v9903_v20  ;;  %v1581_v62 = vcombine.high %v1579_v21, %v1579_v21  ;;  %v3982_v4 = vrot.slane %v3981_v54, 4  ;;  %v10294_v30 = vld [vmem:[#allocation2 + $0x54] sm:$0xf] }
 0x18a   : > { %v3977_v58 = vsel %vm9998_vm3, %v3972_v32, %v3976_v26  ;;  %5304 = vmatmul.mubr.bf16.vlgmr.msra.gmra.mrb[104].mxu0 %v7632_v35  ;;  %v813_v22 = vmax.f32 %v722_v23, 0.0  ;;  %v3004_v14 = vshll.u32 %v10268_v50, 16  ;;  %v10283_v2 = vpop.f32.mrb[64].mxu0  ;;  %v3003_v6 = vrot.slane %v3001_v9, 4 }
 0x18b   : > { %v2287_v8 = vrot.slane %v2273_v63, %v9903_v20  ;;  %v8024_v15 = vpack.c.bf16 %v2295_v19, %v2295_v19  ;;  %v3010_v56 = vshll.u32 %v10276_v12, 16  ;;  %v8722_v52 = vpop.f32.mrb[65].mxu0  ;;  %v3987_v29 = vsel %vm9998_vm3, %v3982_v4, %v3986_v7  ;;  %v3834_v63 = vld [vmem:[#allocation2 + $0x5c] sm:$0x1] }
 0x18c   : > { %v1100_v53 = vmul.f32 %v9840_v34, %v813_v22  ;;  %v3006_v57 = vrot.slane %v3004_v14, 5  ;;  %v3014_v55 = vshrl.u32 %v10276_v12, 16  ;;  %v10291_v43 = vpop.f32.mrb[66].mxu0  ;;  %v7717_v28 = vcombine.low %v3977_v58, %v3987_v29  ;;  %v9229_v34 = vld [vmem:[%s12200_s5 + $0x148] sm:$0xff]   ;;  %v10303_v58 = vld [vmem:[#allocation2 + $0x58] sm:$0xf] }
 0x18d   : > { %v2288_v27 = vcombine.low %v2280_v24, %v2287_v8  ;;  %2903 = vst [vmem:[#allocation2 + $0x80] sm:$0x1] %v8024_v15  ;;  %v3012_v26 = vrot.slane %v3010_v56, 5  ;;  %v3020_v5 = vshll.u32 %v2958_v16, 16  ;;  %v8723_v33 = vpop.f32.mrb[67].mxu0  ;;  %v727_v32 = vadd.f32 %v10206_v18, %v10197_v0  ;;  %v9315_v0 = vld [vmem:[%s12200_s5 + $0x140] sm:$0xff]  }
 0x18e   : > { %v1582_v25 = vcombine.high %v1100_v53, %v1100_v53  ;;  %v1589_v10 = vrot.slane %v1100_v53, %v9903_v20  ;;  %v3007_v60 = vor.u32 %v3006_v57, %v3003_v6  ;;  %v3016_v21 = vrot.slane %v3014_v55, 4  ;;  %4877 = vmatprep.mubr.bf16.mxu1 %v7717_v28  ;;  %v9232_v14 = vld [vmem:[%s12200_s5 + $0x150] sm:$0xff]  }
 0x18f   : > { %v8075_v7 = vpack.c.bf16 %v2288_v27, %v10249_v39  ;;  %v3022_v24 = vrot.slane %v3020_v5, 5  ;;  %4878 = vmatmul.mubr.bf16.vlgmr.msra.gmra.mrb[0].mxu1 %v7701_v17  ;;  %v814_v9 = vmax.f32 %v727_v32, 0.0  ;;  %v3989_v4 = vshrl.u32 %v10294_v30, 16  ;;  %v9236_v32 = vld [vmem:[%s12200_s5 + $0x158] sm:$0xff]  }
 0x190   : > { %v1596_v54 = vrot.slane %v1582_v25, %v9903_v20  ;;  %v1597_v11 = vcombine.high %v1589_v10, %v1589_v10  ;;  %v2296_v35 = vcombine.low %v1581_v62, %v1589_v10  ;;  %v3008_v23 = vrot.slane %v3007_v60, 4  ;;  %8741 = vmatpush3.bf16.msra.mxu1 %v9315_v0 }
 0x191   : > { %8160 = vst [vmem:[#allocation2 + $0x78] sm:$0xff] %v8075_v7   ;;  %v3017_v19 = vor.u32 %v3016_v21, %v3012_v26  ;;  %v3992_v39 = vshll.u32 %v10294_v30, 16  ;;  %8742 = vmatprep.subr.bf16.mxu1 %v9229_v34  ;;  %v1101_v6 = vmul.f32 %v9843_v36, %v814_v9  ;;  %v3991_v56 = vrot.slane %v3989_v4, 4  ;;  %v10335_v4 = vld [vmem:[#allocation2 + $0x1c] sm:$0xf] }
 0x192   : > { %v2297_v17 = vcombine.low %v1597_v11, %v1596_v54  ;;  %v2304_v22 = vrot.slane %v2296_v35, %v9903_v20  ;;  %v3013_v62 = vsel %vm9998_vm3, %v3008_v23, %v3012_v26  ;;  %v1598_v16 = vcombine.high %v1596_v54, %v1596_v54  ;;  %v10316_v8 = vpop.f32.mrb[68].mxu0  ;;  %v10331_v23 = vld [vmem:[#allocation2 + $0x18] sm:$0xf] }
 0x193   : > { %v3018_v15 = vrot.slane %v3017_v19, 4  ;;  %v3994_v52 = vrot.slane %v3992_v39, 5  ;;  %v8726_v29 = vpop.f32.mrb[69].mxu0  ;;  %v3998_v57 = vshll.u32 %v10303_v58, 16  ;;  %v4002_v55 = vshrl.u32 %v10303_v58, 16 }
 0x194   : > { %v2311_v53 = vrot.slane %v2297_v17, %v9903_v20  ;;  %v4008_v27 = vshll.u32 %v3834_v63, 16  ;;  %v10322_v28 = vpop.f32.mrb[70].mxu0  ;;  %v1599_v5 = vcombine.high %v1101_v6, %v1101_v6  ;;  %v1606_v33 = vrot.slane %v1101_v6, %v9903_v20  ;;  %8743 = vmatpush3.bf16.msra.mxu1 %v9229_v34  ;;  %v9239_v6 = vld [vmem:[%s12200_s5 + $0x160] sm:$0xff]  }
 0x195   : > { %v3023_v26 = vsel %vm9998_vm3, %v3018_v15, %v3022_v24  ;;  %v3995_v25 = vor.u32 %v3994_v52, %v3991_v56  ;;  %v8727_v36 = vpop.f32.mrb[71].mxu0  ;;  %v4000_v21 = vrot.slane %v3998_v57, 5  ;;  %v4004_v7 = vrot.slane %v4002_v55, 4  ;;  %8744 = vmatprep.subr.bf16.mxu1 %v9232_v14  ;;  %v2959_v52 = vld [vmem:[#allocation2 + $0x20] sm:$0x1] }
 0x196   : > { %v2312_v10 = vcombine.low %v2304_v22, %v2311_v53  ;;  %v7649_v60 = vcombine.low %v3013_v62, %v3023_v26  ;;  %v1613_v54 = vrot.slane %v1599_v5, %v9903_v20  ;;  %v1614_v11 = vcombine.high %v1606_v33, %v1606_v33 }
 0x197   : > { %v2313_v35 = vcombine.low %v1598_v16, %v1606_v33  ;;  %v3996_v24 = vrot.slane %v3995_v25, 4  ;;  %v4005_v34 = vor.u32 %v4004_v7, %v4000_v21  ;;  %v4010_v19 = vrot.slane %v4008_v27, 5 }
 0x198   : > { %v8025_v63 = vpack.c.bf16 %v2312_v10, %v2312_v10  ;;  %5311 = vmatprep.mubr.bf16.mxu0 %v7649_v60  ;;  %v7702_v9 = vcombine.low %v10294_v30, %v10303_v58  ;;  %v1615_v39 = vcombine.high %v1613_v54, %v1613_v54  ;;  %v2314_v0 = vcombine.low %v1614_v11, %v1613_v54  ;;  %v10360_v54 = vld [vmem:[#allocation2 + $0x60] sm:$0xf]  ;;  %v9243_v11 = vld [vmem:[%s12200_s5 + $0x168] sm:$0xff]  }
 0x199   : > { %v2321_v17 = vrot.slane %v2313_v35, %v9903_v20  ;;  %v4001_v22 = vsel %vm9998_vm3, %v3996_v24, %v4000_v21  ;;  %8745 = vmatpush3.bf16.msra.mxu1 %v9232_v14  ;;  %v4006_v62 = vrot.slane %v4005_v34, 4  ;;  %v7633_v16 = vcombine.low %v10268_v50, %v10276_v12 }
 0x19a   : > { %2904 = vst [vmem:[#allocation2 + $0x84] sm:$0xf] %v8025_v63  ;;  %v730_v15 = vadd.f32 %v10206_v18, %v10210_v47  ;;  %v3025_v30 = vshrl.u32 %v10331_v23, 16  ;;  %8746 = vmatprep.subr.bf16.mxu1 %v9236_v32  ;;  %v10345_v58 = vpop.f32.mrb[72].mxu0  ;;  %v2328_v56 = vrot.slane %v2314_v0, %v9903_v20  ;;  %v2336_v14 = vrot.slane %v1615_v39, %v9903_v20 }
 0x19b   : > { %v3028_v29 = vshll.u32 %v10331_v23, 16  ;;  %v3034_v50 = vshll.u32 %v10335_v4, 16  ;;  %v8730_v12 = vpop.f32.mrb[73].mxu0  ;;  %v4011_v47 = vsel %vm9998_vm3, %v4006_v62, %v4010_v19  ;;  %5312 = vmatmul.mubr.bf16.gmra.mrb[108].mxu0 %v7633_v16  ;;  %v3038_v55 = vshrl.u32 %v10335_v4, 16 }
 0x19c   : > { %v815_v53 = vmax.f32 %v730_v15, 0.0  ;;  %v3027_v57 = vrot.slane %v3025_v30, 4  ;;  %v10357_v27 = vpop.f32.mrb[74].mxu0  ;;  %v2329_v26 = vcombine.low %v2321_v17, %v2328_v56  ;;  %v8027_v5 = vpack.c.bf16 %v2336_v14, %v2336_v14 }
 0x19d   : > { %v7718_v33 = vcombine.low %v4001_v22, %v4011_v47  ;;  %v3030_v25 = vrot.slane %v3028_v29, 5  ;;  %8747 = vmatpush3.bf16.msra.mxu1 %v9236_v32  ;;  %v8731_v36 = vpop.f32.mrb[75].mxu0  ;;  %v3036_v60 = vrot.slane %v3034_v50, 5  ;;  %v3040_v21 = vrot.slane %v3038_v55, 4 }
 0x19e   : > { %v1102_v10 = vmul.f32 %v9845_v37, %v815_v53  ;;  %v3044_v7 = vshll.u32 %v2959_v52, 16  ;;  %8748 = vmatprep.subr.bf16.mxu1 %v9239_v6  ;;  %v8026_v35 = vpack.c.bf16 %v2329_v26, %v2329_v26  ;;  %2906 = vst [vmem:[#allocation2 + $0x8c] sm:$0x1] %v8027_v5  ;;  %v735_v32 = vadd.f32 %v10206_v18, %v10224_v61 }
 0x19f   : > { %4885 = vmatprep.mubr.bf16.mxu1 %v7718_v33  ;;  %v3031_v24 = vor.u32 %v3030_v25, %v3027_v57  ;;  %v7634_v37 = vcombine.low %v10331_v23, %v10335_v4  ;;  %v3041_v19 = vor.u32 %v3040_v21, %v3036_v60  ;;  %v738_v22 = vadd.f32 %v10206_v18, %v10230_v3  ;;  %v9247_v4 = vld [vmem:[%s12200_s5 + $0x170] sm:$0xff]  }
 0x1a0   : > { %4886 = vmatmul.mubr.bf16.gmra.mrb[4].mxu1 %v7702_v9  ;;  %v1616_v63 = vcombine.high %v1102_v10, %v1102_v10  ;;  %v1623_v34 = vrot.slane %v1102_v10, %v9903_v20  ;;  %v3046_v39 = vrot.slane %v3044_v7, 5  ;;  %2905 = vst [vmem:[#allocation2 + $0x88] sm:$0xf] %v8026_v35  ;;  %v816_v17 = vmax.f32 %v735_v32, 0.0 }
 0x1a1   : > { %v3032_v0 = vrot.slane %v3031_v24, 4  ;;  %v4013_v62 = vshrl.u32 %v10360_v54, 16  ;;  %8749 = vmatpush3.bf16.msra.mxu1 %v9239_v6  ;;  %v3042_v15 = vrot.slane %v3041_v19, 4  ;;  %v4016_v23 = vshll.u32 %v10360_v54, 16  ;;  %v10383_v6 = vld [vmem:[#allocation2 + $0x64] sm:$0xf] }
 0x1a2   : > { %v1630_v61 = vrot.slane %v1616_v63, %v9903_v20  ;;  %v1631_v16 = vcombine.high %v1623_v34, %v1623_v34  ;;  %v10375_v9 = vpop.f32.mrb[76].mxu0  ;;  %8750 = vmatprep.subr.bf16.mxu1 %v9243_v11  ;;  %v1103_v3 = vmul.f32 %v9849_v38, %v816_v17  ;;  %v817_v56 = vmax.f32 %v738_v22, 0.0  ;;  %v3835_v24 = vld [vmem:[#allocation2 + $0x68] sm:$0x1]  ;;  %v10403_v22 = vld [vmem:[#allocation2 + $0x24] sm:$0xf] }
 0x1a3   : > { %v3037_v30 = vsel %vm9998_vm3, %v3032_v0, %v3036_v60  ;;  %v4015_v14 = vrot.slane %v4013_v62, 4  ;;  %v8734_v52 = vpop.f32.mrb[77].mxu0  ;;  %v3047_v12 = vsel %vm9998_vm3, %v3042_v15, %v3046_v39  ;;  %v4018_v47 = vrot.slane %v4016_v23, 5  ;;  %v9250_v60 = vld [vmem:[%s12200_s5 + $0x178] sm:$0xff]   ;;  %v10408_v15 = vld [vmem:[#allocation2 + $0x28] sm:$0xf] }
 0x1a4   : > { %v1632_v29 = vcombine.high %v1630_v61, %v1630_v61  ;;  %v2337_v50 = vcombine.low %v1623_v34, %v1631_v16  ;;  %v10387_v53 = vpop.f32.mrb[78].mxu0  ;;  %v7650_v57 = vcombine.low %v3037_v30, %v3047_v12  ;;  %v1633_v55 = vcombine.high %v1103_v3, %v1103_v3 }
 0x1a5   : > { %v1640_v26 = vrot.slane %v1103_v3, %v9903_v20  ;;  %v1104_v5 = vmul.f32 %v9852_v40, %v817_v56  ;;  %v8735_v38 = vpop.f32.mrb[79].mxu0  ;;  %8751 = vmatpush3.bf16.msra.mxu1 %v9243_v11  ;;  %v4019_v36 = vor.u32 %v4018_v47, %v4015_v14  ;;  %v4022_v10 = vshll.u32 %v10383_v6, 16 }
 0x1a6   : > { %v2338_v33 = vcombine.low %v1630_v61, %v1632_v29  ;;  %v2345_v25 = vrot.slane %v2337_v50, %v9903_v20  ;;  %8752 = vmatprep.subr.bf16.mxu1 %v9247_v4  ;;  %5319 = vmatprep.mubr.bf16.mxu0 %v7650_v57  ;;  %v1647_v21 = vrot.slane %v1633_v55, %v9903_v20  ;;  %v4026_v34 = vshrl.u32 %v10383_v6, 16  ;;  %v2960_v50 = vld [vmem:[#allocation2 + $0x2c] sm:$0x1] }
 0x1a7   : > { %v1648_v7 = vcombine.high %v1640_v26, %v1640_v26  ;;  %v1650_v35 = vcombine.high %v1104_v5, %v1104_v5  ;;  %v1657_v40 = vrot.slane %v1104_v5, %v9903_v20  ;;  %5320 = vmatmul.mubr.bf16.gmra.mrb[112].mxu0 %v7634_v37  ;;  %v4020_v32 = vrot.slane %v4019_v36, 4 }
 0x1a8   : > { %v2352_v11 = vrot.slane %v2338_v33, %v9903_v20  ;;  %v4024_v63 = vrot.slane %v4022_v10, 5  ;;  %v1649_v19 = vcombine.high %v1647_v21, %v1647_v21  ;;  %v4028_v16 = vrot.slane %v4026_v34, 4  ;;  %v10429_v34 = vld [vmem:[#allocation2 + $0x30] sm:$0xf] }
 0x1a9   : > { %v2354_v39 = vcombine.low %v1640_v26, %v1648_v7  ;;  %v10401_v0 = vrot.slane %v1650_v35, %v9903_v20  ;;  %v1665_v17 = vcombine.high %v1657_v40, %v1657_v40  ;;  %8753 = vmatpush3.bf16.msra.mxu1 %v9247_v4  ;;  %v2377_v61 = vrot.slane %v1657_v40, %v9903_v20 }
 0x1aa   : > { %v2353_v62 = vcombine.low %v2345_v25, %v2352_v11  ;;  %v4025_v37 = vsel %vm9998_vm3, %v4020_v32, %v4024_v63  ;;  %v10410_v23 = vpop.f32.mrb[80].mxu0  ;;  %8754 = vmatprep.subr.bf16.mxu1 %v9250_v60  ;;  %v2355_v30 = vcombine.low %v1647_v21, %v1649_v19  ;;  %v4032_v14 = vshll.u32 %v3835_v24, 16  ;;  %v10431_v19 = vld [vmem:[#allocation2 + $0x34] sm:$0xf] }
 0x1ab   : > { %v2362_v3 = vrot.slane %v2354_v39, %v9903_v20  ;;  %v10414_v56 = vcombine.low %v1665_v17, %v10401_v0  ;;  %v8738_v4 = vpop.f32.mrb[81].mxu0  ;;  %v8030_v52 = vpack.c.bf16 %v2377_v61, %v2377_v61  ;;  %v4029_v29 = vor.u32 %v4028_v16, %v4024_v63 }
 0x1ac   : > { %v3049_v12 = vshrl.u32 %v10403_v22, 16  ;;  %v3052_v47 = vshll.u32 %v10403_v22, 16  ;;  %v785_v57 = vpop.f32.mrb[82].mxu0  ;;  %v2369_v55 = vrot.slane %v2355_v30, %v9903_v20  ;;  %v4034_v5 = vrot.slane %v4032_v14, 5 }
 0x1ad   : > { %v2386_v26 = vrot.slane %v10414_v56, %v9903_v20  ;;  %v3058_v38 = vshll.u32 %v10408_v15, 16  ;;  %8755 = vmatpush3.bf16.msra.mxu1 %v9250_v60  ;;  %v8739_v33 = vpop.f32.mrb[83].mxu0  ;;  %2909 = vst [vmem:[#allocation2 + $0x98] sm:$0x1] %v8030_v52  ;;  %v4030_v25 = vrot.slane %v4029_v29, 4  ;;  %v3062_v21 = vshrl.u32 %v10408_v15, 16 }
 0x1ae   : > { %v3051_v36 = vrot.slane %v3049_v12, 4  ;;  %v3054_v10 = vrot.slane %v3052_v47, 5  ;;  %v2370_v7 = vcombine.low %v2362_v3, %v2369_v55  ;;  %v3068_v40 = vshll.u32 %v2960_v50, 16 }
 0x1af   : > { %v3060_v35 = vrot.slane %v3058_v38, 5  ;;  %v7703_v11 = vcombine.low %v10360_v54, %v10383_v6  ;;  %v4035_v24 = vsel %vm9998_vm3, %v4030_v25, %v4034_v5  ;;  %v3064_v63 = vrot.slane %v3062_v21, 4 }
 0x1b0   : > { %v3055_v32 = vor.u32 %v3054_v10, %v3051_v36  ;;  %v743_v60 = vadd.f32 %v10206_v18, %v10254_v31  ;;  %v8080_v39 = vpack.c.bf16 %v2370_v7, %v2353_v62  ;;  %v7719_v17 = vcombine.low %v4025_v37, %v4035_v24 }
 0x1b1   : > { %v3070_v61 = vrot.slane %v3068_v40, 5  ;;  %v1666_v16 = vcombine.high %v10401_v0, %v10401_v0  ;;  %v3065_v54 = vor.u32 %v3064_v63, %v3060_v35  ;;  %v7635_v3 = vcombine.low %v10403_v22, %v10408_v15  ;;  %v9254_v0 = vld [vmem:[%s12200_s5 + $0x80] sm:$0xff]   ;;  %v2961_v15 = vld [vmem:[#allocation2 + $0x38] sm:$0x1]  ;;  %v10454_v40 = vld [vmem:[#allocation2 + $0x6c] sm:$0xf] }
 0x1b2   : > { %v3056_v30 = vrot.slane %v3055_v32, 4  ;;  %v818_v6 = vmax.f32 %v743_v60, 0.0  ;;  %8161 = vst [vmem:[#allocation2 + $0x90] sm:$0xff] %v8080_v39   ;;  %4893 = vmatprep.mubr.bf16.mxu1 %v7719_v17  ;;  %v746_v31 = vadd.f32 %v10206_v18, %v10261_v13  ;;  %v3073_v14 = vshrl.u32 %v10429_v34, 16  ;;  %8788 = vmatprep.subr.bf16.mxu1 %v9254_v0 }
 0x1b3   : > { %v3076_v62 = vshll.u32 %v10429_v34, 16  ;;  %v3082_v37 = vshll.u32 %v10431_v19, 16  ;;  %v3066_v52 = vrot.slane %v3065_v54, 4  ;;  %4894 = vmatmul.mubr.bf16.gmra.mrb[8].mxu1 %v7703_v11  ;;  %v3086_v13 = vshrl.u32 %v10431_v19, 16  ;;  %v10461_v54 = vld [vmem:[#allocation2 + $0x70] sm:$0xf] }
 0x1b4   : > { %v3061_v4 = vsel %vm9998_vm3, %v3056_v30, %v3060_v35  ;;  %v1105_v22 = vmul.f32 %v9856_v41, %v818_v6  ;;  %v819_v29 = vmax.f32 %v746_v31, 0.0  ;;  %v3075_v50 = vrot.slane %v3073_v14, 4 }
 0x1b5   : > { %v3078_v12 = vrot.slane %v3076_v62, 5  ;;  %v3084_v47 = vrot.slane %v3082_v37, 5  ;;  %v3071_v57 = vsel %vm9998_vm3, %v3066_v52, %v3070_v61  ;;  %v3088_v38 = vrot.slane %v3086_v13, 4  ;;  %v3836_v37 = vld [vmem:[#allocation2 + $0x74] sm:$0x1] }
 0x1b6   : > { %v1667_v55 = vcombine.high %v1105_v22, %v1105_v22  ;;  %v1674_v5 = vrot.slane %v1105_v22, %v9903_v20  ;;  %v7651_v33 = vcombine.low %v3061_v4, %v3071_v57  ;;  %v1106_v25 = vmul.f32 %v9858_v42, %v819_v29 }
 0x1b7   : > { %v3079_v36 = vor.u32 %v3078_v12, %v3075_v50  ;;  %v3092_v41 = vshll.u32 %v2961_v15, 16  ;;  %v3089_v35 = vor.u32 %v3088_v38, %v3084_v47  ;;  %v4037_v6 = vshrl.u32 %v10454_v40, 16 }
 0x1b8   : > { %v1681_v10 = vrot.slane %v1667_v55, %v9903_v20  ;;  %v1682_v21 = vcombine.high %v1674_v5, %v1674_v5  ;;  %v2379_v7 = vcombine.low %v1666_v16, %v1674_v5  ;;  %5327 = vmatprep.mubr.bf16.mxu0 %v7651_v33  ;;  %v1684_v11 = vcombine.high %v1106_v25, %v1106_v25  ;;  %v10479_v33 = vld [vmem:[#allocation2 + $0x3c] sm:$0xf] }
 0x1b9   : > { %v1691_v24 = vrot.slane %v1106_v25, %v9903_v20  ;;  %v3080_v32 = vrot.slane %v3079_v36, 4  ;;  %v3094_v63 = vrot.slane %v3092_v41, 5  ;;  %5328 = vmatmul.mubr.bf16.gmra.mrb[116].mxu0 %v7635_v3  ;;  %v3090_v17 = vrot.slane %v3089_v35, 4 }
 0x1ba   : > { %v2393_v60 = vrot.slane %v2379_v7, %v9903_v20  ;;  %v2395_v39 = vcombine.low %v1682_v21, %v1681_v10  ;;  %v1683_v42 = vcombine.high %v1681_v10, %v1681_v10  ;;  %v1698_v61 = vrot.slane %v1684_v11, %v9903_v20  ;;  %v10485_v21 = vld [vmem:[#allocation2 + $0x40] sm:$0xf] }
 0x1bb   : > { %v1699_v30 = vcombine.high %v1691_v24, %v1691_v24  ;;  %v3085_v16 = vsel %vm9998_vm3, %v3080_v32, %v3084_v47  ;;  %v3095_v3 = vsel %vm9998_vm3, %v3090_v17, %v3094_v63  ;;  %v4039_v22 = vrot.slane %v4037_v6, 4 }
 0x1bc   : > { %v2394_v31 = vcombine.low %v2386_v26, %v2393_v60  ;;  %v2403_v14 = vrot.slane %v2395_v39, %v9903_v20  ;;  %v2396_v62 = vcombine.low %v1683_v42, %v1691_v24  ;;  %v1700_v0 = vcombine.high %v1698_v61, %v1698_v61 }
 0x1bd   : > { %v2418_v4 = vrot.slane %v1699_v30, %v9903_v20  ;;  %v7652_v52 = vcombine.low %v3085_v16, %v3095_v3  ;;  %v4040_v29 = vshll.u32 %v10454_v40, 16  ;;  %v4046_v56 = vshll.u32 %v10461_v54, 16 }
 0x1be   : > { %v8031_v15 = vpack.c.bf16 %v2394_v31, %v2394_v31  ;;  %v2410_v13 = vrot.slane %v2396_v62, %v9903_v20  ;;  %v10474_v26 = vcombine.low %v1698_v61, %v1700_v0  ;;  %v4050_v12 = vshrl.u32 %v10461_v54, 16  ;;  %v10502_v0 = vld [vmem:[#allocation2 + $0x78] sm:$0xf] }
 0x1bf   : > { %v8033_v50 = vpack.c.bf16 %v2418_v4, %v2418_v4  ;;  %5335 = vmatprep.mubr.bf16.mxu0 %v7652_v52  ;;  %v4056_v47 = vshll.u32 %v3836_v37, 16  ;;  %v4042_v55 = vrot.slane %v4040_v29, 5  ;;  %v4048_v5 = vrot.slane %v4046_v56, 5 }
 0x1c0   : > { %2910 = vst [vmem:[#allocation2 + $0x9c] sm:$0xf] %v8031_v15  ;;  %v2411_v57 = vcombine.low %v2403_v14, %v2410_v13  ;;  %v7704_v38 = vcombine.low %v10454_v40, %v10461_v54  ;;  %v2427_v25 = vrot.slane %v10474_v26, %v9903_v20  ;;  %v4052_v36 = vrot.slane %v4050_v12, 4  ;;  %v2962_v54 = vld [vmem:[#allocation2 + $0x44] sm:$0x1] }
 0x1c1   : > { %2912 = vst [vmem:[#allocation2 + $0xa4] sm:$0x1] %v8033_v50  ;;  %v4058_v41 = vrot.slane %v4056_v47, 5  ;;  %v751_v10 = vadd.f32 %v10206_v18, %v10283_v2  ;;  %v4043_v35 = vor.u32 %v4042_v55, %v4039_v22  ;;  %v7636_v11 = vcombine.low %v10429_v34, %v10431_v19  ;;  %v10509_v47 = vld [vmem:[#allocation2 + $0x7c] sm:$0xf] }
 0x1c2   : > { %v8032_v7 = vpack.c.bf16 %v2411_v57, %v2411_v57  ;;  %v754_v40 = vadd.f32 %v10206_v18, %v10291_v43  ;;  %v4053_v24 = vor.u32 %v4052_v36, %v4048_v5  ;;  %v3097_v63 = vshrl.u32 %v10479_v33, 16 }
 0x1c3   : > { %v820_v32 = vmax.f32 %v751_v10, 0.0  ;;  %v3100_v60 = vshll.u32 %v10479_v33, 16  ;;  %v4044_v39 = vrot.slane %v4043_v35, 4  ;;  %5336 = vmatmul.mubr.bf16.gmra.mrb[120].mxu0 %v7636_v11  ;;  %v3106_v42 = vshll.u32 %v10485_v21, 16 }
 0x1c4   : > { %2911 = vst [vmem:[#allocation2 + $0xa0] sm:$0xf] %v8032_v7  ;;  %v821_v2 = vmax.f32 %v754_v40, 0.0  ;;  %v3110_v17 = vshrl.u32 %v10485_v21, 16  ;;  %v4054_v61 = vrot.slane %v4053_v24, 4  ;;  %v3099_v19 = vrot.slane %v3097_v63, 4 }
 0x1c5   : > { %v1107_v34 = vmul.f32 %v9861_v44, %v820_v32  ;;  %v3102_v30 = vrot.slane %v3100_v60, 5  ;;  %v4049_v43 = vsel %vm9998_vm3, %v4044_v39, %v4048_v5  ;;  %v3108_v6 = vrot.slane %v3106_v42, 5 }
 0x1c6   : > { %v1108_v16 = vmul.f32 %v9863_v45, %v821_v2  ;;  %v3112_v31 = vrot.slane %v3110_v17, 4  ;;  %v4059_v14 = vsel %vm9998_vm3, %v4054_v61, %v4058_v41  ;;  %v3116_v29 = vshll.u32 %v2962_v54, 16 }
 0x1c7   : > { %v1701_v62 = vcombine.high %v1107_v34, %v1107_v34  ;;  %v1708_v3 = vrot.slane %v1107_v34, %v9903_v20  ;;  %v3103_v37 = vor.u32 %v3102_v30, %v3099_v19  ;;  %v7720_v44 = vcombine.low %v4049_v43, %v4059_v14 }
 0x1c8   : > { %v1718_v4 = vcombine.high %v1108_v16, %v1108_v16  ;;  %v1725_v52 = vrot.slane %v1108_v16, %v9903_v20  ;;  %v3113_v22 = vor.u32 %v3112_v31, %v3108_v6  ;;  %v4061_v57 = vshrl.u32 %v10502_v0, 16 }
 0x1c9   : > { %v1715_v15 = vrot.slane %v1701_v62, %v9903_v20  ;;  %v1716_v45 = vcombine.high %v1708_v3, %v1708_v3  ;;  %v3104_v13 = vrot.slane %v3103_v37, 4  ;;  %4901 = vmatprep.mubr.bf16.mxu1 %v7720_v44  ;;  %v3118_v41 = vrot.slane %v3116_v29, 5  ;;  %v10537_v62 = vld [vmem:[#allocation2 + $0x4c] sm:$0xf] }
 0x1ca   : > { %v10507_v56 = vrot.slane %v1718_v4, %v9903_v20  ;;  %v1733_v50 = vcombine.high %v1725_v52, %v1725_v52  ;;  %v3114_v12 = vrot.slane %v3113_v22, 4  ;;  %4902 = vmatmul.mubr.bf16.gmra.mrb[12].mxu1 %v7704_v38  ;;  %v4063_v35 = vrot.slane %v4061_v57, 4  ;;  %v3837_v38 = vld [vmem:[#allocation2 + $0x80] sm:$0x1] }
 0x1cb   : > { %v1717_v55 = vcombine.high %v1715_v15, %v1715_v15  ;;  %v2420_v5 = vcombine.low %v1708_v3, %v1716_v45  ;;  %v3109_v36 = vsel %vm9998_vm3, %v3104_v13, %v3108_v6  ;;  %v4064_v11 = vshll.u32 %v10502_v0, 16  ;;  %v10531_v6 = vld [vmem:[#allocation2 + $0x48] sm:$0xf]  ;;  %v2963_v45 = vld [vmem:[#allocation2 + $0x50] sm:$0x1] }
 0x1cc   : > { %v2437_v10 = vcombine.low %v1725_v52, %v1733_v50  ;;  %v2459_v7 = vrot.slane %v10507_v56, %v9903_v20  ;;  %v3119_v32 = vsel %vm9998_vm3, %v3114_v12, %v3118_v41  ;;  %v4070_v63 = vshll.u32 %v10509_v47, 16 }
 0x1cd   : > { %v2434_v40 = vrot.slane %v2420_v5, %v9903_v20  ;;  %v2436_v24 = vcombine.low %v1715_v15, %v1717_v55  ;;  %v7653_v2 = vcombine.low %v3109_v36, %v3119_v32  ;;  %v4066_v42 = vrot.slane %v4064_v11, 5 }
 0x1ce   : > { %v2451_v60 = vrot.slane %v2437_v10, %v9903_v20  ;;  %v8036_v39 = vpack.c.bf16 %v2459_v7, %v2459_v7  ;;  %v4072_v34 = vrot.slane %v4070_v63, 5  ;;  %v4074_v19 = vshrl.u32 %v10509_v47, 16 }
 0x1cf   : > { %v2435_v17 = vcombine.low %v2427_v25, %v2434_v40  ;;  %v2444_v61 = vrot.slane %v2436_v24, %v9903_v20  ;;  %5343 = vmatprep.mubr.bf16.mxu0 %v7653_v2  ;;  %v4067_v30 = vor.u32 %v4066_v42, %v4063_v35  ;;  %v4080_v43 = vshll.u32 %v3837_v38, 16  ;;  %v10554_v38 = vld [vmem:[#allocation2 + $0x84] sm:$0xf]  ;;  %v10557_v2 = vld [vmem:[#allocation2 + $0x88] sm:$0xf] }
 0x1d0   : > { %2915 = vst [vmem:[#allocation2 + $0xb0] sm:$0x1] %v8036_v39  ;;  %v7705_v16 = vcombine.low %v10502_v0, %v10509_v47  ;;  %v759_v54 = vadd.f32 %v10206_v18, %v10316_v8  ;;  %v4076_v26 = vrot.slane %v4074_v19, 4  ;;  %v1734_v25 = vcombine.high %v10507_v56, %v10507_v56 }
 0x1d1   : > { %v2452_v31 = vcombine.low %v2444_v61, %v2451_v60  ;;  %v7637_v14 = vcombine.low %v10479_v33, %v10485_v21  ;;  %v4068_v3 = vrot.slane %v4067_v30, 4  ;;  %v4082_v37 = vrot.slane %v4080_v43, 5 }
 0x1d2   : > { %v822_v44 = vmax.f32 %v759_v54, 0.0  ;;  %v762_v0 = vadd.f32 %v10206_v18, %v10322_v28  ;;  %v4077_v8 = vor.u32 %v4076_v26, %v4072_v34  ;;  %v3121_v52 = vshrl.u32 %v10531_v6, 16 }
 0x1d3   : > { %v8085_v4 = vpack.c.bf16 %v2452_v31, %v2435_v17  ;;  %5344 = vmatmul.mubr.bf16.gmra.mrb[124].mxu0 %v7637_v14  ;;  %v3124_v22 = vshll.u32 %v10531_v6, 16  ;;  %v4073_v15 = vsel %vm9998_vm3, %v4068_v3, %v4072_v34  ;;  %v3130_v13 = vshll.u32 %v10537_v62, 16 }
 0x1d4   : > { %v1109_v33 = vmul.f32 %v9865_v46, %v822_v44  ;;  %v823_v21 = vmax.f32 %v762_v0, 0.0  ;;  %v4078_v29 = vrot.slane %v4077_v8, 4  ;;  %v3123_v56 = vrot.slane %v3121_v52, 4 }
 0x1d5   : > { %8162 = vst [vmem:[#allocation2 + $0xa8] sm:$0xff] %v8085_v4   ;;  %v3126_v18 = vrot.slane %v3124_v22, 5  ;;  %v3134_v28 = vshrl.u32 %v10537_v62, 16  ;;  %v3132_v57 = vrot.slane %v3130_v13, 5  ;;  %v3140_v36 = vshll.u32 %v2963_v45, 16 }
 0x1d6   : > { %v1735_v50 = vcombine.high %v1109_v33, %v1109_v33  ;;  %v1742_v12 = vrot.slane %v1109_v33, %v9903_v20  ;;  %v1110_v47 = vmul.f32 %v9870_v48, %v823_v21  ;;  %v4083_v55 = vsel %vm9998_vm3, %v4078_v29, %v4082_v37  ;;  %v10574_v13 = vld [vmem:[#allocation2 + $0x54] sm:$0xf] }
 0x1d7   : > { %v3127_v46 = vor.u32 %v3126_v18, %v3123_v56  ;;  %v3136_v5 = vrot.slane %v3134_v28, 4  ;;  %v7721_v41 = vcombine.low %v4073_v15, %v4083_v55  ;;  %v3142_v39 = vrot.slane %v3140_v36, 5  ;;  %v10579_v28 = vld [vmem:[%s12199_s4] ss:$0 sm:$0xff] }
 0x1d8   : > { %v1749_v10 = vrot.slane %v1735_v50, %v9903_v20  ;;  %v1750_v7 = vcombine.high %v1742_v12, %v1742_v12  ;;  %v2460_v35 = vcombine.low %v1734_v25, %v1742_v12  ;;  %v1752_v11 = vcombine.high %v1110_v47, %v1110_v47  ;;  %v10583_v12 = vld [vmem:[#allocation2 + $0x58] sm:$0xf] }
 0x1d9   : > { %v1759_v40 = vrot.slane %v1110_v47, %v9903_v20  ;;  %v3128_v24 = vrot.slane %v3127_v46, 4  ;;  %v3137_v32 = vor.u32 %v3136_v5, %v3132_v57  ;;  %4909 = vmatprep.mubr.bf16.mxu1 %v7721_v41  ;;  %v4085_v43 = vshrl.u32 %v10554_v38, 16 }
 0x1da   : > { %v2461_v48 = vcombine.low %v1750_v7, %v1749_v10  ;;  %v2468_v63 = vrot.slane %v2460_v35, %v9903_v20  ;;  %v1751_v60 = vcombine.high %v1749_v10, %v1749_v10  ;;  %4910 = vmatmul.mubr.bf16.gmra.mrb[16].mxu1 %v7705_v16  ;;  %v1766_v42 = vrot.slane %v1752_v11, %v9903_v20  ;;  %v3838_v16 = vld [vmem:[#allocation2 + $0x8c] sm:$0x1]  ;;  %v2964_v35 = vld [vmem:[#allocation2 + $0x5c] sm:$0x1] }
 0x1db   : > { %v1767_v17 = vcombine.high %v1759_v40, %v1759_v40  ;;  %v3133_v61 = vsel %vm9998_vm3, %v3128_v24, %v3132_v57  ;;  %v3138_v34 = vrot.slane %v3137_v32, 4  ;;  %v4088_v54 = vshll.u32 %v10554_v38, 16 }
 0x1dc   : > { %v2475_v19 = vrot.slane %v2461_v48, %v9903_v20  ;;  %v2477_v30 = vcombine.low %v1751_v60, %v1759_v40  ;;  %v1768_v31 = vcombine.high %v1766_v42, %v1766_v42  ;;  %v4094_v14 = vshll.u32 %v10557_v2, 16 }
 0x1dd   : > { %v2478_v26 = vcombine.low %v1767_v17, %v1766_v42  ;;  %v3143_v25 = vsel %vm9998_vm3, %v3138_v34, %v3142_v39  ;;  %v4087_v0 = vrot.slane %v4085_v43, 4  ;;  %v4090_v52 = vrot.slane %v4088_v54, 5 }
 0x1de   : > { %v2476_v3 = vcombine.low %v2468_v63, %v2475_v19  ;;  %v2485_v37 = vrot.slane %v2477_v30, %v9903_v20  ;;  %v7654_v44 = vcombine.low %v3133_v61, %v3143_v25  ;;  %v2500_v8 = vrot.slane %v1768_v31, %v9903_v20 }
 0x1df   : > { %v2492_v4 = vrot.slane %v2478_v26, %v9903_v20  ;;  %v4096_v22 = vrot.slane %v4094_v14, 5  ;;  %v4098_v33 = vshrl.u32 %v10557_v2, 16  ;;  %v4104_v21 = vshll.u32 %v3838_v16, 16 }
 0x1e0   : > { %v8037_v15 = vpack.c.bf16 %v2476_v3, %v2476_v3  ;;  %5351 = vmatprep.mubr.bf16.mxu0 %v7654_v44  ;;  %v7706_v45 = vcombine.low %v10554_v38, %v10557_v2  ;;  %v8039_v56 = vpack.c.bf16 %v2500_v8, %v2500_v8  ;;  %v4091_v18 = vor.u32 %v4090_v52, %v4087_v0  ;;  %v10607_v0 = vld [vmem:[#allocation2 + $0x20] sm:$0x1] }
 0x1e1   : > { %v2493_v29 = vcombine.low %v2485_v37, %v2492_v4  ;;  %v767_v50 = vadd.f32 %v10579_v28, %v10345_v58  ;;  %v4100_v47 = vrot.slane %v4098_v33, 4  ;;  %v4106_v57 = vrot.slane %v4104_v21, 5 }
 0x1e2   : > { %2916 = vst [vmem:[#allocation2 + $0xb4] sm:$0xf] %v8037_v15  ;;  %v7638_v55 = vcombine.low %v10531_v6, %v10537_v62  ;;  %v770_v46 = vadd.f32 %v10579_v28, %v10357_v27  ;;  %2918 = vst [vmem:[#allocation2 + $0xbc] sm:$0x1] %v8039_v56  ;;  %v4092_v36 = vrot.slane %v4091_v18, 4  ;;  %v3145_v10 = vshrl.u32 %v10574_v13, 16 }
 0x1e3   : > { %v8038_v5 = vpack.c.bf16 %v2493_v29, %v2493_v29  ;;  %v824_v41 = vmax.f32 %v767_v50, 0.0  ;;  %v4101_v7 = vor.u32 %v4100_v47, %v4096_v22  ;;  %v3148_v11 = vshll.u32 %v10574_v13, 16 }
 0x1e4   : > { %5352 = vmatmul.mubr.bf16.gmra.mrb[128].mxu0 %v7638_v55  ;;  %v825_v58 = vmax.f32 %v770_v46, 0.0  ;;  %v3154_v40 = vshll.u32 %v10583_v12, 16  ;;  %v4097_v6 = vsel %vm9998_vm3, %v4092_v36, %v4096_v22  ;;  %v3147_v62 = vrot.slane %v3145_v10, 4  ;;  %v10610_v22 = vld [vmem:[#allocation2 + $0x94] sm:$0xf] }
 0x1e5   : > { %2917 = vst [vmem:[#allocation2 + $0xb8] sm:$0xf] %v8038_v5  ;;  %v1111_v27 = vmul.f32 %v9872_v1, %v824_v41  ;;  %v3158_v24 = vshrl.u32 %v10583_v12, 16  ;;  %v4102_v32 = vrot.slane %v4101_v7, 4  ;;  %v3150_v48 = vrot.slane %v3148_v11, 5 }
 0x1e6   : > { %v1112_v38 = vmul.f32 %v9874_v49, %v825_v58  ;;  %v3156_v63 = vrot.slane %v3154_v40, 5  ;;  %v3164_v42 = vshll.u32 %v2964_v35, 16  ;;  %v10602_v49 = vld [vmem:[#allocation2 + $0x90] sm:$0xf]  ;;  %v775_v44 = vadd.f32 %v10579_v28, %v10375_v9  ;;  %v3839_v9 = vld [vmem:[#allocation2 + $0x98] sm:$0x1] }
 0x1e7   : > { %v1769_v60 = vcombine.high %v1111_v27, %v1111_v27  ;;  %v1776_v39 = vrot.slane %v1111_v27, %v9903_v20  ;;  %v3160_v2 = vrot.slane %v3158_v24, 4  ;;  %v4107_v17 = vsel %vm9998_vm3, %v4102_v32, %v4106_v57 }
 0x1e8   : > { %v1786_v61 = vcombine.high %v1112_v38, %v1112_v38  ;;  %v1793_v34 = vrot.slane %v1112_v38, %v9903_v20  ;;  %v3151_v1 = vor.u32 %v3150_v48, %v3147_v62  ;;  %v7722_v19 = vcombine.low %v4097_v6, %v4107_v17  ;;  %v10636_v17 = vld [vmem:[#allocation2 + $0x64] sm:$0xf] }
 0x1e9   : > { %v1783_v30 = vrot.slane %v1769_v60, %v9903_v20  ;;  %v1784_v43 = vcombine.high %v1776_v39, %v1776_v39  ;;  %v3161_v54 = vor.u32 %v3160_v2, %v3156_v63  ;;  %v3166_v16 = vrot.slane %v3164_v42, 5 }
 0x1ea   : > { %v1800_v31 = vrot.slane %v1786_v61, %v9903_v20  ;;  %v1801_v26 = vcombine.high %v1793_v34, %v1793_v34  ;;  %v3152_v25 = vrot.slane %v3151_v1, 4  ;;  %4917 = vmatprep.mubr.bf16.mxu1 %v7722_v19  ;;  %v4304_v4 = vrot.slane %v10607_v0, 5  ;;  %v9256_v0 = vld [vmem:[%s12200_s5 + $0x88] sm:$0xff]  }
 0x1eb   : > { %v1785_v14 = vcombine.high %v1783_v30, %v1783_v30  ;;  %v2501_v3 = vcombine.low %v1776_v39, %v1784_v43  ;;  %v3162_v37 = vrot.slane %v3161_v54, 4  ;;  %4918 = vmatmul.mubr.bf16.gmra.mrb[20].mxu1 %v7706_v45  ;;  %v4109_v15 = vshrl.u32 %v10602_v49, 16  ;;  %v2965_v54 = vld [vmem:[#allocation2 + $0x68] sm:$0x1] }
 0x1ec   : > { %v1802_v8 = vcombine.high %v1800_v31, %v1800_v31  ;;  %v2518_v52 = vcombine.low %v1793_v34, %v1801_v26  ;;  %v3157_v21 = vsel %vm9998_vm3, %v3152_v25, %v3156_v63  ;;  %v826_v56 = vmax.f32 %v775_v44, 0.0  ;;  %v10630_v63 = vld [vmem:[#allocation2 + $0x60] sm:$0xf]  ;;  %v1068_v26 = vpop.permute.xlu1 %1067  ;;  %v10646_v44 = vld [vmem:[#allocation2 + $0x9c] sm:$0xf] }
 0x1ed   : > { %v2502_v33 = vcombine.low %v1783_v30, %v1785_v14  ;;  %v3167_v29 = vsel %vm9998_vm3, %v3162_v37, %v3166_v16  ;;  %v2509_v18 = vrot.slane %v2501_v3, %v9903_v20  ;;  %v4111_v45 = vrot.slane %v4109_v15, 4 }
 0x1ee   : > { %v2519_v50 = vcombine.low %v1800_v31, %v1802_v8  ;;  %v7655_v47 = vcombine.low %v3157_v21, %v3167_v29  ;;  %v1113_v55 = vmul.f32 %v9876_v51, %v826_v56  ;;  %v4112_v46 = vshll.u32 %v10602_v49, 16 }
 0x1ef   : > { %v2516_v57 = vrot.slane %v2502_v33, %v9903_v20  ;;  %v4118_v5 = vshll.u32 %v10610_v22, 16  ;;  %v2526_v36 = vrot.slane %v2518_v52, %v9903_v20  ;;  %v4122_v10 = vshrl.u32 %v10610_v22, 16 }
 0x1f0   : > { %v2533_v41 = vrot.slane %v2519_v50, %v9903_v20  ;;  %5359 = vmatprep.mubr.bf16.mxu0 %v7655_v47  ;;  %v4128_v7 = vshll.u32 %v3839_v9, 16  ;;  %v1803_v58 = vcombine.high %v1113_v55, %v1113_v55  ;;  %v1810_v35 = vrot.slane %v1113_v55, %v9903_v20 }
 0x1f1   : > { %v4114_v11 = vrot.slane %v4112_v46, 5  ;;  %v7707_v40 = vcombine.low %v10602_v49, %v10610_v22  ;;  %v2517_v51 = vcombine.low %v2509_v18, %v2516_v57  ;;  %v4120_v27 = vrot.slane %v4118_v5, 5 }
 0x1f2   : > { %v2534_v6 = vcombine.low %v2526_v36, %v2533_v41  ;;  %v4124_v62 = vrot.slane %v4122_v10, 4  ;;  %v1817_v24 = vrot.slane %v1803_v58, %v9903_v20  ;;  %v1818_v32 = vcombine.high %v1810_v35, %v1810_v35  ;;  %v10654_v36 = vld [vmem:[#allocation2 + $0xa0] sm:$0xf] }
 0x1f3   : > { %v2541_v38 = vrot.slane %v1810_v35, %v9903_v20  ;;  %v4115_v48 = vor.u32 %v4114_v11, %v4111_v45  ;;  %v7639_v2 = vcombine.low %v10574_v13, %v10583_v12  ;;  %v778_v42 = vadd.f32 %v10579_v28, %v10387_v53 }
 0x1f4   : > { %v8090_v60 = vpack.c.bf16 %v2534_v6, %v2517_v51  ;;  %v4125_v39 = vor.u32 %v4124_v62, %v4120_v27  ;;  %v2542_v61 = vcombine.low %v1818_v32, %v1817_v24  ;;  %v4130_v19 = vrot.slane %v4128_v7, 5  ;;  %v10660_v51 = vld [vmem:[#allocation2 + $0xa4] sm:$0x1] }
 0x1f5   : > { %v8042_v34 = vpack.c.bf16 %v2541_v38, %v2541_v38  ;;  %v4116_v1 = vrot.slane %v4115_v48, 4  ;;  %5360 = vmatmul.mubr.bf16.gmra.mrb[132].mxu0 %v7639_v2  ;;  %v827_v43 = vmax.f32 %v778_v42, 0.0  ;;  %v3169_v49 = vshrl.u32 %v10630_v63, 16 }
 0x1f6   : > { %8163 = vst [vmem:[#allocation2 + $0xc0] sm:$0xff] %v8090_v60   ;;  %v4126_v30 = vrot.slane %v4125_v39, 4  ;;  %v3172_v31 = vshll.u32 %v10630_v63, 16  ;;  %v1819_v13 = vcombine.high %v1817_v24, %v1817_v24  ;;  %v3178_v12 = vshll.u32 %v10636_v17, 16  ;;  %v10666_v39 = vld [vmem:[#allocation2 + $0x6c] sm:$0xf] }
 0x1f7   : > { %2921 = vst [vmem:[#allocation2 + $0xc8] sm:$0x1] %v8042_v34  ;;  %v4121_v53 = vsel %vm9998_vm3, %v4116_v1, %v4120_v27  ;;  %v3182_v25 = vshrl.u32 %v10636_v17, 16  ;;  %v1114_v14 = vmul.f32 %v1068_v26, %v827_v43  ;;  %v3171_v3 = vrot.slane %v3169_v49, 4  ;;  %v10670_v1 = vld [vmem:[#allocation2 + $0x70] sm:$0xf] }
 0x1f8   : > { %v4131_v16 = vsel %vm9998_vm3, %v4126_v30, %v4130_v19  ;;  %v3174_v37 = vrot.slane %v3172_v31, 5  ;;  %v3180_v52 = vrot.slane %v3178_v12, 5  ;;  %v3188_v33 = vshll.u32 %v2965_v54, 16  ;;  %v2966_v12 = vld [vmem:[#allocation2 + $0x74] sm:$0x1] }
 0x1f9   : > { %v7723_v8 = vcombine.low %v4121_v53, %v4131_v16  ;;  %v3184_v15 = vrot.slane %v3182_v25, 4  ;;  %v1820_v21 = vcombine.high %v1114_v14, %v1114_v14  ;;  %v1827_v29 = vrot.slane %v1114_v14, %v9903_v20 }
 0x1fa   : > { %v3175_v56 = vor.u32 %v3174_v37, %v3171_v3  ;;  %v783_v9 = vadd.f32 %v10579_v28, %v10410_v23  ;;  %v3190_v50 = vrot.slane %v3188_v33, 5  ;;  %v4133_v47 = vshrl.u32 %v10646_v44, 16  ;;  %v1073_v23 = vpop.permute.xlu0 %1072 }
 0x1fb   : > { %4925 = vmatprep.mubr.bf16.mxu1 %v7723_v8  ;;  %v3185_v18 = vor.u32 %v3184_v15, %v3180_v52  ;;  %v4136_v45 = vshll.u32 %v10646_v44, 16  ;;  %v1834_v57 = vrot.slane %v1820_v21, %v9903_v20  ;;  %v1835_v55 = vcombine.high %v1827_v29, %v1827_v29  ;;  %v10685_v8 = vld [vmem:[#allocation2 + $0xa8] sm:$0xf]  ;;  %v10687_v21 = vld [vmem:[#allocation2 + $0xac] sm:$0xf] }
 0x1fc   : > { %4926 = vmatmul.mubr.bf16.gmra.mrb[24].mxu1 %v7707_v40  ;;  %v2543_v46 = vcombine.low %v1819_v13, %v1827_v29  ;;  %v3176_v5 = vrot.slane %v3175_v56, 4  ;;  %v828_v10 = vmax.f32 %v783_v9, 0.0  ;;  %v4135_v7 = vrot.slane %v4133_v47, 4 }
 0x1fd   : > { %v3186_v41 = vrot.slane %v3185_v18, 4  ;;  %v4138_v58 = vrot.slane %v4136_v45, 5  ;;  %v2550_v28 = vrot.slane %v2542_v61, %v9903_v20  ;;  %v2559_v11 = vcombine.low %v1835_v55, %v1834_v57 }
 0x1fe   : > { %v2557_v35 = vrot.slane %v2543_v46, %v9903_v20  ;;  %v3181_v40 = vsel %vm9998_vm3, %v3176_v5, %v3180_v52  ;;  %v1115_v27 = vmul.f32 %v1073_v23, %v828_v10  ;;  %v4142_v24 = vshll.u32 %v10654_v36, 16 }
 0x1ff   : > { %v3191_v6 = vsel %vm9998_vm3, %v3186_v41, %v3190_v50  ;;  %v4139_v62 = vor.u32 %v4138_v58, %v4135_v7  ;;  %v1836_v48 = vcombine.high %v1834_v57, %v1834_v57  ;;  %v4146_v60 = vshrl.u32 %v10654_v36, 16 }
 0x200   : > { %v2558_v32 = vcombine.low %v2550_v28, %v2557_v35  ;;  %v7656_v38 = vcombine.low %v3181_v40, %v3191_v6  ;;  %v1843_v2 = vrot.slane %v1115_v27, %v9903_v20  ;;  %v4144_v61 = vrot.slane %v4142_v24, 5  ;;  %v10697_v28 = vld [vmem:[#allocation2 + $0x78] sm:$0xf]  ;;  %v10700_v27 = vld [vmem:[#allocation2 + $0x7c] sm:$0xf] }
 0x201   : > { %v4140_v42 = vrot.slane %v4139_v62, 4  ;;  %v4152_v34 = vshll.u32 %v10660_v51, 16  ;;  %v2567_v19 = vrot.slane %v2559_v11, %v9903_v20  ;;  %v4148_v43 = vrot.slane %v4146_v60, 4 }
 0x202   : > { %v8043_v30 = vpack.c.bf16 %v2558_v32, %v2558_v32  ;;  %5367 = vmatprep.mubr.bf16.mxu0 %v7656_v38  ;;  %v7640_v54 = vcombine.low %v10630_v63, %v10636_v17  ;;  %v1844_v49 = vcombine.high %v1843_v2, %v1843_v2  ;;  %v2560_v31 = vcombine.low %v1836_v48, %v1843_v2  ;;  %v2967_v48 = vld [vmem:[#allocation2 + $0x80] sm:$0x1] }
 0x203   : > { %v4145_v26 = vsel %vm9998_vm3, %v4140_v42, %v4144_v61  ;;  %v7708_v53 = vcombine.low %v10646_v44, %v10654_v36  ;;  %v4149_v13 = vor.u32 %v4148_v43, %v4144_v61  ;;  %v3193_v25 = vshrl.u32 %v10666_v39, 16 }
 0x204   : > { %2922 = vst [vmem:[#allocation2 + $0xcc] sm:$0xf] %v8043_v30  ;;  %5368 = vmatmul.mubr.bf16.gmra.mrb[136].mxu0 %v7640_v54  ;;  %v3196_v16 = vshll.u32 %v10666_v39, 16  ;;  %v3202_v14 = vshll.u32 %v10670_v1, 16  ;;  %v2574_v63 = vrot.slane %v2560_v31, %v9903_v20  ;;  %v2582_v17 = vrot.slane %v1844_v49, %v9903_v20  ;;  %v10691_v20 = vld [vmem:[#allocation2 + $0xb0] sm:$0x1] }
 0x205   : > { %v4154_v3 = vrot.slane %v4152_v34, 5  ;;  %v3206_v37 = vshrl.u32 %v10670_v1, 16  ;;  %v4150_v44 = vrot.slane %v4149_v13, 4  ;;  %v3195_v52 = vrot.slane %v3193_v25, 4  ;;  %v10710_v34 = vld [vmem:[#allocation2 + $0xb4] sm:$0xf] }
 0x206   : > { %v3198_v15 = vrot.slane %v3196_v16, 5  ;;  %v3204_v33 = vrot.slane %v3202_v14, 5  ;;  %v2575_v29 = vcombine.low %v2567_v19, %v2574_v63  ;;  %v8045_v56 = vpack.c.bf16 %v2582_v17, %v2582_v17  ;;  %v10721_v17 = vld [vmem:[#allocation2 + $0xbc] sm:$0x1] }
 0x207   : > { %v3208_v9 = vrot.slane %v3206_v37, 4  ;;  %v3212_v18 = vshll.u32 %v2966_v12, 16  ;;  %v4155_v50 = vsel %vm9998_vm3, %v4150_v44, %v4154_v3  ;;  %v4157_v45 = vshrl.u32 %v10685_v8, 16 }
 0x208   : > { %v3199_v47 = vor.u32 %v3198_v15, %v3195_v52  ;;  %v4160_v57 = vshll.u32 %v10685_v8, 16  ;;  %v8044_v55 = vpack.c.bf16 %v2575_v29, %v2575_v29  ;;  %2924 = vst [vmem:[#allocation2 + $0xd4] sm:$0x1] %v8045_v56  ;;  %v7724_v46 = vcombine.low %v4145_v26, %v4155_v50  ;;  %v10714_v26 = vld [vmem:[#allocation2 + $0xb8] sm:$0xf] }
 0x209   : > { %v3209_v5 = vor.u32 %v3208_v9, %v3204_v33  ;;  %v4166_v41 = vshll.u32 %v10687_v21, 16  ;;  %v4159_v7 = vrot.slane %v4157_v45, 4  ;;  %v4170_v23 = vshrl.u32 %v10687_v21, 16 }
 0x20a   : > { %v3200_v10 = vrot.slane %v3199_v47, 4  ;;  %v4162_v58 = vrot.slane %v4160_v57, 5  ;;  %2923 = vst [vmem:[#allocation2 + $0xd0] sm:$0xf] %v8044_v55  ;;  %4933 = vmatprep.mubr.bf16.mxu1 %v7724_v46  ;;  %v3214_v11 = vrot.slane %v3212_v18, 5  ;;  %v4176_v6 = vshll.u32 %v10691_v20, 16 }
 0x20b   : > { %v3210_v35 = vrot.slane %v3209_v5, 4  ;;  %v4168_v40 = vrot.slane %v4166_v41, 5  ;;  %4934 = vmatmul.mubr.bf16.gmra.mrb[28].mxu1 %v7708_v53  ;;  %v4172_v32 = vrot.slane %v4170_v23, 4  ;;  %v7641_v38 = vcombine.low %v10666_v39, %v10670_v1  ;;  %v10731_v57 = vld [vmem:[#allocation2 + $0x88] sm:$0xf] }
 0x20c   : > { %v3205_v62 = vsel %vm9998_vm3, %v3200_v10, %v3204_v33  ;;  %v4163_v24 = vor.u32 %v4162_v58, %v4159_v7  ;;  %v4178_v2 = vrot.slane %v4176_v6, 5  ;;  %v3217_v42 = vshrl.u32 %v10697_v28, 16  ;;  %v2968_v58 = vld [vmem:[#allocation2 + $0x8c] sm:$0x1] }
 0x20d   : > { %v3215_v60 = vsel %vm9998_vm3, %v3210_v35, %v3214_v11  ;;  %v3220_v61 = vshll.u32 %v10697_v28, 16  ;;  %v4173_v43 = vor.u32 %v4172_v32, %v4168_v40  ;;  %v3226_v54 = vshll.u32 %v10700_v27, 16 }
 0x20e   : > { %v7657_v19 = vcombine.low %v3205_v62, %v3215_v60  ;;  %v4164_v30 = vrot.slane %v4163_v24, 4  ;;  %v3219_v49 = vrot.slane %v3217_v42, 4  ;;  %v3230_v39 = vshrl.u32 %v10700_v27, 16  ;;  %v10743_v24 = vld [vmem:[#allocation2 + $0xc0] sm:$0xf] }
 0x20f   : > { %v3222_v31 = vrot.slane %v3220_v61, 5  ;;  %v3236_v1 = vshll.u32 %v2967_v48, 16  ;;  %v4174_v13 = vrot.slane %v4173_v43, 4  ;;  %v3228_v12 = vrot.slane %v3226_v54, 5 }
 0x210   : > { %5375 = vmatprep.mubr.bf16.mxu0 %v7657_v19  ;;  %v4169_v53 = vsel %vm9998_vm3, %v4164_v30, %v4168_v40  ;;  %v4181_v25 = vshrl.u32 %v10710_v34, 16  ;;  %v7709_v16 = vcombine.low %v10685_v8, %v10687_v21  ;;  %v3232_v63 = vrot.slane %v3230_v39, 4  ;;  %v10728_v8 = vld [vmem:[#allocation2 + $0x84] sm:$0xf]  ;;  %v10756_v39 = vld [vmem:[#allocation2 + $0x90] sm:$0xf] }
 0x211   : > { %5376 = vmatmul.mubr.bf16.gmra.mrb[140].mxu0 %v7641_v38  ;;  %v3223_v14 = vor.u32 %v3222_v31, %v3219_v49  ;;  %v4184_v3 = vshll.u32 %v10710_v34, 16  ;;  %v4179_v37 = vsel %vm9998_vm3, %v4174_v13, %v4178_v2  ;;  %v4190_v52 = vshll.u32 %v10714_v26, 16  ;;  %v10747_v19 = vld [vmem:[#allocation2 + $0xc4] sm:$0xf]  ;;  %v10753_v49 = vld [vmem:[#allocation2 + $0xc8] sm:$0x1] }
 0x212   : > { %v4183_v44 = vrot.slane %v4181_v25, 4  ;;  %v4194_v15 = vshrl.u32 %v10714_v26, 16  ;;  %v7725_v33 = vcombine.low %v4169_v53, %v4179_v37  ;;  %v3233_v56 = vor.u32 %v3232_v63, %v3228_v12  ;;  %v10762_v37 = vld [vmem:[#allocation2 + $0x94] sm:$0xf] }
 0x213   : > { %v3224_v29 = vrot.slane %v3223_v14, 4  ;;  %v4186_v9 = vrot.slane %v4184_v3, 5  ;;  %v3238_v18 = vrot.slane %v3236_v1, 5  ;;  %v4192_v50 = vrot.slane %v4190_v52, 5 }
 0x214   : > { %v4196_v47 = vrot.slane %v4194_v15, 4  ;;  %v4200_v45 = vshll.u32 %v10721_v17, 16  ;;  %4941 = vmatprep.mubr.bf16.mxu1 %v7725_v33  ;;  %v3234_v46 = vrot.slane %v3233_v56, 4  ;;  %v7710_v41 = vcombine.low %v10710_v34, %v10714_v26 }
 0x215   : > { %v3229_v55 = vsel %vm9998_vm3, %v3224_v29, %v3228_v12  ;;  %v4187_v5 = vor.u32 %v4186_v9, %v4183_v44  ;;  %4942 = vmatmul.mubr.bf16.gmra.mrb[32].mxu1 %v7709_v16  ;;  %v3241_v23 = vshrl.u32 %v10728_v8, 16  ;;  %v3244_v35 = vshll.u32 %v10728_v8, 16  ;;  %v2969_v29 = vld [vmem:[#allocation2 + $0x98] sm:$0x1] }
 0x216   : > { %v4197_v10 = vor.u32 %v4196_v47, %v4192_v50  ;;  %v4202_v7 = vrot.slane %v4200_v45, 5  ;;  %v3239_v11 = vsel %vm9998_vm3, %v3234_v46, %v3238_v18  ;;  %v3250_v6 = vshll.u32 %v10731_v57, 16 }
 0x217   : > { %v4188_v40 = vrot.slane %v4187_v5, 4  ;;  %v3254_v62 = vshrl.u32 %v10731_v57, 16  ;;  %v7658_v32 = vcombine.low %v3229_v55, %v3239_v11  ;;  %v3243_v48 = vrot.slane %v3241_v23, 4 }
 0x218   : > { %v4198_v38 = vrot.slane %v4197_v10, 4  ;;  %v3246_v60 = vrot.slane %v3244_v35, 5  ;;  %v7642_v2 = vcombine.low %v10697_v28, %v10700_v27  ;;  %v3252_v42 = vrot.slane %v3250_v6, 5 }
 0x219   : > { %v3256_v61 = vrot.slane %v3254_v62, 4  ;;  %v3260_v34 = vshll.u32 %v2968_v58, 16  ;;  %5383 = vmatprep.mubr.bf16.mxu0 %v7658_v32  ;;  %v4193_v30 = vsel %vm9998_vm3, %v4188_v40, %v4192_v50  ;;  %v4205_v31 = vshrl.u32 %v10743_v24, 16 }
 0x21a   : > { %v4203_v43 = vsel %vm9998_vm3, %v4198_v38, %v4202_v7  ;;  %v3247_v54 = vor.u32 %v3246_v60, %v3243_v48  ;;  %5384 = vmatmul.mubr.bf16.gmra.mrb[144].mxu0 %v7642_v2  ;;  %v4208_v53 = vshll.u32 %v10743_v24, 16  ;;  %v4214_v25 = vshll.u32 %v10747_v19, 16  ;;  %v10782_v38 = vld [vmem:[#allocation2 + $0x9c] sm:$0xf] }
 0x21b   : > { %v7726_v28 = vcombine.low %v4193_v30, %v4203_v43  ;;  %v3257_v27 = vor.u32 %v3256_v61, %v3252_v42  ;;  %v3262_v1 = vrot.slane %v3260_v34, 5  ;;  %v4207_v12 = vrot.slane %v4205_v31, 4  ;;  %v9318_v61 = vld [vmem:[#allocation2 + $0x10] sm:$0xf]  ;;  %v10788_v30 = vld [vmem:[#allocation2 + $0xa0] sm:$0xf] }
 0x21c   : > { %v3248_v13 = vrot.slane %v3247_v54, 4  ;;  %v4218_v16 = vshrl.u32 %v10747_v19, 16  ;;  %v4210_v63 = vrot.slane %v4208_v53, 5  ;;  %v4224_v3 = vshll.u32 %v10753_v49, 16  ;;  %v10797_v53 = vld [vmem:[#allocation2 + $0xa4] sm:$0x1] }
 0x21d   : > { %4949 = vmatprep.mubr.bf16.mxu1 %v7726_v28  ;;  %v3258_v14 = vrot.slane %v3257_v27, 4  ;;  %v3265_v44 = vshrl.u32 %v10756_v39, 16  ;;  %v7643_v52 = vcombine.low %v10728_v8, %v10731_v57  ;;  %v4216_v15 = vrot.slane %v4214_v25, 5  ;;  %v9319_v27 = vld [vmem:[#allocation2 + $0x14] sm:$0x1] }
 0x21e   : > { %4950 = vmatmul.mubr.bf16.gmra.mrb[36].mxu1 %v7710_v41  ;;  %v4220_v33 = vrot.slane %v4218_v16, 4  ;;  %v3268_v56 = vshll.u32 %v10756_v39, 16  ;;  %v3253_v9 = vsel %vm9998_vm3, %v3248_v13, %v3252_v42  ;;  %v4211_v50 = vor.u32 %v4210_v63, %v4207_v12  ;;  %v4228_v41 = vld [vmem:[#allocation2 + $0xc] sm:$0xe]  ;;  %v4229_v13 = vld [vmem:[#allocation2 + $0x18] sm:$0xe] }
 0x21f   : > { %v3263_v18 = vsel %vm9998_vm3, %v3258_v14, %v3262_v1  ;;  %v3267_v47 = vrot.slane %v3265_v44, 4  ;;  %v3274_v5 = vshll.u32 %v10762_v37, 16  ;;  %v4226_v57 = vrot.slane %v4224_v3, 5 }
 0x220   : > { %v7659_v45 = vcombine.low %v3253_v9, %v3263_v18  ;;  %v4221_v55 = vor.u32 %v4220_v33, %v4216_v15  ;;  %v3270_v46 = vrot.slane %v3268_v56, 5  ;;  %v4212_v8 = vrot.slane %v4211_v50, 4  ;;  %v4230_v9 = vld [vmem:[#allocation2 + $0x24] sm:$0xe] }
 0x221   : > { %v3278_v10 = vshrl.u32 %v10762_v37, 16  ;;  %v3284_v7 = vshll.u32 %v2969_v29, 16  ;;  %v10774_v58 = vpop.f32.mrb[84].mxu0  ;;  %v3276_v11 = vrot.slane %v3274_v5, 5  ;;  %v7711_v32 = vcombine.low %v10743_v24, %v10747_v19 }
 0x222   : > { %5391 = vmatprep.mubr.bf16.mxu0 %v7659_v45  ;;  %v4222_v23 = vrot.slane %v4221_v55, 4  ;;  %v3271_v35 = vor.u32 %v3270_v46, %v3267_v47  ;;  %v10776_v40 = vpop.f32.mrb[85].mxu0  ;;  %v4217_v6 = vsel %vm9998_vm3, %v4212_v8, %v4216_v15  ;;  %v7680_v42 = vrot.slane %v4228_v41, 9  ;;  %v9320_v41 = vld [vmem:[#allocation2 + $0x1c] sm:$0xf] }
 0x223   : > { %5392 = vmatmul.mubr.bf16.gmra.mrb[148].mxu0 %v7643_v52  ;;  %v3280_v62 = vrot.slane %v3278_v10, 4  ;;  %v10784_v48 = vpop.f32.mrb[86].mxu0  ;;  %v4294_v34 = vrot.slane %v9318_v61, 5  ;;  %v3286_v28 = vrot.slane %v3284_v7, 5  ;;  %v4297_v1 = vrot.slane %v9319_v27, 5 }
 0x224   : > { %v4227_v60 = vsel %vm9998_vm3, %v4222_v23, %v4226_v57  ;;  %v3272_v2 = vrot.slane %v3271_v35, 4  ;;  %v10790_v43 = vpop.f32.mrb[87].mxu0  ;;  %v3289_v14 = vshrl.u32 %v10782_v38, 16  ;;  %v3292_v3 = vshll.u32 %v10782_v38, 16  ;;  %v10814_v57 = vld [vmem:[#allocation2 + $0xa8] sm:$0xf] }
 0x225   : > { %v7727_v54 = vcombine.low %v4217_v6, %v4227_v60  ;;  %v3281_v31 = vor.u32 %v3280_v62, %v3276_v11  ;;  %v4295_v25 = vsel %vm10793_vm6, %v7680_v42, %v4294_v34  ;;  %v4296_v16 = vrot.slane %v4294_v34, 4  ;;  %v9321_v35 = vld [vmem:[#allocation2 + $0x28] sm:$0xf]  ;;  %v10816_v6 = vld [vmem:[#allocation2 + $0xac] sm:$0xf] }
 0x226   : > { %v3277_v12 = vsel %vm9998_vm3, %v3272_v2, %v3276_v11  ;;  %v3298_v44 = vshll.u32 %v10788_v30, 16  ;;  %v3302_v52 = vshrl.u32 %v10788_v30, 16  ;;  %v3291_v33 = vrot.slane %v3289_v14, 4 }
 0x227   : > { %4957 = vmatprep.mubr.bf16.mxu1 %v7727_v54  ;;  %v3282_v63 = vrot.slane %v3281_v31, 4  ;;  %v4298_v15 = vsel %vm10793_vm6, %v4296_v16, %v4297_v1  ;;  %v3308_v29 = vshll.u32 %v10797_v53, 16  ;;  %v7681_v56 = vrot.slane %v4229_v13, 9 }
 0x228   : > { %4958 = vmatmul.mubr.bf16.gmra.mrb[40].mxu1 %v7711_v32  ;;  %v7728_v50 = vcombine.low %v4295_v25, %v4298_v15  ;;  %v3294_v47 = vrot.slane %v3292_v3, 5  ;;  %v3300_v45 = vrot.slane %v3298_v44, 5  ;;  %v7644_v46 = vcombine.low %v10756_v39, %v10762_v37  ;;  %v9322_v39 = vld [vmem:[#allocation2 + $0x2c] sm:$0x1] }
 0x229   : > { %v3287_v18 = vsel %vm9998_vm3, %v3282_v63, %v3286_v28  ;;  %v3304_v5 = vrot.slane %v3302_v52, 4  ;;  %v4301_v8 = vrot.slane %v9320_v41, 5  ;;  %v3310_v7 = vrot.slane %v3308_v29, 5  ;;  %v4231_v28 = vld [vmem:[#allocation2 + $0x30] sm:$0xe] }
 0x22a   : > { %v7660_v55 = vcombine.low %v3277_v12, %v3287_v18  ;;  %8756 = vmatprep.mubr.bf16.mxu1 %v7728_v50  ;;  %v3295_v10 = vor.u32 %v3294_v47, %v3291_v33  ;;  %v7682_v23 = vrot.slane %v4230_v9, 9  ;;  %v4308_v11 = vrot.slane %v9321_v35, 5  ;;  %v10831_v12 = vld [vmem:[#allocation2 + $0xb0] sm:$0x1]  ;;  %v4232_v9 = vld [vmem:[#allocation2 + $0x3c] sm:$0xe] }
 0x22b   : > { %v3305_v62 = vor.u32 %v3304_v5, %v3300_v45  ;;  %v4302_v32 = vsel %vm10793_vm6, %v7681_v56, %v4301_v8  ;;  %v4303_v60 = vrot.slane %v4301_v8, 4  ;;  %v4311_v2 = vrot.slane %v9322_v39, 5  ;;  %v9324_v41 = vld [vmem:[#allocation2 + $0x34] sm:$0xf] }
 0x22c   : > { %5399 = vmatprep.mubr.bf16.mxu0 %v7660_v55  ;;  %v10820_v42 = vpop.f32.mrb[88].mxu0  ;;  %v3296_v61 = vrot.slane %v3295_v10, 4  ;;  %v4309_v34 = vsel %vm10793_vm6, %v7682_v23, %v4308_v11  ;;  %v4310_v54 = vrot.slane %v4308_v11, 4  ;;  %v3313_v31 = vshrl.u32 %v10814_v57, 16  ;;  %v9323_v55 = vld [vmem:[%s12200_s5 + $0x80] sm:$0xff]   ;;  %v9258_v35 = vld [vmem:[%s12200_s5 + $0x90] sm:$0xff]  }
 0x22d   : > { %5400 = vmatmul.mubr.bf16.gmra.mrb[152].mxu0 %v7644_v46  ;;  %v10825_v27 = vpop.f32.mrb[89].mxu0  ;;  %v3306_v1 = vrot.slane %v3305_v62, 4  ;;  %v4305_v13 = vsel %vm10793_vm6, %v4303_v60, %v4304_v4  ;;  %v3316_v25 = vshll.u32 %v10814_v57, 16  ;;  %v3322_v16 = vshll.u32 %v10816_v6, 16  ;;  %v9325_v10 = vld [vmem:[#allocation2 + $0x38] sm:$0x1] }
 0x22e   : > { %v10835_v14 = vpop.f32.mrb[90].mxu0  ;;  %v3301_v63 = vsel %vm9998_vm3, %v3296_v61, %v3300_v45  ;;  %v7729_v3 = vcombine.low %v4302_v32, %v4305_v13  ;;  %v4312_v44 = vsel %vm10793_vm6, %v4310_v54, %v4311_v2  ;;  %v3315_v52 = vrot.slane %v3313_v31, 4  ;;  %v10855_v23 = vld [vmem:[#allocation2 + $0xb4] sm:$0xf]  ;;  %v9326_v60 = vld [vmem:[#allocation2 + $0x40] sm:$0xf] }
 0x22f   : > { %v10844_v4 = vpop.f32.mrb[91].mxu0  ;;  %v3311_v15 = vsel %vm9998_vm3, %v3306_v1, %v3310_v7  ;;  %v7730_v33 = vcombine.low %v4309_v34, %v4312_v44  ;;  %v3318_v29 = vrot.slane %v3316_v25, 5  ;;  %v3324_v56 = vrot.slane %v3322_v16, 5  ;;  %v10860_v2 = vld [vmem:[#allocation2 + $0xb8] sm:$0xf] }
 0x230   : > { %v7661_v18 = vcombine.low %v3301_v63, %v3311_v15  ;;  %8757 = vmatmul.mubr.bf16.vlgmr.msra.gmra.mrb[44].mxu1 %v7729_v3  ;;  %v3326_v50 = vshrl.u32 %v10816_v6, 16  ;;  %v3332_v47 = vshll.u32 %v10831_v12, 16  ;;  %v7683_v45 = vrot.slane %v4231_v28, 9  ;;  %v9327_v54 = vld [vmem:[#allocation2 + $0x44] sm:$0x1] }
 0x231   : > { %8789 = vmatpush3.bf16.msra.mxu1 %v9323_v55  ;;  %8760 = vmatprep.mubr.bf16.mxu1 %v7730_v33  ;;  %v7645_v46 = vcombine.low %v10782_v38, %v10788_v30  ;;  %v3319_v5 = vor.u32 %v3318_v29, %v3315_v52  ;;  %v4315_v8 = vrot.slane %v9324_v41, 5  ;;  %v4318_v7 = vrot.slane %v9325_v10, 5  ;;  %v10871_v3 = vld [vmem:[#allocation2 + $0xbc] sm:$0x1]  ;;  %v9328_v41 = vld [vmem:[#allocation2 + $0x4c] sm:$0xf] }
 0x232   : > { %5407 = vmatprep.mubr.bf16.mxu0 %v7661_v18  ;;  %v3328_v11 = vrot.slane %v3326_v50, 4  ;;  %v3334_v62 = vrot.slane %v3332_v47, 5  ;;  %8790 = vmatprep.subr.bf16.mxu1 %v9256_v0  ;;  %v7684_v32 = vrot.slane %v4232_v9, 9  ;;  %v4322_v39 = vrot.slane %v9326_v60, 5  ;;  %v4233_v18 = vld [vmem:[#allocation2 + $0x48] sm:$0xe] }
 0x233   : > { %v3320_v38 = vrot.slane %v3319_v5, 4  ;;  %v4316_v61 = vsel %vm10793_vm6, %v7683_v45, %v4315_v8  ;;  %v4317_v34 = vrot.slane %v4315_v8, 4  ;;  %v4325_v31 = vrot.slane %v9327_v54, 5 }
 0x234   : > { %v3329_v28 = vor.u32 %v3328_v11, %v3324_v56  ;;  %v4323_v1 = vsel %vm10793_vm6, %v7684_v32, %v4322_v39  ;;  %v4324_v13 = vrot.slane %v4322_v39, 4  ;;  %v3337_v25 = vshrl.u32 %v10855_v23, 16  ;;  %v4234_v39 = vld [vmem:[#allocation2 + $0x54] sm:$0xe] }
 0x235   : > { %5408 = vmatmul.mubr.bf16.gmra.mrb[156].mxu0 %v7645_v46  ;;  %v3325_v16 = vsel %vm9998_vm3, %v3320_v38, %v3324_v56  ;;  %v4319_v63 = vsel %vm10793_vm6, %v4317_v34, %v4318_v7  ;;  %8791 = vmatpush3.bf16.msra.mxu1 %v9256_v0  ;;  %v3340_v44 = vshll.u32 %v10855_v23, 16  ;;  %v3346_v52 = vshll.u32 %v10860_v2, 16  ;;  %v9260_v56 = vld [vmem:[%s12200_s5 + $0x98] sm:$0xff]  }
 0x236   : > { %v3330_v15 = vrot.slane %v3329_v28, 4  ;;  %v7731_v33 = vcombine.low %v4316_v61, %v4319_v63  ;;  %v4326_v29 = vsel %vm10793_vm6, %v4324_v13, %v4325_v31  ;;  %v3339_v9 = vrot.slane %v3337_v25, 4  ;;  %8792 = vmatprep.subr.bf16.mxu1 %v9258_v35  ;;  %v9329_v61 = vld [vmem:[#allocation2 + $0x50] sm:$0x1]  ;;  %v9330_v31 = vld [vmem:[#allocation2 + $0x58] sm:$0xf] }
 0x237   : > { %v7732_v50 = vcombine.low %v4323_v1, %v4326_v29  ;;  %v3342_v0 = vrot.slane %v3340_v44, 5  ;;  %v3348_v47 = vrot.slane %v3346_v52, 5  ;;  %v3350_v45 = vshrl.u32 %v10860_v2, 16  ;;  %v9261_v1 = vld [vmem:[%s12200_s5 + $0xa0] sm:$0xff]  }
 0x238   : > { %v10881_v55 = vpop.f32.mrb[92].mxu0  ;;  %v3335_v46 = vsel %vm9998_vm3, %v3330_v15, %v3334_v62  ;;  %8761 = vmatmul.mubr.bf16.gmra.mrb[48].mxu1 %v7731_v33  ;;  %v3356_v5 = vshll.u32 %v10871_v3, 16  ;;  %v4329_v8 = vrot.slane %v9328_v41, 5  ;;  %v7685_v60 = vrot.slane %v4233_v18, 9  ;;  %v9333_v41 = vld [vmem:[#allocation2 + $0x70] sm:$0xf] }
 0x239   : > { %v10886_v10 = vpop.f32.mrb[93].mxu0  ;;  %v7662_v7 = vcombine.low %v3325_v16, %v3335_v46  ;;  %8764 = vmatprep.mubr.bf16.mxu1 %v7732_v50  ;;  %v3343_v11 = vor.u32 %v3342_v0, %v3339_v9  ;;  %v3352_v32 = vrot.slane %v3350_v45, 4  ;;  %8793 = vmatpush3.bf16.msra.mxu1 %v9258_v35  ;;  %v4332_v34 = vrot.slane %v9329_v61, 5  ;;  %v9332_v9 = vld [vmem:[#allocation2 + $0x64] sm:$0xf] }
 0x23a   : > { %v10888_v38 = vpop.f32.mrb[94].mxu0  ;;  %v7646_v62 = vcombine.low %v10814_v57, %v10816_v6  ;;  %v4331_v54 = vrot.slane %v4329_v8, 4  ;;  %v4336_v28 = vrot.slane %v9330_v31, 5  ;;  %8794 = vmatprep.subr.bf16.mxu1 %v9260_v56  ;;  %v7686_v63 = vrot.slane %v4234_v39, 9  ;;  %v9331_v57 = vld [vmem:[#allocation2 + $0x5c] sm:$0x1] }
 0x23b   : > { %v10895_v13 = vpop.f32.mrb[95].mxu0  ;;  %5415 = vmatprep.mubr.bf16.mxu0 %v7662_v7  ;;  %v3344_v35 = vrot.slane %v3343_v11, 4  ;;  %v3353_v25 = vor.u32 %v3352_v32, %v3348_v47  ;;  %v4339_v52 = vrot.slane %v9331_v57, 5  ;;  %v3358_v33 = vrot.slane %v3356_v5, 5  ;;  %v4235_v46 = vld [vmem:[#allocation2 + $0x60] sm:$0xe] }
 0x23c   : > { %v4333_v16 = vsel %vm10793_vm6, %v4331_v54, %v4332_v34  ;;  %v4338_v44 = vrot.slane %v4336_v28, 4  ;;  %v4330_v29 = vsel %vm10793_vm6, %v7685_v60, %v4329_v8  ;;  %v4343_v18 = vrot.slane %v9332_v9, 5  ;;  %v9262_v5 = vld [vmem:[%s12200_s5 + $0xa8] sm:$0xff]   ;;  %v4237_v31 = vld [vmem:[#allocation2 + $0x78] sm:$0xe] }
 0x23d   : > { %5416 = vmatmul.mubr.bf16.gmra.mrb[160].mxu0 %v7646_v62  ;;  %v3354_v15 = vrot.slane %v3353_v25, 4  ;;  %8795 = vmatpush3.bf16.msra.mxu1 %v9260_v56  ;;  %v7733_v50 = vcombine.low %v4330_v29, %v4333_v16  ;;  %v4337_v0 = vsel %vm10793_vm6, %v7686_v63, %v4336_v28  ;;  %v4350_v7 = vrot.slane %v9333_v41, 5  ;;  %v4236_v39 = vld [vmem:[#allocation2 + $0x6c] sm:$0xe]  ;;  %v9334_v62 = vld [vmem:[#allocation2 + $0x68] sm:$0x1] }
 0x23e   : > { %v4340_v45 = vsel %vm10793_vm6, %v4338_v44, %v4339_v52  ;;  %8796 = vmatprep.subr.bf16.mxu1 %v9261_v1  ;;  %v3349_v8 = vsel %vm9998_vm3, %v3344_v35, %v3348_v47  ;;  %v4345_v32 = vrot.slane %v4343_v18, 4  ;;  %v7687_v34 = vrot.slane %v4235_v46, 9  ;;  %v9335_v28 = vld [vmem:[#allocation2 + $0x7c] sm:$0xf]  ;;  %v9336_v35 = vld [vmem:[#allocation2 + $0x74] sm:$0x1] }
 0x23f   : > { %v3359_v56 = vsel %vm9998_vm3, %v3354_v15, %v3358_v33  ;;  %v7734_v11 = vcombine.low %v4337_v0, %v4340_v45  ;;  %v4352_v61 = vrot.slane %v4350_v7, 4  ;;  %v4346_v54 = vrot.slane %v9334_v62, 5  ;;  %v9263_v63 = vld [vmem:[%s12200_s5 + $0xb0] sm:$0xff]   ;;  %v4238_v15 = vld [vmem:[#allocation2 + $0x84] sm:$0xe]  ;;  %v9264_v46 = vld [vmem:[%s12200_s5 + $0xb8] sm:$0xff]  }
 0x240   : > { %v7663_v60 = vcombine.low %v3349_v8, %v3359_v56  ;;  %8765 = vmatmul.mubr.bf16.gmra.mrb[52].mxu1 %v7733_v50  ;;  %v4357_v25 = vrot.slane %v9335_v28, 5  ;;  %v7647_v47 = vcombine.low %v10855_v23, %v10860_v2  ;;  %v4353_v16 = vrot.slane %v9336_v35, 5  ;;  %v9337_v33 = vld [vmem:[#allocation2 + $0x88] sm:$0xf]  ;;  %v9338_v8 = vld [vmem:[#allocation2 + $0x80] sm:$0x1] }
 0x241   : > { %8768 = vmatprep.mubr.bf16.mxu1 %v7734_v11  ;;  %8797 = vmatpush3.bf16.msra.mxu1 %v9261_v1  ;;  %v4347_v44 = vsel %vm10793_vm6, %v4345_v32, %v4346_v54  ;;  %v7688_v57 = vrot.slane %v4236_v39, 9  ;;  %v7689_v1 = vrot.slane %v4237_v31, 9  ;;  %v4364_v29 = vrot.slane %v9337_v33, 5  ;;  %v4241_v50 = vld [vmem:[#allocation2 + $0xa8] sm:$0xe] }
 0x242   : > { %5423 = vmatprep.mubr.bf16.mxu0 %v7663_v60  ;;  %8798 = vmatprep.subr.bf16.mxu1 %v9262_v5  ;;  %v4354_v52 = vsel %vm10793_vm6, %v4352_v61, %v4353_v16  ;;  %v4344_v23 = vsel %vm10793_vm6, %v7687_v34, %v4343_v18  ;;  %v4359_v9 = vrot.slane %v4357_v25, 4  ;;  %v4360_v56 = vrot.slane %v9338_v8, 5  ;;  %v4242_v32 = vld [vmem:[#allocation2 + $0xb4] sm:$0xe]  ;;  %v4243_v61 = vld [vmem:[#allocation2 + $0xc0] sm:$0xe] }
 0x243   : > { %v7735_v0 = vcombine.low %v4344_v23, %v4347_v44  ;;  %v4351_v45 = vsel %vm10793_vm6, %v7688_v57, %v4350_v7  ;;  %v7690_v11 = vrot.slane %v4238_v15, 9  ;;  %v4358_v18 = vsel %vm10793_vm6, %v7689_v1, %v4357_v25  ;;  %v9339_v54 = vld [vmem:[#allocation2 + $0x8c] sm:$0x1]  ;;  %v9265_v57 = vld [vmem:[%s12200_s5 + $0x1c0] sm:$0xff]  }
 0x244   : > { %v7736_v41 = vcombine.low %v4351_v45, %v4354_v52  ;;  %v7693_v39 = vrot.slane %v4241_v50, 9  ;;  %v4385_v7 = vrot.slane %v10687_v21, 5  ;;  %v4361_v62 = vsel %vm10793_vm6, %v4359_v9, %v4360_v56  ;;  %v4239_v45 = vld [vmem:[#allocation2 + $0x90] sm:$0xe] }
 0x245   : > { %5424 = vmatmul.mubr.bf16.gmra.mrb[164].mxu0 %v7647_v47  ;;  %8799 = vmatpush3.bf16.msra.mxu1 %v9262_v5  ;;  %v4366_v5 = vrot.slane %v4364_v29, 4  ;;  %v4367_v31 = vrot.slane %v9339_v54, 5  ;;  %v4371_v28 = vrot.slane %v10610_v22, 5  ;;  %v4392_v47 = vrot.slane %v10714_v26, 5 }
 0x246   : > { %8800 = vmatprep.subr.bf16.mxu1 %v9263_v63  ;;  %v4378_v25 = vrot.slane %v10654_v36, 5  ;;  %v4387_v16 = vrot.slane %v4385_v7, 4  ;;  %v4388_v21 = vrot.slane %v10691_v20, 5  ;;  %v7694_v44 = vrot.slane %v4242_v32, 9 }
 0x247   : > { %v4394_v1 = vrot.slane %v4392_v47, 4  ;;  %v4395_v22 = vrot.slane %v10721_v17, 5  ;;  %v4399_v26 = vrot.slane %v10747_v19, 5  ;;  %v4368_v36 = vsel %vm10793_vm6, %v4366_v5, %v4367_v31 }
 0x248   : > { %v10928_v60 = vpop.f32.mrb[96].mxu0  ;;  %8769 = vmatmul.mubr.bf16.gmra.mrb[56].mxu1 %v7735_v0  ;;  %v4386_v20 = vsel %vm10793_vm6, %v7693_v39, %v4385_v7  ;;  %v4389_v15 = vsel %vm10793_vm6, %v4387_v16, %v4388_v21  ;;  %v4393_v33 = vsel %vm10793_vm6, %v7694_v44, %v4392_v47  ;;  %v4402_v50 = vrot.slane %v10753_v49, 5  ;;  %v4240_v39 = vld [vmem:[#allocation2 + $0x9c] sm:$0xe] }
 0x249   : > { %v10933_v34 = vpop.f32.mrb[97].mxu0  ;;  %8772 = vmatprep.mubr.bf16.mxu1 %v7736_v41  ;;  %8801 = vmatpush3.bf16.msra.mxu1 %v9263_v63  ;;  %v7695_v63 = vrot.slane %v4243_v61, 9  ;;  %v7741_v23 = vcombine.low %v4386_v20, %v4389_v15  ;;  %v4396_v9 = vsel %vm10793_vm6, %v4394_v1, %v4395_v22  ;;  %v4401_v17 = vrot.slane %v4399_v26, 4  ;;  %v11006_v15 = vld [vmem:[#allocation2 + $0x10] sm:$0xf] }
 0x24a   : > { %v10939_v35 = vpop.f32.mrb[98].mxu0  ;;  %8802 = vmatprep.subr.bf16.mxu1 %v9264_v46  ;;  %v7737_v19 = vcombine.low %v4358_v18, %v4361_v62  ;;  %v4365_v0 = vsel %vm10793_vm6, %v7690_v11, %v4364_v29  ;;  %v7742_v41 = vcombine.low %v4393_v33, %v4396_v9  ;;  %v4373_v56 = vrot.slane %v4371_v28, 4  ;;  %v9340_v11 = vld [vmem:[#allocation2 + $0x98] sm:$0x1]  ;;  %v11009_v33 = vld [vmem:[#allocation2 + $0x1c] sm:$0xf] }
 0x24b   : > { %v10946_v52 = vpop.f32.mrb[99].mxu0  ;;  %v7738_v8 = vcombine.low %v4365_v0, %v4368_v36  ;;  %v10965_v32 = vsel %vm10793_vm6, %v7695_v63, %v4399_v26  ;;  %v10969_v5 = vsel %vm10793_vm6, %v4401_v17, %v4402_v50  ;;  %v4380_v49 = vrot.slane %v4378_v25, 4  ;;  %v9344_v9 = vld [vmem:[#allocation2 + $0x8] sm:$0x1]  ;;  %v9345_v0 = vld [vmem:[#allocation2 + $0x14] sm:$0x1] }
 0x24c   : > { %v7691_v29 = vrot.slane %v4239_v45, 9  ;;  %v4374_v18 = vrot.slane %v9340_v11, 5  ;;  %v10975_v7 = vadd.f32 %v10776_v40, %v10774_v58  ;;  %v4381_v62 = vrot.slane %v10660_v51, 5 }
 0x24d   : > { %8803 = vmatpush3.bf16.msra.mxu1 %v9264_v46  ;;  %v7743_v46 = vcombine.low %v10965_v32, %v10969_v5  ;;  %v10980_v54 = vadd.f32 %v10790_v43, %v10784_v48  ;;  %v7692_v21 = vrot.slane %v4240_v39, 9  ;;  %v10990_v51 = vadd.f32 %v10825_v27, %v10820_v42 }
 0x24e   : > { %8480 = vmatprep.subr.bf16.mxu1 %v9265_v57  ;;  %v4375_v47 = vsel %vm10793_vm6, %v4373_v56, %v4374_v18  ;;  %v4382_v44 = vsel %vm10793_vm6, %v4380_v49, %v4381_v62  ;;  %v4372_v58 = vsel %vm10793_vm6, %v7691_v29, %v4371_v28  ;;  %v10996_v1 = vadd.f32 %v10844_v4, %v10835_v14  ;;  %v9341_v28 = vld [vmem:[#allocation2 + $0x4] sm:$0xf]  ;;  %v3374_v49 = vld [vmem:[#allocation2 + $0xa8] sm:$0xe] }
 0x24f   : > { %v7739_v40 = vcombine.low %v4372_v58, %v4375_v47  ;;  %v4379_v48 = vsel %vm10793_vm6, %v7692_v21, %v4378_v25  ;;  %v11000_v22 = vadd.f32 %v10886_v10, %v10881_v55  ;;  %v3429_v63 = vrot.slane %v9341_v28, 5  ;;  %v3360_v25 = vld [vmem:[#allocation2] sm:$0xe]  ;;  %v9346_v21 = vld [vmem:[#allocation2 + $0x20] sm:$0x1] }
 0x250   : > { %8773 = vmatmul.mubr.bf16.gmra.mrb[60].mxu1 %v7737_v19  ;;  %v7740_v43 = vcombine.low %v4379_v48, %v4382_v44  ;;  %v11004_v42 = vadd.f32 %v10895_v13, %v10888_v38  ;;  %v3436_v14 = vrot.slane %v11006_v15, 5  ;;  %v3443_v55 = vrot.slane %v11009_v33, 5  ;;  %v3361_v13 = vld [vmem:[#allocation2 + $0xc] sm:$0xe] }
 0x251   : > { %8776 = vmatprep.mubr.bf16.mxu1 %v7738_v8  ;;  %v3431_v20 = vrot.slane %v3429_v63, 4  ;;  %v7616_v10 = vrot.slane %v3360_v25, 9  ;;  %v3432_v17 = vrot.slane %v9344_v9, 5  ;;  %v11014_v38 = vadd.f32 %v10933_v34, %v10928_v60  ;;  %v3362_v8 = vld [vmem:[#allocation2 + $0x18] sm:$0xe] }
 0x252   : > { %v8248_v61 = vpop.f32.mrb[100].mxu0  ;;  %v11018_v50 = vadd.f32 %v10946_v52, %v10939_v35  ;;  %v3445_v60 = vrot.slane %v3443_v55, 4  ;;  %v3373_v34 = vld [vmem:[#allocation2 + $0x9c] sm:$0xe]  ;;  %v7617_v52 = vrot.slane %v3361_v13, 9  ;;  %v7618_v47 = vrot.slane %v3362_v8, 9 }
 0x253   : > { %v8249_v31 = vpop.f32.mrb[101].mxu0  ;;  %v3433_v45 = vsel %vm10793_vm6, %v3431_v20, %v3432_v17  ;;  %v3430_v35 = vsel %vm10793_vm6, %v7616_v10, %v3429_v63  ;;  %v3446_v44 = vrot.slane %v9346_v21, 5  ;;  %v3520_v58 = vrot.slane %v10788_v30, 5  ;;  %v3375_v9 = vld [vmem:[#allocation2 + $0xb4] sm:$0xe] }
 0x254   : > { %v8251_v16 = vpop.f32.mrb[102].mxu0  ;;  %v11028_v11 = vadd.f32 %v8249_v31, %v8248_v61  ;;  %v7664_v62 = vcombine.low %v3430_v35, %v3433_v45  ;;  %v7629_v48 = vrot.slane %v3373_v34, 9  ;;  %v3527_v28 = vrot.slane %v10816_v6, 5  ;;  %v11041_v31 = vld [vmem:[#allocation2 + $0x28] sm:$0xf] }
 0x255   : > { %v8252_v57 = vpop.f32.mrb[103].mxu0  ;;  %v3447_v61 = vsel %vm10793_vm6, %v3445_v60, %v3446_v44  ;;  %v3523_v30 = vrot.slane %v10797_v53, 5  ;;  %v3530_v25 = vrot.slane %v10831_v12, 5  ;;  %v3534_v13 = vrot.slane %v10860_v2, 5  ;;  %v9266_v2 = vld [vmem:[%s12200_s5 + $0x180] sm:$0xff]  }
 0x256   : > { %v11030_v18 = vadd.f32 %v8252_v57, %v8251_v16  ;;  %v3450_v16 = vrot.slane %v11041_v31, 5  ;;  %v3522_v57 = vrot.slane %v3520_v58, 4  ;;  %v11047_v63 = vsel %vm10793_vm6, %v7629_v48, %v3520_v58  ;;  %v3364_v60 = vld [vmem:[#allocation2 + $0x30] sm:$0xe]  ;;  %v9350_v58 = vld [vmem:[#allocation2 + $0x38] sm:$0x1] }
 0x257   : > { %v3529_v6 = vrot.slane %v3527_v28, 4  ;;  %v3536_v45 = vrot.slane %v3534_v13, 4  ;;  %v7620_v44 = vrot.slane %v3364_v60, 9  ;;  %v9269_v48 = vld [vmem:[%s12200_s5 + $0x1d0] sm:$0xff]  }
 0x258   : > { %8777 = vmatmul.mubr.bf16.gmra.mrb[64].mxu1 %v7739_v40  ;;  %v11054_v5 = vsel %vm10793_vm6, %v3522_v57, %v3523_v30  ;;  %v9351_v30 = vld [vmem:[#allocation2 + $0x40] sm:$0xf] }
 0x259   : > { %8780 = vmatprep.mubr.bf16.mxu1 %v7740_v43  ;;  %v7630_v43 = vrot.slane %v3374_v49, 9  ;;  %v7677_v53 = vcombine.low %v11047_v63, %v11054_v5  ;;  %v11066_v12 = vsel %vm10793_vm6, %v3529_v6, %v3530_v25  ;;  %v3464_v6 = vrot.slane %v9351_v30, 5 }
 0x25b   : > { %v11062_v17 = vsel %vm10793_vm6, %v7630_v43, %v3527_v28 }
 0x25d   : > { %v8360_v26 = vpop.f32.mrb[104].mxu0 }
 0x25e   : > { %v8361_v27 = vpop.f32.mrb[105].mxu0 }
 0x25f   : > { %v8363_v36 = vpop.f32.mrb[106].mxu0 }
 0x260   : > { %v8364_v4 = vpop.f32.mrb[107].mxu0  ;;  %8781 = vmatmul.mubr.bf16.gmra.mrb[68].mxu1 %v7741_v23  ;;  %v3439_v23 = vrot.slane %v9345_v0, 5 }
 0x261   : > { %8784 = vmatprep.mubr.bf16.mxu1 %v7742_v41  ;;  %v3438_v41 = vrot.slane %v3436_v14, 4  ;;  %v8365_v10 = vadd.f32 %v8364_v4, %v8363_v36  ;;  %v3437_v4 = vsel %vm10793_vm6, %v7617_v52, %v3436_v14  ;;  %v9349_v52 = vld [vmem:[#allocation2 + $0x2c] sm:$0x1] }
 0x262   : > { %v8254_v19 = vpop.f32.mrb[0].mxu1 }
 0x263   : > { %v8255_v56 = vpop.f32.mrb[1].mxu1  ;;  %v3440_v40 = vsel %vm10793_vm6, %v3438_v41, %v3439_v23  ;;  %v11075_v36 = vadd.f32 %v8365_v10, %v10980_v54  ;;  %v7631_v23 = vrot.slane %v3375_v9, 9  ;;  %v3537_v41 = vrot.slane %v10871_v3, 5  ;;  %v9267_v54 = vld [vmem:[%s12200_s5 + $0x1c8] sm:$0xff]  }
 0x264   : > { %v8257_v29 = vpop.f32.mrb[2].mxu1  ;;  %v11050_v32 = vadd.f32 %v8255_v56, %v8254_v19  ;;  %v9348_v19 = vld [vmem:[#allocation2 + $0x34] sm:$0xf]  ;;  %v7665_v8 = vcombine.low %v3437_v4, %v3440_v40  ;;  %v3452_v56 = vrot.slane %v3450_v16, 4  ;;  %v3460_v40 = vrot.slane %v9350_v58, 5 }
 0x265   : > { %v8258_v39 = vpop.f32.mrb[3].mxu1  ;;  %v3457_v0 = vrot.slane %v9348_v19, 5  ;;  %12226 = vst [vmem:[#allocation8_spill] sm:$0xff] %v11075_v36  ;;  %v11096_v34 = vsel %vm10793_vm6, %v7631_v23, %v3534_v13  ;;  %v11100_v3 = vsel %vm10793_vm6, %v3536_v45, %v3537_v41  ;;  %v9352_v9 = vld [vmem:[#allocation2 + $0x4c] sm:$0xf] }
 0x266   : > { %v11056_v20 = vadd.f32 %v8258_v39, %v8257_v29  ;;  %v7679_v29 = vcombine.low %v11096_v34, %v11100_v3  ;;  %v3453_v39 = vrot.slane %v9349_v52, 5  ;;  %v3471_v13 = vrot.slane %v9352_v9, 5  ;;  %v9275_v9 = vld [vmem:[%s12200_s5 + $0x1e8] sm:$0xff]  }
 0x267   : > { %v3459_v49 = vrot.slane %v3457_v0, 4 }
 0x268   : > { %8785 = vmatmul.mubr.bf16.gmra.mrb[72].mxu1 %v7743_v46  ;;  %v8362_v46 = vadd.f32 %v8361_v27, %v8360_v26  ;;  %v7678_v26 = vcombine.low %v11062_v17, %v11066_v12  ;;  %v3454_v57 = vsel %vm10793_vm6, %v3452_v56, %v3453_v39  ;;  %v9353_v56 = vld [vmem:[#allocation2 + $0x44] sm:$0x1]  ;;  %v11267_v12 = vld [vmem:[#allocation2 + $0x3c] sm:$0xf] }
 0x269   : > { %8804 = vmatprep.mubr.bf16.mxu1 %v7664_v62  ;;  %v9268_v62 = vld [vmem:[%s12200_s5 + $0x188] sm:$0xff]   ;;  %v3461_v10 = vsel %vm10793_vm6, %v3459_v49, %v3460_v40  ;;  %v3467_v60 = vrot.slane %v9353_v56, 5  ;;  %v9356_v40 = vld [vmem:[#allocation2 + $0x64] sm:$0xf] }
 0x26a   : > { %v11072_v27 = vadd.f32 %v8362_v46, %v10975_v7  ;;  %v3444_v7 = vsel %vm10793_vm6, %v7618_v47, %v3443_v55  ;;  %v3363_v55 = vld [vmem:[#allocation2 + $0x24] sm:$0xe] }
 0x26b   : > { %v7666_v14 = vcombine.low %v3444_v7, %v3447_v61  ;;  %v7619_v61 = vrot.slane %v3363_v55, 9  ;;  %v9354_v55 = vld [vmem:[#allocation2 + $0x50] sm:$0x1] }
 0x26c   : > { %12225 = vst [vmem:[#allocation7_spill] sm:$0xff] %v11072_v27  ;;  %v3474_v49 = vrot.slane %v9354_v55, 5  ;;  %v9360_v55 = vld [vmem:[#allocation2 + $0x7c] sm:$0xf] }
 0x26d   : > { %v3451_v23 = vsel %vm10793_vm6, %v7619_v61, %v3450_v16  ;;  %v3366_v16 = vld [vmem:[#allocation2 + $0x48] sm:$0xe] }
 0x26e   : > { %v8366_v15 = vpop.f32.mrb[108].mxu0  ;;  %v7667_v41 = vcombine.low %v3451_v23, %v3454_v57  ;;  %v9274_v57 = vld [vmem:[%s12200_s5 + $0x1a0] sm:$0xff]  }
 0x26f   : > { %v8367_v33 = vpop.f32.mrb[109].mxu0 }
 0x270   : > { %8805 = vmatmul.mubr.bf16.vlgmr.msra.gmra.mrb[44].mxu1 %v7665_v8  ;;  %v8369_v35 = vpop.f32.mrb[110].mxu0  ;;  %v8368_v47 = vadd.f32 %v8367_v33, %v8366_v15  ;;  %v3458_v8 = vsel %vm10793_vm6, %v7620_v44, %v3457_v0  ;;  %v3365_v15 = vld [vmem:[#allocation2 + $0x3c] sm:$0xe]  ;;  %v7622_v33 = vrot.slane %v3366_v16, 9  ;;  %v9358_v16 = vld [vmem:[#allocation2 + $0x68] sm:$0x1] }
 0x271   : > { %8481 = vmatpush3.bf16.msra.mxu1 %v9266_v2  ;;  %8808 = vmatprep.mubr.bf16.mxu1 %v7666_v14  ;;  %v8370_v21 = vpop.f32.mrb[111].mxu0  ;;  %v7668_v31 = vcombine.low %v3458_v8, %v3461_v10  ;;  %v3473_v14 = vrot.slane %v3471_v13, 4  ;;  %v9272_v0 = vld [vmem:[%s12200_s5 + $0x198] sm:$0xff]   ;;  %v7621_v39 = vrot.slane %v3365_v15, 9  ;;  %v3488_v15 = vrot.slane %v9358_v16, 5 }
 0x272   : > { %8482 = vmatprep.subr.bf16.mxu1 %v9267_v54  ;;  %v8371_v28 = vadd.f32 %v8370_v21, %v8369_v35  ;;  %v11113_v46 = vadd.f32 %v8368_v47, %v10990_v51  ;;  %v9270_v51 = vld [vmem:[%s12200_s5 + $0x190] sm:$0xff]   ;;  %v3466_v54 = vrot.slane %v3464_v6, 4  ;;  %v9273_v35 = vld [vmem:[%s12200_s5 + $0x1e0] sm:$0xff]   ;;  %v9355_v47 = vld [vmem:[#allocation2 + $0x58] sm:$0xf]  ;;  %v3472_v10 = vsel %vm10793_vm6, %v7622_v33, %v3471_v13 }
 0x273   : > { %v8260_v43 = vpop.f32.mrb[4].mxu1  ;;  %v3478_v21 = vrot.slane %v9355_v47, 5  ;;  %v3475_v58 = vsel %vm10793_vm6, %v3473_v14, %v3474_v49  ;;  %v3465_v61 = vsel %vm10793_vm6, %v7621_v39, %v3464_v6  ;;  %v9357_v13 = vld [vmem:[#allocation2 + $0x5c] sm:$0x1]  ;;  %v9277_v14 = vld [vmem:[%s12200_s5 + $0x1f0] sm:$0xff]   ;;  %v3499_v49 = vrot.slane %v9360_v55, 5 }
 0x274   : > { %v8261_v25 = vpop.f32.mrb[5].mxu1  ;;  %12227 = vst [vmem:[#allocation9_spill] sm:$0xff] %v11113_v46  ;;  %v11120_v2 = vadd.f32 %v8371_v28, %v10996_v1  ;;  %v9271_v1 = vld [vmem:[%s12200_s5 + $0x1d8] sm:$0xff]   ;;  %v7670_v6 = vcombine.low %v3472_v10, %v3475_v58  ;;  %v3513_v16 = vrot.slane %v10762_v37, 5 }
 0x275   : > { %v11117_v19 = vadd.f32 %v8261_v25, %v8260_v43  ;;  %v8263_v4 = vpop.f32.mrb[6].mxu1  ;;  %8483 = vmatpush3.bf16.msra.mxu1 %v9268_v62  ;;  %v3468_v62 = vsel %vm10793_vm6, %v3466_v54, %v3467_v60  ;;  %v9276_v54 = vld [vmem:[%s12200_s5 + $0x1a8] sm:$0xff]   ;;  %v9359_v60 = vld [vmem:[#allocation2 + $0x70] sm:$0xf]  ;;  %v9279_v47 = vld [vmem:[%s12200_s5 + $0x1f8] sm:$0xff]  }
 0x276   : > { %12228 = vst [vmem:[#allocation10_spill] sm:$0xff] %v11120_v2  ;;  %v8264_v45 = vpop.f32.mrb[7].mxu1  ;;  %8484 = vmatprep.subr.bf16.mxu1 %v9269_v48  ;;  %v3485_v48 = vrot.slane %v9356_v40, 5  ;;  %v7669_v25 = vcombine.low %v3465_v61, %v3468_v62  ;;  %v3501_v61 = vrot.slane %v3499_v49, 4  ;;  %v6040_v2 = vld [vmem:[#allocation2 + $0xc0] sm:$0xe] }
 0x277   : > { %v11134_v7 = vadd.f32 %v8264_v45, %v8263_v4  ;;  %v3368_v45 = vld [vmem:[#allocation2 + $0x60] sm:$0xe]  ;;  %v11542_v46 = vld [vmem:[#allocation2 + $0xbc] sm:$0x1] }
 0x278   : > { %8809 = vmatmul.mubr.bf16.gmra.mrb[48].mxu1 %v7667_v41  ;;  %v3367_v41 = vld [vmem:[#allocation2 + $0x54] sm:$0xe]  ;;  %v3487_v8 = vrot.slane %v3485_v48, 4 }
 0x279   : > { %8812 = vmatprep.mubr.bf16.mxu1 %v7668_v31  ;;  %8485 = vmatpush3.bf16.msra.mxu1 %v9270_v51  ;;  %v3480_v51 = vrot.slane %v3478_v21, 4  ;;  %v3481_v31 = vrot.slane %v9357_v13, 5  ;;  %v7623_v56 = vrot.slane %v3367_v41, 9 }
 0x27a   : > { %8486 = vmatprep.subr.bf16.mxu1 %v9271_v1  ;;  %v8372_v52 = vpop.f32.mrb[112].mxu0  ;;  %v3489_v33 = vsel %vm10793_vm6, %v3487_v8, %v3488_v15 }
 0x27b   : > { %v8373_v44 = vpop.f32.mrb[113].mxu0 }
 0x27c   : > { %v8374_v43 = vadd.f32 %v8373_v44, %v8372_v52  ;;  %v8375_v28 = vpop.f32.mrb[114].mxu0  ;;  %v9278_v52 = vld [vmem:[%s12200_s5 + $0x1b0] sm:$0xff]  }
 0x27d   : > { %8487 = vmatpush3.bf16.msra.mxu1 %v9272_v0  ;;  %v8376_v30 = vpop.f32.mrb[115].mxu0  ;;  %v3492_v0 = vrot.slane %v9359_v60, 5 }
 0x27e   : > { %8488 = vmatprep.subr.bf16.mxu1 %v9273_v35  ;;  %v11157_v4 = vadd.f32 %v8374_v43, %v11000_v22  ;;  %v8377_v23 = vadd.f32 %v8376_v30, %v8375_v28  ;;  %v7624_v22 = vrot.slane %v3368_v45, 9  ;;  %v3479_v35 = vsel %vm10793_vm6, %v7623_v56, %v3478_v21  ;;  %v3370_v43 = vld [vmem:[#allocation2 + $0x78] sm:$0xe]  ;;  %v3369_v21 = vld [vmem:[#allocation2 + $0x6c] sm:$0xe]  ;;  %v11190_v45 = vld [vmem:[%s12200_s5 + $0x200] sm:$0xff]  }
 0x27f   : > { %v3494_v40 = vrot.slane %v3492_v0, 4  ;;  %v7625_v8 = vrot.slane %v3369_v21, 9  ;;  %v9365_v21 = vld [vmem:[#allocation2 + $0x98] sm:$0x1] }
 0x280   : > { %12229 = vst [vmem:[#allocation11_spill] sm:$0xff] %v11157_v4  ;;  %8813 = vmatmul.mubr.bf16.gmra.mrb[52].mxu1 %v7669_v25  ;;  %v11160_v1 = vadd.f32 %v8377_v23, %v11004_v42  ;;  %v3482_v42 = vsel %vm10793_vm6, %v3480_v51, %v3481_v31  ;;  %v3486_v62 = vsel %vm10793_vm6, %v7624_v22, %v3485_v48  ;;  %v9361_v25 = vld [vmem:[#allocation2 + $0x74] sm:$0x1]  ;;  %v9280_v48 = vld [vmem:[%s12200_s5 + $0x1b8] sm:$0xff]   ;;  %v7626_v23 = vrot.slane %v3370_v43, 9 }
 0x281   : > { %8816 = vmatprep.mubr.bf16.mxu1 %v7670_v6  ;;  %8489 = vmatpush3.bf16.msra.mxu1 %v9274_v57  ;;  %v7671_v39 = vcombine.low %v3479_v35, %v3482_v42  ;;  %v7672_v58 = vcombine.low %v3486_v62, %v3489_v33  ;;  %v3495_v10 = vrot.slane %v9361_v25, 5  ;;  %v9362_v6 = vld [vmem:[#allocation2 + $0x80] sm:$0x1]  ;;  %v9363_v31 = vld [vmem:[#allocation2 + $0x88] sm:$0xf] }
 0x282   : > { %12230 = vst [vmem:[#allocation12_spill] sm:$0xff] %v11160_v1  ;;  %8490 = vmatprep.subr.bf16.mxu1 %v9275_v9  ;;  %v3502_v51 = vrot.slane %v9362_v6, 5  ;;  %v3500_v60 = vsel %vm10793_vm6, %v7626_v23, %v3499_v49  ;;  %v3372_v33 = vld [vmem:[#allocation2 + $0x90] sm:$0xe]  ;;  %v11204_v62 = vld [vmem:[#allocation2 + $0x18] sm:$0xf] }
 0x283   : > { %v3496_v13 = vsel %vm10793_vm6, %v3494_v40, %v3495_v10  ;;  %v9364_v49 = vld [vmem:[#allocation2 + $0x8c] sm:$0x1]  ;;  %v5646_v25 = vshll.u32 %v11204_v62, 16  ;;  %v6039_v4 = vld [vmem:[#allocation2 + $0xb4] sm:$0xe] }
 0x284   : > { %v3503_v22 = vsel %vm10793_vm6, %v3501_v61, %v3502_v51  ;;  %v3509_v43 = vrot.slane %v9364_v49, 5  ;;  %v3516_v61 = vrot.slane %v9365_v21, 5  ;;  %v11240_v21 = vld [vmem:[#allocation2 + $0x34] sm:$0xf] }
 0x285   : > { %8491 = vmatpush3.bf16.msra.mxu1 %v9276_v54  ;;  %v3506_v54 = vrot.slane %v9363_v31, 5  ;;  %v5648_v31 = vrot.slane %v5646_v25, 5 }
 0x286   : > { %8492 = vmatprep.subr.bf16.mxu1 %v9277_v14  ;;  %v8266_v44 = vpop.f32.mrb[8].mxu1  ;;  %v3493_v14 = vsel %vm10793_vm6, %v7625_v8, %v3492_v0  ;;  %v11206_v0 = vld [vmem:[#allocation2 + $0x1c] sm:$0xf] }
 0x287   : > { %v8267_v28 = vpop.f32.mrb[9].mxu1  ;;  %v7673_v42 = vcombine.low %v3493_v14, %v3496_v13  ;;  %v5656_v23 = vshrl.u32 %v11206_v0, 16 }
 0x288   : > { %8817 = vmatmul.mubr.bf16.gmra.mrb[56].mxu1 %v7671_v39  ;;  %v11182_v57 = vadd.f32 %v8267_v28, %v8266_v44  ;;  %v8269_v30 = vpop.f32.mrb[10].mxu1  ;;  %v3508_v39 = vrot.slane %v3506_v54, 4  ;;  %v3515_v44 = vrot.slane %v3513_v16, 4  ;;  %v7628_v28 = vrot.slane %v3372_v33, 9 }
 0x289   : > { %8820 = vmatprep.mubr.bf16.mxu1 %v7672_v58  ;;  %8493 = vmatpush3.bf16.msra.mxu1 %v9278_v52  ;;  %v8270_v9 = vpop.f32.mrb[11].mxu1  ;;  %v7674_v52 = vcombine.low %v3500_v60, %v3503_v22  ;;  %v11226_v60 = vld [vmem:[#allocation2 + $0x28] sm:$0xf] }
 0x28a   : > { %8494 = vmatprep.subr.bf16.mxu1 %v9279_v47  ;;  %v11192_v41 = vadd.f32 %v8270_v9, %v8269_v30  ;;  %v3371_v47 = vld [vmem:[#allocation2 + $0x84] sm:$0xe]  ;;  %v5643_v30 = vshrl.u32 %v11204_v62, 16  ;;  %v3510_v9 = vsel %vm10793_vm6, %v3508_v39, %v3509_v43  ;;  %v3517_v6 = vsel %vm10793_vm6, %v3515_v44, %v3516_v61 }
 0x28b   : > { %v3514_v13 = vsel %vm10793_vm6, %v7628_v28, %v3513_v16  ;;  %v5676_v44 = vshll.u32 %v11226_v60, 16  ;;  %v11238_v28 = vld [vmem:[#allocation2 + $0x30] sm:$0xf] }
 0x28c   : > { %v8378_v15 = vpop.f32.mrb[116].mxu0 }
 0x28d   : > { %8495 = vmatpush3.bf16.msra.mxu1 %v9280_v48  ;;  %v8379_v56 = vpop.f32.mrb[117].mxu0  ;;  %v7627_v48 = vrot.slane %v3371_v47, 9  ;;  %v11231_v47 = vld [vmem:[#allocation2 + $0x24] sm:$0xf] }
 0x28e   : > { %8836 = vmatprep.subr.bf16.mxu1 %v11190_v45  ;;  %v8380_v55 = vadd.f32 %v8379_v56, %v8378_v15  ;;  %v8381_v35 = vpop.f32.mrb[118].mxu0  ;;  %v7676_v15 = vcombine.low %v3514_v13, %v3517_v6  ;;  %v5658_v56 = vrot.slane %v5656_v23, 4  ;;  %v5670_v25 = vshll.u32 %v11231_v47, 16 }
 0x28f   : > { %v8382_v37 = vpop.f32.mrb[119].mxu0  ;;  %v3507_v51 = vsel %vm10793_vm6, %v7627_v48, %v3506_v54  ;;  %v5700_v13 = vshll.u32 %v11240_v21, 16 }
 0x290   : > { %8821 = vmatmul.mubr.bf16.gmra.mrb[60].mxu1 %v7673_v42  ;;  %v11209_v58 = vadd.f32 %v8380_v55, %v11014_v38  ;;  %v8383_v40 = vadd.f32 %v8382_v37, %v8381_v35  ;;  %v5652_v38 = vshll.u32 %v11206_v0, 16  ;;  %v7675_v8 = vcombine.low %v3507_v51, %v3510_v9 }
 0x291   : > { %8824 = vmatprep.mubr.bf16.mxu1 %v7674_v52  ;;  %v5626_v52 = vld [vmem:[#allocation2 + $0x20] sm:$0x1]  ;;  %v5691_v51 = vshrl.u32 %v11238_v28, 16  ;;  %v5672_v63 = vrot.slane %v5670_v25, 5 }
 0x292   : > { %12231 = vst [vmem:[#allocation13_spill] sm:$0xff] %v11209_v58  ;;  %v11214_v10 = vadd.f32 %v8383_v40, %v11018_v50  ;;  %v5645_v50 = vrot.slane %v5643_v30, 4  ;;  %v5654_v14 = vrot.slane %v5652_v38, 5  ;;  %v5680_v40 = vshrl.u32 %v11226_v60, 16 }
 0x293   : > { %v5662_v43 = vshll.u32 %v5626_v52, 16  ;;  %v11244_v38 = vrot.slane %v5676_v44, 5  ;;  %v11265_v52 = vrot.slane %v5700_v13, 5 }
 0x294   : > { %12232 = vst [vmem:[#allocation14_spill] sm:$0xff] %v11214_v10  ;;  %v5649_v54 = vor.u32 %v5648_v31, %v5645_v50  ;;  %v5659_v37 = vor.u32 %v5658_v56, %v5654_v14  ;;  %v5682_v23 = vrot.slane %v5680_v40, 4  ;;  %v5704_v50 = vshrl.u32 %v11240_v21, 16  ;;  %v5627_v56 = vld [vmem:[#allocation2 + $0x2c] sm:$0x1] }
 0x296   : > { %v8384_v22 = vpop.f32.mrb[120].mxu0  ;;  %v5650_v30 = vrot.slane %v5649_v54, 4  ;;  %v5660_v9 = vrot.slane %v5659_v37, 4  ;;  %v5706_v17 = vrot.slane %v5704_v50, 4  ;;  %v11269_v54 = vld [vmem:[#allocation2 + $0x40] sm:$0xf] }
 0x297   : > { %v8385_v42 = vpop.f32.mrb[121].mxu0 }
 0x298   : > { %8825 = vmatmul.mubr.bf16.gmra.mrb[64].mxu1 %v7675_v8  ;;  %v8386_v33 = vadd.f32 %v8385_v42, %v8384_v22  ;;  %v8387_v55 = vpop.f32.mrb[122].mxu0  ;;  %v5694_v8 = vshll.u32 %v11238_v28, 16  ;;  %v5664_v22 = vrot.slane %v5662_v43, 5  ;;  %v5655_v5 = vsel %vm9998_vm3, %v5650_v30, %v5654_v14  ;;  %v5628_v43 = vld [vmem:[#allocation2 + $0x38] sm:$0x1] }
 0x299   : > { %8828 = vmatprep.mubr.bf16.mxu1 %v7676_v15  ;;  %v8388_v35 = vpop.f32.mrb[123].mxu0  ;;  %v5718_v30 = vshll.u32 %v11267_v12, 16 }
 0x29a   : > { %v11229_v39 = vadd.f32 %v8386_v33, %v11028_v11  ;;  %v8389_v16 = vadd.f32 %v8388_v35, %v8387_v55  ;;  %v5667_v11 = vshrl.u32 %v11231_v47, 16  ;;  %v5683_v33 = vor.u32 %v5682_v23, %v11244_v38 }
 0x29b   : > { %v5693_v55 = vrot.slane %v5691_v51, 4  ;;  %v5696_v35 = vrot.slane %v5694_v8, 5  ;;  %v5724_v23 = vshll.u32 %v11269_v54, 16 }
 0x29c   : > { %12233 = vst [vmem:[#allocation15_spill] sm:$0xff] %v11229_v39  ;;  %v11236_v49 = vadd.f32 %v8389_v16, %v11030_v18  ;;  %v5669_v42 = vrot.slane %v5667_v11, 4  ;;  %v5684_v14 = vrot.slane %v5683_v33, 4  ;;  %v5629_v33 = vld [vmem:[#allocation2 + $0x44] sm:$0x1] }
 0x29d   : > { %v8272_v61 = vpop.f32.mrb[12].mxu1 }
 0x29e   : > { %12234 = vst [vmem:[#allocation16_spill] sm:$0xff] %v11236_v49  ;;  %v8273_v48 = vpop.f32.mrb[13].mxu1  ;;  %v5673_v44 = vor.u32 %v5672_v63, %v5669_v42 }
 0x29f   : > { %v11246_v6 = vadd.f32 %v8273_v48, %v8272_v61  ;;  %v8275_v18 = vpop.f32.mrb[14].mxu1  ;;  %v5715_v61 = vshrl.u32 %v11267_v12, 16  ;;  %v5697_v48 = vor.u32 %v5696_v35, %v5693_v55 }
 0x2a0   : > { %8829 = vmatmul.mubr.bf16.gmra.mrb[68].mxu1 %v7677_v53  ;;  %v8276_v31 = vpop.f32.mrb[15].mxu1  ;;  %v5665_v53 = vsel %vm9998_vm3, %v5660_v9, %v5664_v22  ;;  %v5707_v9 = vor.u32 %v5706_v17, %v11265_v52  ;;  %v5710_v22 = vshll.u32 %v5628_v43, 16 }
 0x2a1   : > { %8832 = vmatprep.mubr.bf16.mxu1 %v7678_v26  ;;  %v11258_v15 = vadd.f32 %v8276_v31, %v8275_v18  ;;  %v5686_v26 = vshll.u32 %v5627_v56, 16  ;;  %v7872_v37 = vcombine.low %v5655_v5, %v5665_v53  ;;  %v5728_v18 = vshrl.u32 %v11269_v54, 16 }
 0x2a2   : > { %v5674_v31 = vrot.slane %v5673_v44, 4  ;;  %v5717_v3 = vrot.slane %v5715_v61, 4  ;;  %v5698_v42 = vrot.slane %v5697_v48, 4  ;;  %v5708_v63 = vrot.slane %v5707_v9, 4  ;;  %v11315_v9 = vld [vmem:[#allocation2 + $0x60] sm:$0xf] }
 0x2a3   : > { %v5688_v8 = vrot.slane %v5686_v26, 5  ;;  %v11287_v5 = vrot.slane %v5724_v23, 5  ;;  %v5730_v53 = vrot.slane %v5728_v18, 4  ;;  %v5712_v17 = vrot.slane %v5710_v22, 5  ;;  %v11329_v22 = vld [vmem:[#allocation2 + $0x50] sm:$0x1] }
 0x2a4   : > { %v5679_v35 = vsel %vm9998_vm3, %v5674_v31, %v11244_v38 }
 0x2a5   : > { %v5689_v34 = vsel %vm9998_vm3, %v5684_v14, %v5688_v8  ;;  %v11301_v14 = vld [vmem:[#allocation2 + $0x4c] sm:$0xf]  ;;  %v5731_v43 = vor.u32 %v5730_v53, %v11287_v5  ;;  %v11325_v8 = vld [vmem:[#allocation2 + $0x64] sm:$0xf] }
 0x2a6   : > { %v8390_v16 = vpop.f32.mrb[124].mxu0  ;;  %v5748_v18 = vshll.u32 %v11301_v14, 16 }
 0x2a7   : > { %v8391_v40 = vpop.f32.mrb[125].mxu0 }
 0x2a8   : > { %v8392_v11 = vadd.f32 %v8391_v40, %v8390_v16  ;;  %v8393_v25 = vpop.f32.mrb[126].mxu0  ;;  %8833 = vmatmul.mubr.bf16.gmra.mrb[72].mxu1 %v7679_v29  ;;  %v5720_v29 = vrot.slane %v5718_v30, 5  ;;  %v11297_v16 = vld [vmem:[#allocation2 + $0x48] sm:$0xf]  ;;  %v11309_v30 = vld [vmem:[#allocation2 + $0x58] sm:$0xf] }
 0x2a9   : > { %v8394_v51 = vpop.f32.mrb[127].mxu0  ;;  %6635 = vmatprep.mubr.bf16.mxu1 %v7872_v37  ;;  %v7873_v37 = vcombine.low %v5679_v35, %v5689_v34  ;;  %v5742_v23 = vshll.u32 %v11297_v16, 16  ;;  %v11339_v35 = vld [vmem:[#allocation2 + $0x70] sm:$0xf] }
 0x2aa   : > { %v11280_v13 = vadd.f32 %v8392_v11, %v11050_v32  ;;  %v8395_v50 = vadd.f32 %v8394_v51, %v8393_v25  ;;  %v7856_v32 = vcombine.low %v11204_v62, %v11206_v0  ;;  %v5703_v62 = vsel %vm9998_vm3, %v5698_v42, %v11265_v52 }
 0x2ab   : > { %v5713_v0 = vsel %vm9998_vm3, %v5708_v63, %v5712_v17  ;;  %v5721_v38 = vor.u32 %v5720_v29, %v5717_v3  ;;  %v5734_v11 = vshll.u32 %v5629_v33, 16  ;;  %v5739_v25 = vshrl.u32 %v11297_v16, 16  ;;  %v11333_v29 = vld [vmem:[#allocation2 + $0x54] sm:$0xf] }
 0x2ac   : > { %12235 = vst [vmem:[#allocation17_spill] sm:$0xff] %v11280_v13  ;;  %v11285_v56 = vadd.f32 %v8395_v50, %v11056_v20  ;;  %v9284_v20 = vld [vmem:[%s12200_s5 + $0x208] sm:$0xff]   ;;  %v7857_v52 = vcombine.low %v11231_v47, %v11226_v60  ;;  %v5752_v51 = vshrl.u32 %v11301_v14, 16  ;;  %v7874_v50 = vcombine.low %v5703_v62, %v5713_v0  ;;  %v5631_v0 = vld [vmem:[#allocation2 + $0x5c] sm:$0x1] }
 0x2ad   : > { %v8278_v55 = vpop.f32.mrb[16].mxu1  ;;  %v5772_v60 = vshll.u32 %v11309_v30, 16  ;;  %v5776_v47 = vshrl.u32 %v11309_v30, 16  ;;  %v5722_v34 = vrot.slane %v5721_v38, 4  ;;  %v5732_v3 = vrot.slane %v5731_v43, 4 }
 0x2ae   : > { %12236 = vst [vmem:[#allocation18_spill] sm:$0xff] %v11285_v56  ;;  %v8279_v26 = vpop.f32.mrb[17].mxu1  ;;  %v5787_v42 = vshrl.u32 %v11315_v9, 16  ;;  %v5790_v63 = vshll.u32 %v11315_v9, 16  ;;  %v5736_v53 = vrot.slane %v5734_v11, 5  ;;  %v5741_v33 = vrot.slane %v5739_v25, 4 }
 0x2af   : > { %v11299_v44 = vadd.f32 %v8279_v26, %v8278_v55  ;;  %v8281_v40 = vpop.f32.mrb[18].mxu1  ;;  %v5796_v55 = vshll.u32 %v11325_v8, 16  ;;  %v5744_v17 = vrot.slane %v5742_v23, 5  ;;  %v11341_v26 = vrot.slane %v5748_v18, 5  ;;  %v11353_v56 = vld [vmem:[#allocation2 + $0x6c] sm:$0xf] }
 0x2b0   : > { %6636 = vmatmul.mubr.bf16.vlgmr.msra.gmra.mrb[76].mxu1 %v7856_v32  ;;  %v8282_v61 = vpop.f32.mrb[19].mxu1  ;;  %v5800_v32 = vshrl.u32 %v11325_v8, 16  ;;  %v5763_v38 = vshrl.u32 %v11333_v29, 16  ;;  %v5766_v43 = vshll.u32 %v11333_v29, 16  ;;  %v5778_v11 = vrot.slane %v5776_v47, 4 }
 0x2b1   : > { %8837 = vmatpush3.bf16.msra.mxu1 %v11190_v45  ;;  %6643 = vmatprep.mubr.bf16.mxu1 %v7873_v37  ;;  %v11313_v48 = vadd.f32 %v8282_v61, %v8281_v40  ;;  %v9287_v45 = vld [vmem:[%s12200_s5 + $0x210] sm:$0xff]   ;;  %v5754_v37 = vrot.slane %v5752_v51, 4  ;;  %v5758_v40 = vshll.u32 %v11329_v22, 16  ;;  %v11349_v61 = vrot.slane %v5772_v60, 5 }
 0x2b2   : > { %8838 = vmatprep.subr.bf16.mxu1 %v9284_v20  ;;  %v5737_v23 = vsel %vm9998_vm3, %v5732_v3, %v5736_v53  ;;  %v5789_v22 = vrot.slane %v5787_v42, 4  ;;  %v5792_v31 = vrot.slane %v5790_v63, 5  ;;  %v11355_v49 = vrot.slane %v5796_v55, 5 }
 0x2b3   : > { %v5802_v39 = vrot.slane %v5800_v32, 4  ;;  %v5820_v60 = vshll.u32 %v11339_v35, 16  ;;  %v5824_v47 = vshrl.u32 %v11339_v35, 16  ;;  %v5755_v10 = vor.u32 %v5754_v37, %v11341_v26 }
 0x2b4   : > { %v5768_v63 = vrot.slane %v5766_v43, 5  ;;  %v5779_v53 = vor.u32 %v5778_v11, %v11349_v61  ;;  %v5782_v55 = vshll.u32 %v5631_v0, 16  ;;  %v5727_v37 = vsel %vm9998_vm3, %v5722_v34, %v11287_v5  ;;  %v11380_v43 = vld [vmem:[#allocation2 + $0x78] sm:$0xf] }
 0x2b5   : > { %8839 = vmatpush3.bf16.msra.mxu1 %v9284_v20  ;;  %v9290_v20 = vld [vmem:[%s12200_s5 + $0x218] sm:$0xff]   ;;  %v5826_v0 = vrot.slane %v5824_v47, 4 }
 0x2b6   : > { %8840 = vmatprep.subr.bf16.mxu1 %v9287_v45  ;;  %v5780_v34 = vrot.slane %v5779_v53, 4 }
 0x2b7   : > { %v8396_v62 = vpop.f32.mrb[128].mxu0 }
 0x2b8   : > { %v8397_v25 = vpop.f32.mrb[129].mxu0  ;;  %6644 = vmatmul.mubr.bf16.gmra.mrb[80].mxu1 %v7857_v52  ;;  %v5745_v52 = vor.u32 %v5744_v17, %v5741_v33  ;;  %v11370_v33 = vld [vmem:[#allocation2 + $0x68] sm:$0x1]  ;;  %v5793_v17 = vor.u32 %v5792_v31, %v5789_v22  ;;  %v5760_v31 = vrot.slane %v5758_v40, 5 }
 0x2b9   : > { %v8398_v18 = vadd.f32 %v8397_v25, %v8396_v62  ;;  %v8399_v51 = vpop.f32.mrb[130].mxu0  ;;  %6651 = vmatprep.mubr.bf16.mxu1 %v7874_v50  ;;  %8841 = vmatpush3.bf16.msra.mxu1 %v9287_v45  ;;  %v9293_v45 = vld [vmem:[%s12200_s5 + $0x220] sm:$0xff]   ;;  %v5765_v50 = vrot.slane %v5763_v38, 4  ;;  %v5803_v62 = vor.u32 %v5802_v39, %v11355_v49  ;;  %v11378_v38 = vrot.slane %v5820_v60, 5  ;;  %v11386_v60 = vld [vmem:[#allocation2 + $0x7c] sm:$0xf] }
 0x2ba   : > { %v8400_v13 = vpop.f32.mrb[131].mxu0  ;;  %8842 = vmatprep.subr.bf16.mxu1 %v9290_v20  ;;  %v5746_v11 = vrot.slane %v5745_v52, 4  ;;  %v5756_v25 = vrot.slane %v5755_v10, 4  ;;  %v5784_v39 = vrot.slane %v5782_v55, 5  ;;  %v5794_v47 = vrot.slane %v5793_v17, 4 }
 0x2bb   : > { %v11361_v3 = vadd.f32 %v8398_v18, %v11117_v19  ;;  %v8401_v42 = vadd.f32 %v8400_v13, %v8399_v51  ;;  %v5811_v19 = vshrl.u32 %v11353_v56, 16  ;;  %v5814_v13 = vshll.u32 %v11353_v56, 16  ;;  %v9296_v51 = vld [vmem:[%s12200_s5 + $0x228] sm:$0xff]   ;;  %v11393_v52 = vld [vmem:[#allocation2 + $0x74] sm:$0x1] }
 0x2bc   : > { %v5769_v5 = vor.u32 %v5768_v63, %v5765_v50  ;;  %v5804_v63 = vrot.slane %v5803_v62, 4  ;;  %v5827_v53 = vor.u32 %v5826_v0, %v11378_v38  ;;  %v5835_v55 = vshrl.u32 %v11380_v43, 16 }
 0x2bd   : > { %12237 = vst [vmem:[#allocation19_spill] sm:$0xff] %v11361_v3  ;;  %v11368_v32 = vadd.f32 %v8401_v42, %v11134_v7  ;;  %8843 = vmatpush3.bf16.msra.mxu1 %v9290_v20  ;;  %v7875_v7 = vcombine.low %v5727_v37, %v5737_v23  ;;  %v5806_v20 = vshll.u32 %v11370_v33, 16  ;;  %v12239_v23 = vcombine.low %v11238_v28, %v11240_v21 }
 0x2be   : > { %v8284_v18 = vpop.f32.mrb[20].mxu1  ;;  %8844 = vmatprep.subr.bf16.mxu1 %v9293_v45  ;;  %v5813_v42 = vrot.slane %v5811_v19, 4  ;;  %v5816_v37 = vrot.slane %v5814_v13, 5  ;;  %v5751_v28 = vsel %vm9998_vm3, %v5746_v11, %v11341_v26  ;;  %v5844_v17 = vshll.u32 %v11386_v60, 16  ;;  %v9299_v13 = vld [vmem:[%s12200_s5 + $0x230] sm:$0xff]  }
 0x2bf   : > { %12238 = vst [vmem:[#allocation20_spill] sm:$0xff] %v11368_v32  ;;  %v8285_v22 = vpop.f32.mrb[21].mxu1  ;;  %v5838_v32 = vshll.u32 %v11380_v43, 16  ;;  %v5848_v19 = vshrl.u32 %v11386_v60, 16  ;;  %v5761_v62 = vsel %vm9998_vm3, %v5756_v25, %v5760_v31  ;;  %v5770_v0 = vrot.slane %v5769_v5, 4 }
 0x2c0   : > { %6652 = vmatmul.mubr.bf16.gmra.mrb[84].mxu1 %v12239_v23  ;;  %v11391_v10 = vadd.f32 %v8285_v22, %v8284_v18  ;;  %v8287_v40 = vpop.f32.mrb[22].mxu1  ;;  %v7859_v26 = vcombine.low %v11267_v12, %v11269_v54  ;;  %v5785_v11 = vsel %vm9998_vm3, %v5780_v34, %v5784_v39  ;;  %v5799_v18 = vsel %vm9998_vm3, %v5794_v47, %v11355_v49  ;;  %v6032_v23 = vld [vmem:[#allocation2 + $0x60] sm:$0xe]  ;;  %v9302_v49 = vld [vmem:[%s12200_s5 + $0x238] sm:$0xff]  }
 0x2c1   : > { %6659 = vmatprep.mubr.bf16.mxu1 %v7875_v7  ;;  %v8288_v50 = vpop.f32.mrb[23].mxu1  ;;  %8845 = vmatpush3.bf16.msra.mxu1 %v9293_v45  ;;  %v5808_v45 = vrot.slane %v5806_v20, 5  ;;  %v5830_v7 = vshll.u32 %v11393_v52, 16  ;;  %v5817_v22 = vor.u32 %v5816_v37, %v5813_v42  ;;  %v11420_v25 = vrot.slane %v5827_v53, 4  ;;  %v6034_v53 = vld [vmem:[#allocation2 + $0x78] sm:$0xe] }
 0x2c2   : > { %v11401_v21 = vadd.f32 %v8288_v50, %v8287_v40  ;;  %8846 = vmatprep.subr.bf16.mxu1 %v9296_v51  ;;  %v11422_v31 = vrot.slane %v5835_v55, 4  ;;  %v11424_v5 = vrot.slane %v5838_v32, 5  ;;  %v7876_v12 = vcombine.low %v5751_v28, %v5761_v62  ;;  %v6036_v28 = vld [vmem:[#allocation2 + $0x90] sm:$0xe] }
 0x2c3   : > { %v5809_v40 = vsel %vm9998_vm3, %v5804_v63, %v5808_v45  ;;  %v7860_v54 = vcombine.low %v11297_v16, %v11301_v14  ;;  %v11428_v34 = vrot.slane %v5844_v17, 5  ;;  %v11430_v39 = vrot.slane %v5848_v19, 4  ;;  %v6033_v63 = vld [vmem:[#allocation2 + $0x6c] sm:$0xe]  ;;  %v11454_v45 = vld [vmem:[#allocation2 + $0x80] sm:$0x1] }
 0x2c4   : > { %v5775_v20 = vsel %vm9998_vm3, %v5770_v0, %v11349_v61  ;;  %v11438_v32 = vrot.slane %v5830_v7, 5  ;;  %v6134_v47 = vrot.slane %v11325_v8, 5  ;;  %v11443_v37 = vcombine.low %v5799_v18, %v5809_v40  ;;  %v11480_v61 = vld [vmem:[#allocation2 + $0x98] sm:$0x1]  ;;  %v6037_v14 = vld [vmem:[#allocation2 + $0x9c] sm:$0xe] }
 0x2c5   : > { %8847 = vmatpush3.bf16.msra.mxu1 %v9296_v51  ;;  %v7846_v51 = vrot.slane %v6032_v23, 9  ;;  %v7877_v16 = vcombine.low %v5775_v20, %v5785_v11  ;;  %v11445_v50 = vrot.slane %v5817_v22, 4  ;;  %v6137_v19 = vrot.slane %v11370_v33, 5  ;;  %v11465_v22 = vld [vmem:[#allocation2 + $0x8c] sm:$0x1] }
 0x2c6   : > { %8848 = vmatprep.subr.bf16.mxu1 %v9299_v13  ;;  %v6136_v17 = vrot.slane %v6134_v47, 4  ;;  %v6141_v18 = vrot.slane %v11339_v35, 5  ;;  %v7847_v23 = vrot.slane %v6033_v63, 9  ;;  %v7848_v40 = vrot.slane %v6034_v53, 9  ;;  %v6035_v20 = vld [vmem:[#allocation2 + $0x84] sm:$0xe] }
 0x2c7   : > { %v11462_v11 = vsel %vm10793_vm6, %v7846_v51, %v6134_v47  ;;  %v11475_v51 = vld [vmem:[#allocation2 + $0x94] sm:$0xf]  ;;  %v6144_v7 = vrot.slane %v11393_v52, 5  ;;  %v7851_v58 = vrot.slane %v6037_v14, 9 }
 0x2c8   : > { %6660 = vmatmul.mubr.bf16.gmra.mrb[88].mxu1 %v7859_v26  ;;  %v8402_v42 = vpop.f32.mrb[132].mxu0  ;;  %v11458_v26 = vld [vmem:[#allocation2 + $0x88] sm:$0xf]  ;;  %v11469_v33 = vsel %vm10793_vm6, %v6136_v17, %v6137_v19  ;;  %v11484_v63 = vsel %vm10793_vm6, %v7847_v23, %v6141_v18  ;;  %v6143_v53 = vrot.slane %v6141_v18, 4 }
 0x2c9   : > { %6667 = vmatprep.mubr.bf16.mxu1 %v7876_v12  ;;  %v8403_v55 = vpop.f32.mrb[133].mxu0  ;;  %8849 = vmatpush3.bf16.msra.mxu1 %v9299_v13  ;;  %v6148_v12 = vrot.slane %v11386_v60, 5 }
 0x2ca   : > { %v8404_v62 = vadd.f32 %v8403_v55, %v8402_v42  ;;  %v8405_v0 = vpop.f32.mrb[134].mxu0  ;;  %8850 = vmatprep.subr.bf16.mxu1 %v9302_v49  ;;  %v11499_v18 = vsel %vm10793_vm6, %v6143_v53, %v6144_v7  ;;  %v6158_v53 = vrot.slane %v11465_v22, 5  ;;  %v11526_v7 = vld [vmem:[#allocation2 + $0xb8] sm:$0xf] }
 0x2cb   : > { %v8406_v13 = vpop.f32.mrb[135].mxu0  ;;  %v6150_v17 = vrot.slane %v6148_v12, 4  ;;  %v11494_v52 = vsel %vm10793_vm6, %v7848_v40, %v6148_v12  ;;  %v11508_v12 = vld [vmem:[#allocation2 + $0xac] sm:$0xf] }
 0x2cc   : > { %v11473_v42 = vadd.f32 %v8404_v62, %v11182_v57  ;;  %v8407_v55 = vadd.f32 %v8406_v13, %v8405_v0  ;;  %v6151_v57 = vrot.slane %v11454_v45, 5  ;;  %v11490_v0 = vld [vmem:[#allocation2 + $0xa0] sm:$0xf]  ;;  %12242 = vst [vmem:[#allocation23_spill] sm:$0xff] %v11494_v52  ;;  %v7849_v13 = vrot.slane %v6035_v20, 9 }
 0x2cd   : > { %8851 = vmatpush3.bf16.msra.mxu1 %v9302_v49  ;;  %v6155_v49 = vrot.slane %v11458_v26, 5  ;;  %v11524_v20 = vld [vmem:[#allocation2 + $0xb0] sm:$0x1]  ;;  %v6169_v1 = vrot.slane %v11490_v0, 5  ;;  %v6041_v52 = vld [vmem:[#allocation2 + $0xcc] sm:$0xe] }
 0x2ce   : > { %12240 = vst [vmem:[#allocation21_spill] sm:$0xff] %v11473_v42  ;;  %v11488_v62 = vadd.f32 %v8407_v55, %v11192_v41  ;;  %v11503_v23 = vsel %vm10793_vm6, %v6150_v17, %v6151_v57  ;;  %v7850_v41 = vrot.slane %v6036_v28, 9  ;;  %v6162_v55 = vrot.slane %v11475_v51, 5  ;;  %v6038_v17 = vld [vmem:[#allocation2 + $0xa8] sm:$0xe] }
 0x2cf   : > { %v8290_v19 = vpop.f32.mrb[24].mxu1  ;;  %12243 = vst [vmem:[#allocation24_spill] sm:$0xff] %v11503_v23  ;;  %v11515_v57 = vld [vmem:[#allocation2 + $0xa4] sm:$0x1]  ;;  %v6165_v42 = vrot.slane %v11480_v61, 5  ;;  %v6179_v27 = vrot.slane %v11524_v20, 5 }
 0x2d0   : > { %12241 = vst [vmem:[#allocation22_spill] sm:$0xff] %v11488_v62  ;;  %v8291_v47 = vpop.f32.mrb[25].mxu1  ;;  %6668 = vmatmul.mubr.bf16.gmra.mrb[92].mxu1 %v7860_v54  ;;  %v11519_v54 = vsel %vm10793_vm6, %v7849_v13, %v6155_v49 }
 0x2d1   : > { %v11506_v62 = vadd.f32 %v8291_v47, %v8290_v19  ;;  %v8293_v40 = vpop.f32.mrb[26].mxu1  ;;  %6675 = vmatprep.mubr.bf16.mxu1 %v7877_v16  ;;  %12244 = vst [vmem:[#allocation25_spill] sm:$0xff] %v11519_v54  ;;  %v6157_v47 = vrot.slane %v6155_v49, 4  ;;  %v6164_v19 = vrot.slane %v6162_v55, 4  ;;  %v11530_v16 = vsel %vm10793_vm6, %v7850_v41, %v6162_v55  ;;  %v11544_v41 = vld [vmem:[#allocation2 + $0xc4] sm:$0xf] }
 0x2d2   : > { %v8294_v28 = vpop.f32.mrb[27].mxu1  ;;  %12245 = vst [vmem:[#allocation26_spill] sm:$0xff] %v11530_v16  ;;  %v6183_v16 = vrot.slane %v11526_v7, 5  ;;  %v7854_v54 = vrot.slane %v6040_v2, 9  ;;  %v6190_v23 = vrot.slane %v11544_v41, 5 }
 0x2d3   : > { %v11522_v3 = vadd.f32 %v8294_v28, %v8293_v40  ;;  %v11535_v13 = vsel %vm10793_vm6, %v6157_v47, %v6158_v53  ;;  %v11539_v49 = vsel %vm10793_vm6, %v6164_v19, %v6165_v42  ;;  %v7852_v40 = vrot.slane %v6038_v17, 9  ;;  %v11551_v42 = vld [vmem:[#allocation2 + $0xc8] sm:$0x1]  ;;  %v11580_v2 = vld [vmem:[#allocation2 + $0xd4] sm:$0x1] }
 0x2d4   : > { %12246 = vst [vmem:[#allocation27_spill] sm:$0xff] %v11535_v13  ;;  %12247 = vst [vmem:[#allocation28_spill] sm:$0xff] %v11539_v49  ;;  %v6176_v28 = vrot.slane %v11508_v12, 5  ;;  %v6171_v53 = vrot.slane %v6169_v1, 4  ;;  %v6172_v47 = vrot.slane %v11515_v57, 5  ;;  %v11555_v17 = vsel %vm10793_vm6, %v7851_v58, %v6169_v1 }
 0x2d5   : > { %12248 = vst [vmem:[#allocation29_spill] sm:$0xff] %v11555_v17  ;;  %v11562_v13 = vld [vmem:[#allocation2 + $0xd0] sm:$0xf]  ;;  %v7853_v49 = vrot.slane %v6039_v4, 9  ;;  %v11598_v58 = vld [vmem:[#allocation2 + $0x84] sm:$0xf] }
 0x2d6   : > { %v11559_v19 = vsel %vm10793_vm6, %v7852_v40, %v6176_v28  ;;  %v6178_v36 = vrot.slane %v6176_v28, 4  ;;  %v11566_v55 = vsel %vm10793_vm6, %v6171_v53, %v6172_v47  ;;  %v6186_v28 = vrot.slane %v11542_v46, 5 }
 0x2d7   : > { %v8408_v14 = vpop.f32.mrb[136].mxu0  ;;  %12249 = vst [vmem:[#allocation30_spill] sm:$0xff] %v11566_v55  ;;  %v12251_v53 = vcombine.low %v11333_v29, %v11309_v30  ;;  %v6185_v55 = vrot.slane %v6183_v16, 4  ;;  %v11588_v17 = vsel %vm10793_vm6, %v7853_v49, %v6183_v16  ;;  %v11592_v30 = vsel %vm10793_vm6, %v7854_v54, %v6190_v23 }
 0x2d8   : > { %v8409_v1 = vpop.f32.mrb[137].mxu0  ;;  %v11573_v40 = vsel %vm10793_vm6, %v6178_v36, %v6179_v27  ;;  %v6193_v27 = vrot.slane %v11551_v42, 5  ;;  %12252 = vst [vmem:[#allocation32_spill] sm:$0xff] %v11592_v30  ;;  %v6192_v29 = vrot.slane %v6190_v23, 4  ;;  %v6200_v49 = vrot.slane %v11580_v2, 5 }
 0x2d9   : > { %12250 = vst [vmem:[#allocation31_spill] sm:$0xff] %v11573_v40  ;;  %6676 = vmatmul.mubr.bf16.gmra.mrb[96].mxu1 %v12251_v53  ;;  %v8410_v4 = vadd.f32 %v8409_v1, %v8408_v14  ;;  %v8411_v47 = vpop.f32.mrb[138].mxu0  ;;  %v6197_v14 = vrot.slane %v11562_v13, 5  ;;  %v7855_v40 = vrot.slane %v6041_v52, 9 }
 0x2da   : > { %6683 = vmatprep.mubr.bf16.mxu1 %v11443_v37  ;;  %v8412_v36 = vpop.f32.mrb[139].mxu0  ;;  %v11602_v37 = vsel %vm10793_vm6, %v6185_v55, %v6186_v28  ;;  %v11608_v54 = vsel %vm10793_vm6, %v6192_v29, %v6193_v27  ;;  %v5854_v55 = vshll.u32 %v11454_v45, 16  ;;  %v5859_v28 = vshrl.u32 %v11598_v58, 16 }
 0x2db   : > { %v11596_v1 = vadd.f32 %v8410_v4, %v11246_v6  ;;  %v8413_v53 = vadd.f32 %v8412_v36, %v8411_v47  ;;  %12254 = vst [vmem:[#allocation34_spill] sm:$0xff] %v11608_v54  ;;  %v6199_v23 = vrot.slane %v6197_v14, 4  ;;  %v5868_v4 = vshll.u32 %v11458_v26, 16 }
 0x2dc   : > { %v5872_v47 = vshrl.u32 %v11458_v26, 16  ;;  %v11622_v27 = vsel %vm10793_vm6, %v7855_v40, %v6197_v14  ;;  %v5862_v45 = vshll.u32 %v11598_v58, 16  ;;  %v12258_v40 = vsel %vm9998_vm3, %v11420_v25, %v11438_v32 }
 0x2dd   : > { %12253 = vst [vmem:[#allocation33_spill] sm:$0xff] %v11596_v1  ;;  %v11612_v6 = vadd.f32 %v8413_v53, %v11258_v15  ;;  %12256 = vst [vmem:[#allocation36_spill] sm:$0xff] %v11622_v27  ;;  %v11626_v36 = vsel %vm10793_vm6, %v6199_v23, %v6200_v49  ;;  %v7862_v15 = vcombine.low %v11315_v9, %v11325_v8  ;;  %v5856_v32 = vrot.slane %v5854_v55, 5 }
 0x2de   : > { %12257 = vst [vmem:[#allocation37_spill] sm:$0xff] %v11626_v36  ;;  %v8296_v29 = vpop.f32.mrb[28].mxu1  ;;  %v5823_v53 = vsel %vm9998_vm3, %v11445_v50, %v11378_v38  ;;  %v12259_v9 = vor.u32 %v11424_v5, %v11422_v31  ;;  %v12260_v49 = vor.u32 %v11430_v39, %v11428_v34  ;;  %v11648_v50 = vld [vmem:[#allocation2 + $0x90] sm:$0xf]  ;;  %v5874_v1 = vrot.slane %v5872_v47, 4 }
 0x2df   : > { %12255 = vst [vmem:[#allocation35_spill] sm:$0xff] %v11612_v6  ;;  %v7879_v14 = vcombine.low %v5823_v53, %v12258_v40  ;;  %v8297_v23 = vpop.f32.mrb[29].mxu1  ;;  %v5870_v6 = vrot.slane %v5868_v4, 5  ;;  %v5861_v53 = vrot.slane %v5859_v28, 4  ;;  %v5864_v31 = vrot.slane %v5862_v45, 5 }
 0x2e0   : > { %v5842_v8 = vrot.slane %v12259_v9, 4  ;;  %v5852_v38 = vrot.slane %v12260_v49, 4  ;;  %v11650_v16 = vadd.f32 %v8297_v23, %v8296_v29  ;;  %v8299_v52 = vpop.f32.mrb[30].mxu1  ;;  %v5883_v5 = vshrl.u32 %v11648_v50, 16 }
 0x2e1   : > { %6684 = vmatmul.mubr.bf16.gmra.mrb[100].mxu1 %v7862_v15  ;;  %v8300_v25 = vpop.f32.mrb[31].mxu1  ;;  %v5886_v39 = vshll.u32 %v11648_v50, 16  ;;  %v5892_v47 = vshll.u32 %v11475_v51, 16  ;;  %v5896_v55 = vshrl.u32 %v11475_v51, 16  ;;  %v7863_v29 = vcombine.low %v11353_v56, %v11339_v35 }
 0x2e2   : > { %6691 = vmatprep.mubr.bf16.mxu1 %v7879_v14  ;;  %v11652_v40 = vadd.f32 %v8300_v25, %v8299_v52  ;;  %v5847_v15 = vsel %vm9998_vm3, %v5842_v8, %v11428_v34  ;;  %v5857_v4 = vsel %vm9998_vm3, %v5852_v38, %v5856_v32  ;;  %v5875_v52 = vor.u32 %v5874_v1, %v5870_v6 }
 0x2e3   : > { %v5878_v23 = vshll.u32 %v11465_v22, 16  ;;  %v7880_v49 = vcombine.low %v5847_v15, %v5857_v4  ;;  %v5865_v36 = vor.u32 %v5864_v31, %v5861_v53  ;;  %v5885_v34 = vrot.slane %v5883_v5, 4  ;;  %v11676_v5 = vld [vmem:[#allocation2 + $0x9c] sm:$0xf] }
 0x2e4   : > { %v8414_v9 = vpop.f32.mrb[140].mxu0  ;;  %v5888_v8 = vrot.slane %v5886_v39, 5  ;;  %v11669_v27 = vrot.slane %v5892_v47, 5  ;;  %v5898_v54 = vrot.slane %v5896_v55, 4  ;;  %v5876_v30 = vrot.slane %v5875_v52, 4 }
 0x2e5   : > { %v8415_v28 = vpop.f32.mrb[141].mxu0  ;;  %v5880_v31 = vrot.slane %v5878_v23, 5  ;;  %v5866_v39 = vrot.slane %v5865_v36, 4  ;;  %v5902_v4 = vshll.u32 %v11480_v61, 16  ;;  %v7864_v36 = vcombine.low %v11380_v43, %v11386_v60 }
 0x2e6   : > { %v8416_v45 = vadd.f32 %v8415_v28, %v8414_v9  ;;  %v8417_v14 = vpop.f32.mrb[142].mxu0  ;;  %v5889_v9 = vor.u32 %v5888_v8, %v5885_v34  ;;  %v5899_v15 = vor.u32 %v5898_v54, %v11669_v27  ;;  %v5920_v28 = vshrl.u32 %v11490_v0, 16  ;;  %v11692_v34 = vld [vmem:[#allocation2 + $0xa8] sm:$0xf] }
 0x2e7   : > { %v8418_v25 = vpop.f32.mrb[143].mxu0  ;;  %v5881_v55 = vsel %vm9998_vm3, %v5876_v30, %v5880_v31  ;;  %v5871_v61 = vsel %vm9998_vm3, %v5866_v39, %v5870_v6 }
 0x2e8   : > { %v11667_v38 = vadd.f32 %v8416_v45, %v11299_v44  ;;  %v8419_v32 = vadd.f32 %v8418_v25, %v8417_v14  ;;  %v8302_v1 = vpop.f32.mrb[32].mxu1  ;;  %v5910_v45 = vshll.u32 %v11676_v5, 16  ;;  %v7881_v14 = vcombine.low %v5871_v61, %v5881_v55 }
 0x2e9   : > { %6692 = vmatmul.mubr.bf16.gmra.mrb[104].mxu1 %v7863_v29  ;;  %v8303_v56 = vpop.f32.mrb[33].mxu1  ;;  %v5907_v29 = vshrl.u32 %v11676_v5, 16  ;;  %v5890_v30 = vrot.slane %v5889_v9, 4  ;;  %v5900_v25 = vrot.slane %v5899_v15, 4  ;;  %v5931_v15 = vshrl.u32 %v11692_v34, 16 }
 0x2ea   : > { %6699 = vmatprep.mubr.bf16.mxu1 %v7880_v49  ;;  %v11672_v35 = vadd.f32 %v8419_v32, %v11313_v48  ;;  %v11674_v22 = vadd.f32 %v8303_v56, %v8302_v1  ;;  %v8305_v53 = vpop.f32.mrb[34].mxu1  ;;  %v5916_v48 = vshll.u32 %v11490_v0, 16  ;;  %v5904_v1 = vrot.slane %v5902_v4, 5 }
 0x2eb   : > { %v8306_v44 = vpop.f32.mrb[35].mxu1  ;;  %v5909_v6 = vrot.slane %v5907_v29, 4  ;;  %v5934_v55 = vshll.u32 %v11692_v34, 16 }
 0x2ec   : > { %v11680_v47 = vadd.f32 %v8306_v44, %v8305_v53  ;;  %v5918_v56 = vrot.slane %v5916_v48, 5  ;;  %v5922_v53 = vrot.slane %v5920_v28, 4  ;;  %v5912_v44 = vrot.slane %v5910_v45, 5 }
 0x2ed   : > { %v8420_v52 = vpop.f32.mrb[144].mxu0  ;;  %v5895_v48 = vsel %vm9998_vm3, %v5890_v30, %v11669_v27  ;;  %v5940_v45 = vshll.u32 %v11508_v12, 16  ;;  %v5936_v27 = vrot.slane %v5934_v55, 5  ;;  %v11722_v55 = vld [vmem:[#allocation2 + $0xb4] sm:$0xf] }
 0x2ee   : > { %v8421_v54 = vpop.f32.mrb[145].mxu0  ;;  %v5923_v29 = vor.u32 %v5922_v53, %v5918_v56 }
 0x2ef   : > { %v8422_v23 = vadd.f32 %v8421_v54, %v8420_v52  ;;  %v8423_v49 = vpop.f32.mrb[146].mxu0  ;;  %v5913_v54 = vor.u32 %v5912_v44, %v5909_v6  ;;  %v5942_v53 = vrot.slane %v5940_v45, 5 }
 0x2f0   : > { %v8424_v32 = vpop.f32.mrb[147].mxu0 }
 0x2f1   : > { %6700 = vmatmul.mubr.bf16.gmra.mrb[108].mxu1 %v7864_v36  ;;  %v8308_v8 = vpop.f32.mrb[36].mxu1  ;;  %v11695_v43 = vadd.f32 %v8422_v23, %v11391_v10  ;;  %v8425_v60 = vadd.f32 %v8424_v32, %v8423_v49  ;;  %v5905_v10 = vsel %vm9998_vm3, %v5900_v25, %v5904_v1  ;;  %v5944_v36 = vshrl.u32 %v11508_v12, 16 }
 0x2f2   : > { %6707 = vmatprep.mubr.bf16.mxu1 %v7881_v14  ;;  %v8309_v31 = vpop.f32.mrb[37].mxu1  ;;  %v5926_v23 = vshll.u32 %v11515_v57, 16  ;;  %v5933_v49 = vrot.slane %v5931_v15, 4  ;;  %v7882_v30 = vcombine.low %v5895_v48, %v5905_v10  ;;  %v5924_v1 = vrot.slane %v5923_v29, 4 }
 0x2f3   : > { %v11697_v39 = vadd.f32 %v8309_v31, %v8308_v8  ;;  %v8311_v9 = vpop.f32.mrb[38].mxu1  ;;  %v11702_v4 = vadd.f32 %v8425_v60, %v11401_v21  ;;  %v7865_v21 = vcombine.low %v11598_v58, %v11458_v26  ;;  %v5946_v31 = vrot.slane %v5944_v36, 4 }
 0x2f4   : > { %v8312_v52 = vpop.f32.mrb[39].mxu1  ;;  %v5914_v44 = vrot.slane %v5913_v54, 4  ;;  %v5928_v58 = vrot.slane %v5926_v23, 5  ;;  %v5968_v48 = vshrl.u32 %v11526_v7, 16  ;;  %v5950_v54 = vshll.u32 %v11524_v20, 16 }
 0x2f5   : > { %v11709_v28 = vadd.f32 %v8312_v52, %v8311_v9  ;;  %v5937_v9 = vor.u32 %v5936_v27, %v5933_v49  ;;  %v5964_v52 = vshll.u32 %v11526_v7, 16  ;;  %v5947_v45 = vor.u32 %v5946_v31, %v5942_v53 }
 0x2f6   : > { %v8426_v61 = vpop.f32.mrb[148].mxu0  ;;  %v5955_v23 = vshrl.u32 %v11722_v55, 16  ;;  %v5958_v49 = vshll.u32 %v11722_v55, 16 }
 0x2f7   : > { %v8427_v14 = vpop.f32.mrb[149].mxu0 }
 0x2f8   : > { %v8428_v8 = vadd.f32 %v8427_v14, %v8426_v61  ;;  %v8429_v25 = vpop.f32.mrb[150].mxu0  ;;  %v7866_v61 = vcombine.low %v11648_v50, %v11475_v51  ;;  %v5938_v14 = vrot.slane %v5937_v9, 4  ;;  %v11739_v51 = vld [vmem:[#allocation2 + $0xc0] sm:$0xf] }
 0x2f9   : > { %6708 = vmatmul.mubr.bf16.gmra.mrb[112].mxu1 %v7865_v21  ;;  %v8430_v32 = vpop.f32.mrb[151].mxu0 }
 0x2fa   : > { %6715 = vmatprep.mubr.bf16.mxu1 %v7882_v30  ;;  %v11717_v60 = vadd.f32 %v8428_v8, %v11506_v62  ;;  %v8431_v6 = vadd.f32 %v8430_v32, %v8429_v25  ;;  %v5929_v62 = vsel %vm9998_vm3, %v5924_v1, %v5928_v58  ;;  %v5966_v8 = vrot.slane %v5964_v52, 5 }
 0x2fb   : > { %v8314_v26 = vpop.f32.mrb[40].mxu1  ;;  %v5970_v25 = vrot.slane %v5968_v48, 4  ;;  %v5948_v1 = vrot.slane %v5947_v45, 4  ;;  %v5943_v31 = vsel %vm9998_vm3, %v5938_v14, %v5942_v53  ;;  %v5979_v52 = vshrl.u32 %v11739_v51, 16 }
 0x2fc   : > { %v8315_v57 = vpop.f32.mrb[41].mxu1  ;;  %v11720_v15 = vadd.f32 %v8431_v6, %v11522_v3  ;;  %v5919_v3 = vsel %vm9998_vm3, %v5914_v44, %v5918_v56  ;;  %v5952_v6 = vrot.slane %v5950_v54, 5  ;;  %v5957_v44 = vrot.slane %v5955_v23, 4 }
 0x2fd   : > { %v11726_v10 = vadd.f32 %v8315_v57, %v8314_v26  ;;  %v8317_v29 = vpop.f32.mrb[42].mxu1  ;;  %v7883_v30 = vcombine.low %v5919_v3, %v5929_v62  ;;  %v5960_v26 = vrot.slane %v5958_v49, 5  ;;  %v5971_v57 = vor.u32 %v5970_v25, %v5966_v8 }
 0x2fe   : > { %v8318_v36 = vpop.f32.mrb[43].mxu1  ;;  %v5953_v48 = vsel %vm9998_vm3, %v5948_v1, %v5952_v6  ;;  %v5988_v62 = vshll.u32 %v11544_v41, 16  ;;  %v5992_v45 = vshrl.u32 %v11544_v41, 16  ;;  %v5981_v49 = vrot.slane %v5979_v52, 4 }
 0x2ff   : > { %v11735_v21 = vadd.f32 %v8318_v36, %v8317_v29  ;;  %v5982_v29 = vshll.u32 %v11739_v51, 16  ;;  %v5974_v36 = vshll.u32 %v11542_v46, 16  ;;  %v7884_v54 = vcombine.low %v5943_v31, %v5953_v48 }
 0x300   : > { %v8432_v27 = vpop.f32.mrb[152].mxu0  ;;  %v5972_v14 = vrot.slane %v5971_v57, 4  ;;  %v5994_v25 = vrot.slane %v5992_v45, 4  ;;  %v7868_v57 = vcombine.low %v11692_v34, %v11508_v12  ;;  %v5998_v52 = vshll.u32 %v11551_v42, 16 }
 0x301   : > { %6716 = vmatmul.mubr.bf16.gmra.mrb[116].mxu1 %v7866_v61  ;;  %v8433_v32 = vpop.f32.mrb[153].mxu0  ;;  %v5961_v61 = vor.u32 %v5960_v26, %v5957_v44  ;;  %v6012_v44 = vshll.u32 %v11562_v13, 16  ;;  %v6016_v26 = vshrl.u32 %v11562_v13, 16 }
 0x302   : > { %6723 = vmatprep.mubr.bf16.mxu1 %v7883_v30  ;;  %v8434_v50 = vadd.f32 %v8433_v32, %v8432_v27  ;;  %v8435_v56 = vpop.f32.mrb[154].mxu0  ;;  %v5984_v27 = vrot.slane %v5982_v29, 5  ;;  %v5990_v30 = vrot.slane %v5988_v62, 5 }
 0x303   : > { %v8436_v20 = vpop.f32.mrb[155].mxu0  ;;  %v6014_v12 = vrot.slane %v6012_v44, 5  ;;  %v6018_v34 = vrot.slane %v6016_v26, 4 }
 0x304   : > { %v11744_v58 = vadd.f32 %v8434_v50, %v11650_v16  ;;  %v8437_v9 = vadd.f32 %v8436_v20, %v8435_v56  ;;  %v7867_v16 = vcombine.low %v11676_v5, %v11490_v0  ;;  %v5962_v56 = vrot.slane %v5961_v61, 4  ;;  %v11763_v20 = vld [vmem:[#allocation2 + $0xcc] sm:$0xf] }
 0x305   : > { %v5985_v31 = vor.u32 %v5984_v27, %v5981_v49  ;;  %v5995_v6 = vor.u32 %v5994_v25, %v5990_v30  ;;  %v6003_v48 = vshrl.u32 %v11763_v20, 16  ;;  %v6006_v29 = vshll.u32 %v11763_v20, 16 }
 0x306   : > { %v11753_v53 = vadd.f32 %v8437_v9, %v11652_v40  ;;  %v5976_v40 = vrot.slane %v5974_v36, 5  ;;  %v9305_v36 = vld [vmem:[%s12202_s7] sm:$0xff]  }
 0x307   : > { %v5996_v61 = vrot.slane %v5995_v6, 4  ;;  %8884 = vmatprep.subr.bf16.mxu0 %v9305_v36 }
 0x308   : > { %v8438_v3 = vpop.f32.mrb[156].mxu0  ;;  %v5977_v5 = vsel %vm9998_vm3, %v5972_v14, %v5976_v40  ;;  %v6005_v14 = vrot.slane %v6003_v48, 4  ;;  %8885 = vmatpush3.bf16.msra.mxu0 %v9305_v36  ;;  %v6026_v36 = vld [vmem:[#allocation2 + $0x18] sm:$0xe] }
 0x309   : > { %6724 = vmatmul.mubr.bf16.gmra.mrb[120].mxu1 %v7867_v16  ;;  %v8439_v23 = vpop.f32.mrb[157].mxu0  ;;  %v5986_v16 = vrot.slane %v5985_v31, 4 }
 0x30a   : > { %6731 = vmatprep.mubr.bf16.mxu1 %v7884_v54  ;;  %v8440_v32 = vadd.f32 %v8439_v23, %v8438_v3  ;;  %v8441_v1 = vpop.f32.mrb[158].mxu0  ;;  %v6000_v54 = vrot.slane %v5998_v52, 5  ;;  %v6008_v23 = vrot.slane %v6006_v29, 5  ;;  %v7870_v29 = vcombine.low %v11739_v51, %v11544_v41  ;;  %v9369_v41 = vld [vmem:[#allocation2 + $0x34] sm:$0xf] }
 0x30b   : > { %v8442_v50 = vpop.f32.mrb[159].mxu0  ;;  %v5991_v25 = vsel %vm9998_vm3, %v5986_v16, %v5990_v30  ;;  %v7840_v16 = vrot.slane %v6026_v36, 9  ;;  %v6106_v51 = vrot.slane %v9369_v41, 5  ;;  %v9375_v36 = vld [vmem:[#allocation2 + $0x50] sm:$0x1] }
 0x30c   : > { %v11759_v46 = vadd.f32 %v8440_v32, %v11674_v22  ;;  %v8443_v0 = vadd.f32 %v8442_v50, %v8441_v1  ;;  %v5967_v22 = vsel %vm9998_vm3, %v5962_v56, %v5966_v8  ;;  %v6001_v32 = vsel %vm9998_vm3, %v5996_v61, %v6000_v54  ;;  %v9367_v61 = vld [vmem:[#allocation2 + $0x20] sm:$0x1] }
 0x30d   : > { %v7885_v45 = vcombine.low %v5967_v22, %v5977_v5  ;;  %v6019_v1 = vor.u32 %v6018_v34, %v6014_v12  ;;  %v7869_v50 = vcombine.low %v11722_v55, %v11526_v7  ;;  %v6009_v56 = vor.u32 %v6008_v23, %v6005_v14  ;;  %v9366_v55 = vld [vmem:[#allocation2 + $0x1c] sm:$0xf]  ;;  %v9368_v34 = vld [vmem:[#allocation2 + $0x28] sm:$0xf]  ;;  %v6028_v14 = vld [vmem:[#allocation2 + $0x30] sm:$0xe] }
 0x30e   : > { %v11768_v9 = vadd.f32 %v8443_v0, %v11680_v47  ;;  %v6022_v0 = vshll.u32 %v11580_v2, 16  ;;  %v6092_v2 = vrot.slane %v9366_v55, 5  ;;  %v6027_v23 = vld [vmem:[#allocation2 + $0x24] sm:$0xe]  ;;  %v6029_v55 = vld [vmem:[#allocation2 + $0x3c] sm:$0xe] }
 0x30f   : > { %v6020_v6 = vrot.slane %v6019_v1, 4  ;;  %v7842_v1 = vrot.slane %v6028_v14, 9 }
 0x310   : > { %v8444_v62 = vpop.f32.mrb[160].mxu0  ;;  %v6024_v22 = vrot.slane %v6022_v0, 5  ;;  %v7841_v0 = vrot.slane %v6027_v23, 9 }
 0x311   : > { %6732 = vmatmul.mubr.bf16.gmra.mrb[124].mxu1 %v7868_v57  ;;  %v8445_v47 = vpop.f32.mrb[161].mxu0  ;;  %v6010_v57 = vrot.slane %v6009_v56, 4 }
 0x312   : > { %6739 = vmatprep.mubr.bf16.mxu1 %v7885_v45  ;;  %v8446_v8 = vadd.f32 %v8445_v47, %v8444_v62  ;;  %v8447_v3 = vpop.f32.mrb[162].mxu0  ;;  %v6025_v7 = vsel %vm9998_vm3, %v6020_v6, %v6024_v22  ;;  %v6094_v47 = vrot.slane %v6092_v2, 4 }
 0x313   : > { %v8448_v42 = vpop.f32.mrb[163].mxu0  ;;  %v6015_v62 = vsel %vm9998_vm3, %v6010_v57, %v6014_v12  ;;  %v7871_v12 = vcombine.low %v11763_v20, %v11562_v13  ;;  %v9372_v13 = vld [vmem:[#allocation2 + $0x40] sm:$0xf] }
 0x314   : > { %v11781_v49 = vadd.f32 %v8446_v8, %v11697_v39  ;;  %v8449_v27 = vadd.f32 %v8448_v42, %v8447_v3  ;;  %v7886_v39 = vcombine.low %v5991_v25, %v6001_v32  ;;  %v7887_v45 = vcombine.low %v6015_v62, %v6025_v7  ;;  %v9370_v25 = vld [vmem:[#allocation2 + $0x2c] sm:$0x1]  ;;  %v9307_v7 = vld [vmem:[%s12202_s7 + $0x10] sm:$0xff]  }
 0x315   : > { %v6099_v8 = vrot.slane %v9368_v34, 5  ;;  %v6093_v3 = vsel %vm10793_vm6, %v7840_v16, %v6092_v2  ;;  %v6102_v32 = vrot.slane %v9370_v25, 5  ;;  %v6113_v20 = vrot.slane %v9372_v13, 5  ;;  %v12266_v13 = vld [vmem:[#allocation25_spill] sm:$0xff] }
 0x316   : > { %v11788_v40 = vadd.f32 %v8449_v27, %v11709_v28  ;;  %v6108_v27 = vrot.slane %v6106_v51, 4 }
 0x317   : > { %v6101_v54 = vrot.slane %v6099_v8, 4  ;;  %v6115_v22 = vrot.slane %v6113_v20, 4 }
 0x318   : > { %v8450_v5 = vpop.f32.mrb[164].mxu0 }
 0x319   : > { %6740 = vmatmul.mubr.bf16.gmra.mrb[128].mxu1 %v7869_v50  ;;  %v8451_v31 = vpop.f32.mrb[165].mxu0  ;;  %v9371_v50 = vld [vmem:[#allocation2 + $0x38] sm:$0x1] }
 0x31a   : > { %6747 = vmatprep.mubr.bf16.mxu1 %v7886_v39  ;;  %v8452_v30 = vadd.f32 %v8451_v31, %v8450_v5  ;;  %v8453_v44 = vpop.f32.mrb[166].mxu0  ;;  %v6109_v56 = vrot.slane %v9371_v50, 5  ;;  %v6103_v5 = vsel %vm10793_vm6, %v6101_v54, %v6102_v32  ;;  %v9373_v31 = vld [vmem:[#allocation2 + $0x4c] sm:$0xf]  ;;  %v9308_v32 = vld [vmem:[%s12202_s7 + $0x18] sm:$0xff]   ;;  %v12262_v50 = vcombine.low %v11484_v63, %v11499_v18  ;;  %v12273_v18 = vld [vmem:[#allocation30_spill] sm:$0xff] }
 0x31b   : > { %v8454_v26 = vpop.f32.mrb[167].mxu0  ;;  %v6120_v6 = vrot.slane %v9373_v31, 5  ;;  %v12272_v63 = vld [vmem:[#allocation29_spill] sm:$0xff] }
 0x31c   : > { %v11794_v28 = vadd.f32 %v8452_v30, %v11726_v10  ;;  %v8455_v52 = vadd.f32 %v8454_v26, %v8453_v44  ;;  %v9306_v10 = vld [vmem:[%s12202_s7 + $0x8] sm:$0xff]   ;;  %v6110_v39 = vsel %vm10793_vm6, %v6108_v27, %v6109_v56  ;;  %v6100_v30 = vsel %vm10793_vm6, %v7841_v0, %v6099_v8  ;;  %v12263_v56 = vld [vmem:[#allocation23_spill] sm:$0xff]  ;;  %v12264_v0 = vld [vmem:[#allocation24_spill] sm:$0xff] }
 0x31d   : > { %8886 = vmatprep.subr.bf16.mxu0 %v9306_v10  ;;  %v7889_v44 = vcombine.low %v6100_v30, %v6103_v5  ;;  %v6107_v26 = vsel %vm10793_vm6, %v7842_v1, %v6106_v51  ;;  %v6122_v2 = vrot.slane %v6120_v6, 4  ;;  %v12261_v1 = vcombine.low %v11462_v11, %v11469_v33  ;;  %v9309_v5 = vld [vmem:[%s12202_s7 + $0x20] sm:$0xff]   ;;  %v12269_v11 = vld [vmem:[#allocation26_spill] sm:$0xff]  ;;  %v12275_v30 = vld [vmem:[#allocation31_spill] sm:$0xff] }
 0x31e   : > { %v11799_v48 = vadd.f32 %v8455_v52, %v11735_v21  ;;  %v6095_v21 = vrot.slane %v9367_v61, 5  ;;  %8887 = vmatpush3.bf16.msra.mxu0 %v9306_v10  ;;  %v7890_v57 = vcombine.low %v6107_v26, %v6110_v39  ;;  %v6030_v52 = vld [vmem:[#allocation2 + $0x48] sm:$0xe]  ;;  %v6123_v10 = vrot.slane %v9375_v36, 5  ;;  %v9376_v61 = vld [vmem:[#allocation2 + $0x58] sm:$0xf] }
 0x31f   : > { %8888 = vmatprep.subr.bf16.mxu0 %v9307_v7  ;;  %v12265_v24 = vcombine.low %v12263_v56, %v12264_v0  ;;  %v12270_v33 = vld [vmem:[#allocation28_spill] sm:$0xff]  ;;  %v9310_v26 = vld [vmem:[%s12202_s7 + $0x28] sm:$0xff]   ;;  %v12288_v0 = vld [vmem:[#allocation11_spill] sm:$0xff] }
 0x320   : > { %v6096_v59 = vsel %vm10793_vm6, %v6094_v47, %v6095_v21  ;;  %v7843_v47 = vrot.slane %v6029_v55, 9  ;;  %v6127_v21 = vrot.slane %v9376_v61, 5  ;;  %v6124_v34 = vsel %vm10793_vm6, %v6122_v2, %v6123_v10  ;;  %v12281_v55 = vld [vmem:[#allocation36_spill] sm:$0xff]  ;;  %v12282_v2 = vld [vmem:[#allocation37_spill] sm:$0xff] }
 0x321   : > { %6748 = vmatmul.mubr.bf16.gmra.mrb[132].mxu1 %v7870_v29  ;;  %v7888_v42 = vcombine.low %v6093_v3, %v6096_v59  ;;  %v9374_v29 = vld [vmem:[#allocation2 + $0x44] sm:$0x1]  ;;  %v6031_v3 = vld [vmem:[#allocation2 + $0x54] sm:$0xe]  ;;  %v12271_v31 = vcombine.low %v12269_v11, %v12270_v33 }
 0x322   : > { %6755 = vmatprep.mubr.bf16.mxu1 %v7887_v45  ;;  %v6116_v62 = vrot.slane %v9374_v29, 5  ;;  %v7844_v45 = vrot.slane %v6030_v52, 9  ;;  %8889 = vmatpush3.bf16.msra.mxu0 %v9307_v7  ;;  %v6114_v8 = vsel %vm10793_vm6, %v7843_v47, %v6113_v20  ;;  %v7845_v14 = vrot.slane %v6031_v3, 9  ;;  %v12267_v20 = vld [vmem:[#allocation27_spill] sm:$0xff]  ;;  %v12279_v52 = vld [vmem:[#allocation34_spill] sm:$0xff] }
 0x323   : > { %8890 = vmatprep.subr.bf16.mxu0 %v9308_v32  ;;  %v12268_v39 = vcombine.low %v12266_v13, %v12267_v20  ;;  %v12283_v29 = vcombine.low %v12281_v55, %v12282_v2  ;;  %v12292_v2 = vld [vmem:[#allocation15_spill] sm:$0xff] }
 0x324   : > { %v6117_v16 = vsel %vm10793_vm6, %v6115_v22, %v6116_v62  ;;  %v6121_v41 = vsel %vm10793_vm6, %v7844_v45, %v6120_v6  ;;  %v6128_v27 = vsel %vm10793_vm6, %v7845_v14, %v6127_v21  ;;  %v12274_v6 = vcombine.low %v12272_v63, %v12273_v18  ;;  %v12278_v22 = vld [vmem:[#allocation32_spill] sm:$0xff]  ;;  %v12287_v14 = vld [vmem:[#allocation10_spill] sm:$0xff]  ;;  %v12290_v18 = vld [vmem:[#allocation13_spill] sm:$0xff] }
 0x325   : > { %v7891_v59 = vcombine.low %v6114_v8, %v6117_v16  ;;  %v7892_v51 = vcombine.low %v6121_v41, %v6124_v34  ;;  %v12280_v7 = vcombine.low %v12278_v22, %v12279_v52  ;;  %v12284_v16 = vld [vmem:[#allocation7_spill] sm:$0xff]  ;;  %v12285_v8 = vld [vmem:[#allocation8_spill] sm:$0xff] }
 0x326   : > { %8891 = vmatpush3.bf16.msra.mxu0 %v9308_v32 }
 0x327   : > { %8892 = vmatprep.subr.bf16.mxu0 %v9309_v5 }
 0x329   : > { %6756 = vmatmul.mubr.bf16.gmra.mrb[136].mxu1 %v7871_v12  ;;  %v6129_v12 = vrot.slane %v6127_v21, 4 }
 0x32a   : > { %8852 = vmatprep.mubr.bf16.mxu1 %v7888_v42  ;;  %v9377_v42 = vld [vmem:[#allocation2 + $0x5c] sm:$0x1]  ;;  %8893 = vmatpush3.bf16.msra.mxu0 %v9309_v5  ;;  %v12289_v5 = vld [vmem:[#allocation12_spill] sm:$0xff] }
 0x32b   : > { %v6130_v54 = vrot.slane %v9377_v42, 5  ;;  %8894 = vmatprep.subr.bf16.mxu0 %v9310_v26  ;;  %v12286_v42 = vld [vmem:[#allocation9_spill] sm:$0xff] }
 0x32d   : > { %v6131_v23 = vsel %vm10793_vm6, %v6129_v12, %v6130_v54 }
 0x32e   : > { %v7893_v25 = vcombine.low %v6128_v27, %v6131_v23  ;;  %8895 = vmatpush3.bf16.msra.mxu0 %v9310_v26 }
 0x331   : > { %8853 = vmatmul.mubr.bf16.vlgmr.msra.gmra.mrb[44].mxu1 %v7889_v44  ;;  %v12276_v44 = vcombine.low %v11559_v19, %v12275_v30  ;;  %v9311_v19 = vld [vmem:[%s12202_s7 + $0x30] sm:$0xff]  }
 0x332   : > { %8856 = vmatprep.mubr.bf16.mxu1 %v7890_v57  ;;  %v12277_v57 = vcombine.low %v11588_v17, %v11602_v37  ;;  %8896 = vmatprep.subr.bf16.mxu0 %v9311_v19  ;;  %v9312_v17 = vld [vmem:[%s12202_s7 + $0x38] sm:$0xff]   ;;  %v12291_v30 = vld [vmem:[#allocation14_spill] sm:$0xff] }
 0x333   : > { %8897 = vmatpush3.bf16.msra.mxu0 %v9311_v19  ;;  %v12293_v19 = vld [vmem:[#allocation16_spill] sm:$0xff] }
 0x334   : > { %8898 = vmatprep.subr.bf16.mxu0 %v9312_v17 }
 0x337   : > { %8899 = vmatpush3.bf16.msra.mxu0 %v9312_v17 }
 0x339   : > { %8857 = vmatmul.mubr.bf16.gmra.mrb[48].mxu1 %v7891_v59 }
 0x33a   : > { %8860 = vmatprep.mubr.bf16.mxu1 %v7892_v51 }
 0x341   : > { %8861 = vmatmul.mubr.bf16.gmra.mrb[52].mxu1 %v7893_v25 }
 0x342   : > { %8864 = vmatprep.mubr.bf16.mxu1 %v12261_v1 }
 0x349   : > { %8865 = vmatmul.mubr.bf16.gmra.mrb[56].mxu1 %v12262_v50 }
 0x34a   : > { %8868 = vmatprep.mubr.bf16.mxu1 %v12265_v24 }
 0x351   : > { %8869 = vmatmul.mubr.bf16.gmra.mrb[60].mxu1 %v12268_v39 }
 0x352   : > { %8872 = vmatprep.mubr.bf16.mxu1 %v12271_v31 }
 0x359   : > { %8873 = vmatmul.mubr.bf16.gmra.mrb[64].mxu1 %v12274_v6 }
 0x35a   : > { %8876 = vmatprep.mubr.bf16.mxu1 %v12276_v44 }
 0x361   : > { %8877 = vmatmul.mubr.bf16.gmra.mrb[68].mxu1 %v12277_v57 }
 0x362   : > { %8880 = vmatprep.mubr.bf16.mxu1 %v12280_v7 }
 0x369   : > { %8881 = vmatmul.mubr.bf16.gmra.mrb[72].mxu1 %v12283_v29 }
 0x383   : > { %v8496_v37 = vpop.f32.mrb[76].mxu1 }
 0x384   : > { %v8497_v62 = vpop.f32.mrb[77].mxu1 }
 0x385   : > { %v8498_v45 = vadd.f32 %v8497_v62, %v8496_v37  ;;  %v8499_v36 = vpop.f32.mrb[78].mxu1 }
 0x386   : > { %v8500_v10 = vpop.f32.mrb[79].mxu1 }
 0x387   : > { %v8501_v47 = vadd.f32 %v8500_v10, %v8499_v36  ;;  %v11883_v61 = vadd.f32 %v12284_v16, %v8498_v45  ;;  %v12294_v16 = vld [vmem:[#allocation17_spill] sm:$0xff] }
 0x389   : > { %v11886_v59 = vadd.f32 %v12285_v8, %v8501_v47 }
 0x38b   : > { %v8502_v21 = vpop.f32.mrb[80].mxu1 }
 0x38c   : > { %v8503_v34 = vpop.f32.mrb[81].mxu1 }
 0x38d   : > { %v8504_v41 = vadd.f32 %v8503_v34, %v8502_v21  ;;  %v8505_v51 = vpop.f32.mrb[82].mxu1  ;;  %v12295_v34 = vld [vmem:[#allocation18_spill] sm:$0xff] }
 0x38e   : > { %v8506_v12 = vpop.f32.mrb[83].mxu1 }
 0x38f   : > { %v8507_v3 = vadd.f32 %v8506_v12, %v8505_v51  ;;  %v11889_v54 = vadd.f32 %v12286_v42, %v8504_v41 }
 0x391   : > { %v11892_v23 = vadd.f32 %v12287_v14, %v8507_v3 }
 0x393   : > { %v8508_v27 = vpop.f32.mrb[84].mxu1 }
 0x394   : > { %v8509_v25 = vpop.f32.mrb[85].mxu1 }
 0x395   : > { %v8510_v32 = vadd.f32 %v8509_v25, %v8508_v27  ;;  %v8511_v1 = vpop.f32.mrb[86].mxu1  ;;  %v12296_v27 = vld [vmem:[#allocation19_spill] sm:$0xff] }
 0x396   : > { %v8512_v50 = vpop.f32.mrb[87].mxu1 }
 0x397   : > { %v8513_v56 = vadd.f32 %v8512_v50, %v8511_v1  ;;  %v11895_v24 = vadd.f32 %v12288_v0, %v8510_v32  ;;  %v12297_v32 = vld [vmem:[#allocation20_spill] sm:$0xff] }
 0x399   : > { %v11898_v13 = vadd.f32 %v12289_v5, %v8513_v56 }
 0x39b   : > { %v8514_v20 = vpop.f32.mrb[88].mxu1 }
 0x39c   : > { %v8515_v39 = vpop.f32.mrb[89].mxu1 }
 0x39d   : > { %v8516_v11 = vadd.f32 %v8515_v39, %v8514_v20  ;;  %v8517_v33 = vpop.f32.mrb[90].mxu1 }
 0x39e   : > { %v8518_v31 = vpop.f32.mrb[91].mxu1 }
 0x39f   : > { %v8519_v63 = vadd.f32 %v8518_v31, %v8517_v33  ;;  %v11901_v6 = vadd.f32 %v12290_v18, %v8516_v11  ;;  %v12298_v11 = vld [vmem:[#allocation21_spill] sm:$0xff]  ;;  %v12299_v31 = vld [vmem:[#allocation22_spill] sm:$0xff] }
 0x3a1   : > { %v11904_v44 = vadd.f32 %v12291_v30, %v8519_v63 }
 0x3a3   : > { %v8520_v26 = vpop.f32.mrb[92].mxu1 }
 0x3a4   : > { %v8521_v57 = vpop.f32.mrb[93].mxu1 }
 0x3a5   : > { %v8522_v22 = vadd.f32 %v8521_v57, %v8520_v26  ;;  %v8523_v52 = vpop.f32.mrb[94].mxu1 }
 0x3a6   : > { %v8524_v7 = vpop.f32.mrb[95].mxu1 }
 0x3a7   : > { %v8525_v55 = vadd.f32 %v8524_v7, %v8523_v52  ;;  %v11907_v29 = vadd.f32 %v12292_v2, %v8522_v22  ;;  %v12300_v7 = vld [vmem:[#allocation33_spill] sm:$0xff]  ;;  %v12301_v2 = vld [vmem:[#allocation35_spill] sm:$0xff] }
 0x3a9   : > { %v11910_v17 = vadd.f32 %v12293_v19, %v8525_v55 }
 0x3ac   : > { %v8526_v37 = vpop.f32.mrb[96].mxu1 }
 0x3ad   : > { %v8527_v62 = vpop.f32.mrb[97].mxu1 }
 0x3ae   : > { %v8528_v45 = vadd.f32 %v8527_v62, %v8526_v37  ;;  %v8529_v36 = vpop.f32.mrb[98].mxu1 }
 0x3af   : > { %v8530_v10 = vpop.f32.mrb[99].mxu1 }
 0x3b0   : > { %v8531_v47 = vadd.f32 %v8530_v10, %v8529_v36  ;;  %v11913_v21 = vadd.f32 %v12294_v16, %v8528_v45 }
 0x3b2   : > { %v11916_v8 = vadd.f32 %v12295_v34, %v8531_v47 }
 0x3b4   : > { %v8532_v41 = vpop.f32.mrb[100].mxu1 }
 0x3b5   : > { %v8533_v51 = vpop.f32.mrb[101].mxu1 }
 0x3b6   : > { %v8534_v12 = vadd.f32 %v8533_v51, %v8532_v41  ;;  %v8535_v3 = vpop.f32.mrb[102].mxu1 }
 0x3b7   : > { %v8536_v42 = vpop.f32.mrb[103].mxu1 }
 0x3b8   : > { %v8537_v14 = vadd.f32 %v8536_v42, %v8535_v3  ;;  %v11919_v25 = vadd.f32 %v12296_v27, %v8534_v12 }
 0x3ba   : > { %v11922_v1 = vadd.f32 %v12297_v32, %v8537_v14 }
 0x3bc   : > { %v8538_v50 = vpop.f32.mrb[104].mxu1 }
 0x3bd   : > { %v8539_v56 = vpop.f32.mrb[105].mxu1 }
 0x3be   : > { %v8540_v0 = vadd.f32 %v8539_v56, %v8538_v50  ;;  %v8541_v5 = vpop.f32.mrb[106].mxu1 }
 0x3bf   : > { %v8542_v20 = vpop.f32.mrb[107].mxu1 }
 0x3c0   : > { %v8543_v39 = vadd.f32 %v8542_v20, %v8541_v5  ;;  %v11925_v33 = vadd.f32 %v12298_v11, %v8540_v0 }
 0x3c2   : > { %v11928_v63 = vadd.f32 %v12299_v31, %v8543_v39 }
 0x3c4   : > { %v8544_v18 = vpop.f32.mrb[108].mxu1 }
 0x3c5   : > { %v8545_v30 = vpop.f32.mrb[109].mxu1 }
 0x3c6   : > { %v8546_v26 = vadd.f32 %v8545_v30, %v8544_v18  ;;  %v8547_v57 = vpop.f32.mrb[110].mxu1 }
 0x3c7   : > { %v8548_v22 = vpop.f32.mrb[111].mxu1 }
 0x3c8   : > { %v8549_v52 = vadd.f32 %v8548_v22, %v8547_v57  ;;  %v11931_v55 = vadd.f32 %v12300_v7, %v8546_v26 }
 0x3ca   : > { %v11934_v19 = vadd.f32 %v12301_v2, %v8549_v52 }
 0x3cc   : > { %v8550_v37 = vpop.f32.mrb[112].mxu1 }
 0x3cd   : > { %v8551_v62 = vpop.f32.mrb[113].mxu1 }
 0x3ce   : > { %v8552_v45 = vadd.f32 %v8551_v62, %v8550_v37  ;;  %v8553_v36 = vpop.f32.mrb[114].mxu1 }
 0x3cf   : > { %v8554_v10 = vpop.f32.mrb[115].mxu1 }
 0x3d0   : > { %v8555_v47 = vadd.f32 %v8554_v10, %v8553_v36  ;;  %v11937_v16 = vadd.f32 %v11667_v38, %v8552_v45 }
 0x3d2   : > { %v11940_v34 = vadd.f32 %v11672_v35, %v8555_v47 }
 0x3d4   : > { %v8556_v41 = vpop.f32.mrb[116].mxu1 }
 0x3d5   : > { %v8557_v51 = vpop.f32.mrb[117].mxu1 }
 0x3d6   : > { %v8558_v12 = vadd.f32 %v8557_v51, %v8556_v41  ;;  %v8559_v3 = vpop.f32.mrb[118].mxu1 }
 0x3d7   : > { %v8560_v42 = vpop.f32.mrb[119].mxu1 }
 0x3d8   : > { %v8561_v14 = vadd.f32 %v8560_v42, %v8559_v3  ;;  %v11943_v27 = vadd.f32 %v11695_v43, %v8558_v12 }
 0x3da   : > { %v11946_v32 = vadd.f32 %v11702_v4, %v8561_v14 }
 0x3dc   : > { %v8562_v50 = vpop.f32.mrb[120].mxu1 }
 0x3dd   : > { %v8563_v56 = vpop.f32.mrb[121].mxu1 }
 0x3de   : > { %v8564_v0 = vadd.f32 %v8563_v56, %v8562_v50  ;;  %v8565_v38 = vpop.f32.mrb[122].mxu1 }
 0x3df   : > { %v8566_v5 = vpop.f32.mrb[123].mxu1 }
 0x3e0   : > { %v8567_v20 = vadd.f32 %v8566_v5, %v8565_v38  ;;  %v11949_v35 = vadd.f32 %v11717_v60, %v8564_v0 }
 0x3e2   : > { %v11952_v39 = vadd.f32 %v11720_v15, %v8567_v20 }
 0x3e4   : > { %v8568_v11 = vpop.f32.mrb[124].mxu1 }
 0x3e5   : > { %v8569_v31 = vpop.f32.mrb[125].mxu1 }
 0x3e6   : > { %v8570_v18 = vadd.f32 %v8569_v31, %v8568_v11  ;;  %v8571_v43 = vpop.f32.mrb[126].mxu1 }
 0x3e7   : > { %v8572_v30 = vpop.f32.mrb[127].mxu1 }
 0x3e8   : > { %v8573_v26 = vadd.f32 %v8572_v30, %v8571_v43  ;;  %v11955_v4 = vadd.f32 %v11744_v58, %v8570_v18 }
 0x3ea   : > { %v11958_v57 = vadd.f32 %v11753_v53, %v8573_v26 }
 0x3ec   : > { %v8574_v22 = vpop.f32.mrb[128].mxu1 }
 0x3ed   : > { %v8575_v52 = vpop.f32.mrb[129].mxu1 }
 0x3ee   : > { %v8576_v7 = vadd.f32 %v8575_v52, %v8574_v22  ;;  %v8577_v60 = vpop.f32.mrb[130].mxu1 }
 0x3ef   : > { %v8578_v2 = vpop.f32.mrb[131].mxu1 }
 0x3f0   : > { %v8579_v37 = vadd.f32 %v8578_v2, %v8577_v60  ;;  %v11961_v15 = vadd.f32 %v11759_v46, %v8576_v7 }
 0x3f2   : > { %v11964_v62 = vadd.f32 %v11768_v9, %v8579_v37 }
 0x3f4   : > { %v8580_v45 = vpop.f32.mrb[132].mxu1 }
 0x3f5   : > { %v8581_v36 = vpop.f32.mrb[133].mxu1 }
 0x3f6   : > { %v8582_v10 = vadd.f32 %v8581_v36, %v8580_v45  ;;  %v8583_v58 = vpop.f32.mrb[134].mxu1 }
 0x3f7   : > { %v8584_v47 = vpop.f32.mrb[135].mxu1 }
 0x3f8   : > { %v8585_v41 = vadd.f32 %v8584_v47, %v8583_v58  ;;  %v11967_v53 = vadd.f32 %v11781_v49, %v8582_v10  ;;  %v11981_v49 = vld [vmem:[%s12201_s6] ss:$0 sm:$0xff] }
 0x3fa   : > { %v11970_v51 = vadd.f32 %v11788_v40, %v8585_v41 }
 0x3fc   : > { %v8586_v12 = vpop.f32.mrb[136].mxu1 }
 0x3fd   : > { %v8587_v3 = vpop.f32.mrb[137].mxu1 }
 0x3fe   : > { %v8588_v42 = vadd.f32 %v8587_v3, %v8586_v12  ;;  %v8589_v46 = vpop.f32.mrb[138].mxu1 }
 0x3ff   : > { %v8590_v14 = vpop.f32.mrb[139].mxu1 }
 0x400   : > { %v8591_v50 = vadd.f32 %v8590_v14, %v8589_v46  ;;  %v11973_v9 = vadd.f32 %v11794_v28, %v8588_v42 }
 0x402   : > { %v11976_v56 = vadd.f32 %v11799_v48, %v8591_v50 }
 0x404   : > { %v8854_v0 = vpop.f32.mrb[44].mxu1 }
 0x405   : > { %v8950_v40 = vadd.f32 %v11889_v54, %v8854_v0  ;;  %v6798_v38 = vpop.f32.mrb[45].mxu1 }
 0x406   : > { %v8953_v5 = vadd.f32 %v11883_v61, %v6798_v38  ;;  %v8855_v20 = vpop.f32.mrb[46].mxu1 }
 0x407   : > { %v6966_v11 = vadd.f32 %v8950_v40, %v11981_v49  ;;  %v8956_v28 = vadd.f32 %v11892_v23, %v8855_v20  ;;  %v6801_v31 = vpop.f32.mrb[47].mxu1 }
 0x408   : > { %v6964_v48 = vadd.f32 %v8953_v5, %v11981_v49  ;;  %v8959_v18 = vadd.f32 %v11886_v59, %v6801_v31 }
 0x409   : > { %v6967_v43 = vadd.f32 %v8956_v28, %v11981_v49  ;;  %v6998_v26 = vmax.f32 %v6966_v11, 0.0 }
 0x40a   : > { %v6965_v30 = vadd.f32 %v8959_v18, %v11981_v49  ;;  %v6996_v54 = vmax.f32 %v6964_v48, 0.0 }
 0x40b   : > { %v6999_v22 = vmax.f32 %v6967_v43, 0.0 }
 0x40c   : > { %v6997_v52 = vmax.f32 %v6965_v30, 0.0  ;;  %v8858_v7 = vpop.f32.mrb[48].mxu1 }
 0x40d   : > { %v7029_v61 = vpack.c.bf16 %v6999_v22, %v6998_v26  ;;  %v8962_v60 = vadd.f32 %v11901_v6, %v8858_v7  ;;  %v6814_v2 = vpop.f32.mrb[49].mxu1 }
 0x40e   : > { %v8965_v23 = vadd.f32 %v11895_v24, %v6814_v2  ;;  %v8859_v37 = vpop.f32.mrb[50].mxu1  ;;  %v7028_v45 = vpack.c.bf16 %v6997_v52, %v6996_v54 }
 0x40f   : > { %v6970_v36 = vadd.f32 %v8962_v60, %v11981_v49  ;;  %v8968_v59 = vadd.f32 %v11904_v44, %v8859_v37  ;;  %v6817_v10 = vpop.f32.mrb[51].mxu1 }
 0x410   : > { %v6968_v58 = vadd.f32 %v8965_v23, %v11981_v49  ;;  %v8971_v47 = vadd.f32 %v11898_v13, %v6817_v10  ;;  %8900 = vmatprep.mubr.bf16.mxu0 %v7028_v45 }
 0x411   : > { %v6971_v41 = vadd.f32 %v8968_v59, %v11981_v49  ;;  %8901 = vmatmul.mubr.bf16.vlgmr.msra.gmra.mrb[168].mxu0 %v7029_v61  ;;  %v7002_v12 = vmax.f32 %v6970_v36, 0.0 }
 0x412   : > { %v6969_v6 = vadd.f32 %v8971_v47, %v11981_v49  ;;  %v7000_v24 = vmax.f32 %v6968_v58, 0.0 }
 0x413   : > { %v7003_v3 = vmax.f32 %v6971_v41, 0.0 }
 0x414   : > { %v7001_v42 = vmax.f32 %v6969_v6, 0.0  ;;  %v8862_v46 = vpop.f32.mrb[52].mxu1 }
 0x415   : > { %v8974_v14 = vadd.f32 %v11913_v21, %v8862_v46  ;;  %v6830_v50 = vpop.f32.mrb[53].mxu1  ;;  %v7031_v44 = vpack.c.bf16 %v7003_v3, %v7002_v12 }
 0x416   : > { %v8977_v0 = vadd.f32 %v11907_v29, %v6830_v50  ;;  %v8863_v40 = vpop.f32.mrb[54].mxu1  ;;  %v7030_v38 = vpack.c.bf16 %v7001_v42, %v7000_v24 }
 0x417   : > { %v6974_v13 = vadd.f32 %v8974_v14, %v11981_v49  ;;  %v8980_v5 = vadd.f32 %v11916_v8, %v8863_v40  ;;  %v6833_v20 = vpop.f32.mrb[55].mxu1 }
 0x418   : > { %v6972_v11 = vadd.f32 %v8977_v0, %v11981_v49  ;;  %v8983_v28 = vadd.f32 %v11910_v17, %v6833_v20  ;;  %8904 = vmatprep.mubr.bf16.mxu0 %v7030_v38 }
 0x419   : > { %v6975_v31 = vadd.f32 %v8980_v5, %v11981_v49  ;;  %8905 = vmatmul.mubr.bf16.gmra.mrb[172].mxu0 %v7031_v44  ;;  %v7006_v48 = vmax.f32 %v6974_v13, 0.0 }
 0x41a   : > { %v6973_v21 = vadd.f32 %v8983_v28, %v11981_v49  ;;  %v7004_v29 = vmax.f32 %v6972_v11, 0.0 }
 0x41b   : > { %v7007_v18 = vmax.f32 %v6975_v31, 0.0 }
 0x41c   : > { %v7005_v43 = vmax.f32 %v6973_v21, 0.0  ;;  %v8866_v30 = vpop.f32.mrb[56].mxu1 }
 0x41d   : > { %v8986_v26 = vadd.f32 %v11925_v33, %v8866_v30  ;;  %v6846_v22 = vpop.f32.mrb[57].mxu1  ;;  %v7033_v8 = vpack.c.bf16 %v7007_v18, %v7006_v48 }
 0x41e   : > { %v8989_v54 = vadd.f32 %v11919_v25, %v6846_v22  ;;  %v8867_v52 = vpop.f32.mrb[58].mxu1  ;;  %v7032_v7 = vpack.c.bf16 %v7005_v43, %v7004_v29 }
 0x41f   : > { %v6978_v17 = vadd.f32 %v8986_v26, %v11981_v49  ;;  %v8992_v61 = vadd.f32 %v11928_v63, %v8867_v52  ;;  %v6849_v60 = vpop.f32.mrb[59].mxu1 }
 0x420   : > { %v6976_v2 = vadd.f32 %v8989_v54, %v11981_v49  ;;  %v8995_v23 = vadd.f32 %v11922_v1, %v6849_v60  ;;  %8908 = vmatprep.mubr.bf16.mxu0 %v7032_v7 }
 0x421   : > { %v6979_v37 = vadd.f32 %v8992_v61, %v11981_v49  ;;  %8909 = vmatmul.mubr.bf16.gmra.mrb[176].mxu0 %v7033_v8  ;;  %v7010_v45 = vmax.f32 %v6978_v17, 0.0 }
 0x422   : > { %v6977_v33 = vadd.f32 %v8995_v23, %v11981_v49  ;;  %v7008_v25 = vmax.f32 %v6976_v2, 0.0 }
 0x423   : > { %v7011_v36 = vmax.f32 %v6979_v37, 0.0 }
 0x424   : > { %v7009_v59 = vmax.f32 %v6977_v33, 0.0  ;;  %v8870_v10 = vpop.f32.mrb[60].mxu1 }
 0x425   : > { %v8998_v58 = vadd.f32 %v11937_v16, %v8870_v10  ;;  %v6862_v47 = vpop.f32.mrb[61].mxu1  ;;  %v7035_v63 = vpack.c.bf16 %v7011_v36, %v7010_v45 }
 0x426   : > { %v9001_v41 = vadd.f32 %v11931_v55, %v6862_v47  ;;  %v8871_v6 = vpop.f32.mrb[62].mxu1  ;;  %v7034_v12 = vpack.c.bf16 %v7009_v59, %v7008_v25 }
 0x427   : > { %v6982_v1 = vadd.f32 %v8998_v58, %v11981_v49  ;;  %v9004_v3 = vadd.f32 %v11940_v34, %v8871_v6  ;;  %v6865_v24 = vpop.f32.mrb[63].mxu1 }
 0x428   : > { %v6980_v42 = vadd.f32 %v9001_v41, %v11981_v49  ;;  %v9007_v46 = vadd.f32 %v11934_v19, %v6865_v24  ;;  %8912 = vmatprep.mubr.bf16.mxu0 %v7034_v12 }
 0x429   : > { %v6983_v14 = vadd.f32 %v9004_v3, %v11981_v49  ;;  %8913 = vmatmul.mubr.bf16.gmra.mrb[180].mxu0 %v7035_v63  ;;  %v7014_v50 = vmax.f32 %v6982_v1, 0.0 }
 0x42a   : > { %v6981_v16 = vadd.f32 %v9007_v46, %v11981_v49  ;;  %v7012_v55 = vmax.f32 %v6980_v42, 0.0 }
 0x42b   : > { %v7015_v44 = vmax.f32 %v6983_v14, 0.0  ;;  %v8093_v14 = vld [vmem:[%s12051_s21] sm:$0xff]  }
 0x42c   : > { %v7013_v0 = vmax.f32 %v6981_v16, 0.0  ;;  %v8874_v40 = vpop.f32.mrb[64].mxu1 }
 0x42d   : > { %v9010_v38 = vadd.f32 %v11949_v35, %v8874_v40  ;;  %v6878_v13 = vpop.f32.mrb[65].mxu1  ;;  %v7037_v34 = vpack.c.bf16 %v7015_v44, %v7014_v50  ;;  %v8094_v44 = vunpack.c.l.bf16 %v8093_v14 }
 0x42e   : > { %v9013_v5 = vadd.f32 %v11943_v27, %v6878_v13  ;;  %v8875_v20 = vpop.f32.mrb[66].mxu1  ;;  %v7036_v11 = vpack.c.bf16 %v7013_v0, %v7012_v55 }
 0x42f   : > { %v6986_v19 = vadd.f32 %v9010_v38, %v11981_v49  ;;  %v9016_v28 = vadd.f32 %v11952_v39, %v8875_v20  ;;  %v6881_v31 = vpop.f32.mrb[67].mxu1 }
 0x430   : > { %v6984_v21 = vadd.f32 %v9013_v5, %v11981_v49  ;;  %v9019_v48 = vadd.f32 %v11946_v32, %v6881_v31  ;;  %8916 = vmatprep.mubr.bf16.mxu0 %v7036_v11  ;;  %v8166_v31 = vld [vmem:[%s12051_s21 + $0x18] sm:$0xff]  }
 0x431   : > { %v6987_v18 = vadd.f32 %v9016_v28, %v11981_v49  ;;  %8917 = vmatmul.mubr.bf16.gmra.mrb[184].mxu0 %v7037_v34  ;;  %v7018_v29 = vmax.f32 %v6986_v19, 0.0  ;;  %v8095_v34 = vunpack.c.h.bf16 %v8093_v14 }
 0x432   : > { %v6985_v35 = vadd.f32 %v9019_v48, %v11981_v49  ;;  %v7016_v27 = vmax.f32 %v6984_v21, 0.0 }
 0x433   : > { %v7019_v43 = vmax.f32 %v6987_v18, 0.0  ;;  %v8165_v18 = vld [vmem:[%s12051_s21 + $0x10] sm:$0xff]  }
 0x434   : > { %v7017_v30 = vmax.f32 %v6985_v35, 0.0  ;;  %v8878_v26 = vpop.f32.mrb[68].mxu1 }
 0x435   : > { %v9022_v22 = vadd.f32 %v11961_v15, %v8878_v26  ;;  %v6894_v8 = vpop.f32.mrb[69].mxu1  ;;  %v7039_v39 = vpack.c.bf16 %v7019_v43, %v7018_v29 }
 0x436   : > { %v9025_v54 = vadd.f32 %v11955_v4, %v6894_v8  ;;  %v8879_v52 = vpop.f32.mrb[70].mxu1  ;;  %v7038_v7 = vpack.c.bf16 %v7017_v30, %v7016_v27  ;;  %v8106_v27 = vunpack.c.l.bf16 %v8166_v31 }
 0x437   : > { %v6990_v32 = vadd.f32 %v9022_v22, %v11981_v49  ;;  %v9028_v17 = vadd.f32 %v11964_v62, %v8879_v52  ;;  %v6897_v61 = vpop.f32.mrb[71].mxu1  ;;  %v8102_v22 = vunpack.c.l.bf16 %v8165_v18 }
 0x438   : > { %v6988_v60 = vadd.f32 %v9025_v54, %v11981_v49  ;;  %v9031_v2 = vadd.f32 %v11958_v57, %v6897_v61  ;;  %8920 = vmatprep.mubr.bf16.mxu0 %v7038_v7  ;;  %v8107_v54 = vunpack.c.h.bf16 %v8166_v31 }
 0x439   : > { %v6991_v23 = vadd.f32 %v9028_v17, %v11981_v49  ;;  %8921 = vmatmul.mubr.bf16.gmra.mrb[188].mxu0 %v7039_v39  ;;  %v7022_v37 = vmax.f32 %v6990_v32, 0.0  ;;  %v8103_v32 = vunpack.c.h.bf16 %v8165_v18  ;;  %v8172_v18 = vld [vmem:[%s12051_s21 + $0x48] sm:$0xff]  }
 0x43a   : > { %v6989_v15 = vadd.f32 %v9031_v2, %v11981_v49  ;;  %v7020_v4 = vmax.f32 %v6988_v60, 0.0 }
 0x43b   : > { %v7023_v33 = vmax.f32 %v6991_v23, 0.0 }
 0x43c   : > { %v7021_v45 = vmax.f32 %v6989_v15, 0.0  ;;  %v8882_v36 = vpop.f32.mrb[72].mxu1  ;;  %v8168_v15 = vld [vmem:[%s12051_s21 + $0x28] sm:$0xff]  }
 0x43d   : > { %v9034_v25 = vadd.f32 %v11973_v9, %v8882_v36  ;;  %v6910_v59 = vpop.f32.mrb[73].mxu1  ;;  %v7041_v62 = vpack.c.bf16 %v7023_v33, %v7022_v37 }
 0x43e   : > { %v9037_v10 = vadd.f32 %v11967_v53, %v6910_v59  ;;  %v8883_v58 = vpop.f32.mrb[74].mxu1  ;;  %v7040_v47 = vpack.c.bf16 %v7021_v45, %v7020_v4  ;;  %v8167_v4 = vld [vmem:[%s12051_s21 + $0x20] sm:$0xff]   ;;  %v8114_v59 = vunpack.c.l.bf16 %v8168_v15 }
 0x43f   : > { %v6994_v57 = vadd.f32 %v9034_v25, %v11981_v49  ;;  %v9040_v63 = vadd.f32 %v11976_v56, %v8883_v58  ;;  %v6913_v41 = vpop.f32.mrb[75].mxu1  ;;  %v8110_v58 = vunpack.c.l.bf16 %v8167_v4 }
 0x440   : > { %v6992_v6 = vadd.f32 %v9037_v10, %v11981_v49  ;;  %v9043_v12 = vadd.f32 %v11970_v51, %v6913_v41  ;;  %8924 = vmatprep.mubr.bf16.mxu0 %v7040_v47  ;;  %v8164_v51 = vld [vmem:[%s12051_s21 + $0x8] sm:$0xff]  }
 0x441   : > { %v6995_v9 = vadd.f32 %v9040_v63, %v11981_v49  ;;  %8925 = vmatmul.mubr.bf16.gmra.mrb[192].mxu0 %v7041_v62  ;;  %v7026_v53 = vmax.f32 %v6994_v57, 0.0  ;;  %v8098_v16 = vunpack.c.l.bf16 %v8164_v51  ;;  %v8099_v40 = vunpack.c.h.bf16 %v8164_v51  ;;  %v8169_v51 = vld [vmem:[%s12051_s21 + $0x30] sm:$0xff]  }
 0x442   : > { %v6993_v1 = vadd.f32 %v9043_v12, %v11981_v49  ;;  %v7024_v24 = vmax.f32 %v6992_v6, 0.0  ;;  %v12059_v49 = vld [vmem:[%s12203_s8] ss:$0 sm:$0xff]  ;;  %v8115_v63 = vunpack.c.h.bf16 %v8168_v15  ;;  %v8111_v12 = vunpack.c.h.bf16 %v8167_v4  ;;  %v8174_v4 = vld [vmem:[%s12051_s21 + $0x58] sm:$0xff]  }
 0x443   : > { %v7027_v3 = vmax.f32 %v6995_v9, 0.0 }
 0x444   : > { %v7025_v42 = vmax.f32 %v6993_v1, 0.0 }
 0x445   : > { %v7043_v46 = vpack.c.bf16 %v7027_v3, %v7026_v53 }
 0x446   : > { %v7042_v56 = vpack.c.bf16 %v7025_v42, %v7024_v24  ;;  %v8170_v42 = vld [vmem:[%s12051_s21 + $0x38] sm:$0xff]  }
 0x448   : > { %8928 = vmatprep.mubr.bf16.mxu0 %v7042_v56 }
 0x449   : > { %8929 = vmatmul.mubr.bf16.gmra.mrb[196].mxu0 %v7043_v46 }
 0x4e4   : > { %v8902_v50 = vpop.f32.mrb[168].mxu0 }
 0x4e5   : > { %v7158_v55 = vadd.f32 %v8902_v50, %v12059_v49  ;;  %v7149_v0 = vpop.f32.mrb[169].mxu0 }
 0x4e6   : > { %v7150_v38 = vadd.f32 %v12059_v49, %v7149_v0  ;;  %v8903_v13 = vpop.f32.mrb[170].mxu0 }
 0x4e7   : > { %v7342_v5 = vadd.f32 %v8098_v16, %v7158_v55  ;;  %v7161_v20 = vadd.f32 %v8903_v13, %v12059_v49  ;;  %v7152_v11 = vpop.f32.mrb[171].mxu0 }
 0x4e8   : > { %v7340_v19 = vadd.f32 %v8094_v44, %v7150_v38  ;;  %v7153_v28 = vadd.f32 %v12059_v49, %v7152_v11  ;;  %v8122_v44 = vunpack.c.l.bf16 %v8170_v42  ;;  %v8119_v11 = vunpack.c.h.bf16 %v8169_v51 }
 0x4e9   : > { %v7374_v21 = vmax.f32 %v7342_v5, 0.0  ;;  %v7343_v48 = vadd.f32 %v8099_v40, %v7161_v20  ;;  %v8118_v40 = vunpack.c.l.bf16 %v8169_v51  ;;  %v8176_v51 = vld [vmem:[%s12051_s21 + $0x68] sm:$0xff]  }
 0x4ea   : > { %v7372_v35 = vmax.f32 %v7340_v19, 0.0  ;;  %v7341_v29 = vadd.f32 %v8095_v34, %v7153_v28  ;;  %v8123_v34 = vunpack.c.h.bf16 %v8170_v42 }
 0x4eb   : > { %7406 = vst [vmem:[%s12069_s24 + $0x10] sm:$0xff] %v7374_v21  ;;  %v7375_v43 = vmax.f32 %v7343_v48, 0.0 }
 0x4ec   : > { %7404 = vst [vmem:[%s12069_s24] sm:$0xff] %v7372_v35  ;;  %v7373_v30 = vmax.f32 %v7341_v29, 0.0  ;;  %v8906_v26 = vpop.f32.mrb[172].mxu0 }
 0x4ed   : > { %7407 = vst [vmem:[%s12069_s24 + $0x18] sm:$0xff] %v7375_v43  ;;  %v7174_v8 = vadd.f32 %v8906_v26, %v12059_v49  ;;  %v7165_v39 = vpop.f32.mrb[173].mxu0  ;;  %v8171_v43 = vld [vmem:[%s12051_s21 + $0x40] sm:$0xff]  }
 0x4ee   : > { %7405 = vst [vmem:[%s12069_s24 + $0x8] sm:$0xff] %v7373_v30  ;;  %v7166_v52 = vadd.f32 %v12059_v49, %v7165_v39  ;;  %v8907_v7 = vpop.f32.mrb[174].mxu0 }
 0x4ef   : > { %v7346_v17 = vadd.f32 %v8106_v27, %v7174_v8  ;;  %v7177_v61 = vadd.f32 %v8907_v7, %v12059_v49  ;;  %v7168_v60 = vpop.f32.mrb[175].mxu0 }
 0x4f0   : > { %v7344_v2 = vadd.f32 %v8102_v22, %v7166_v52  ;;  %v7169_v23 = vadd.f32 %v12059_v49, %v7168_v60  ;;  %v8130_v22 = vunpack.c.l.bf16 %v8172_v18  ;;  %v8127_v60 = vunpack.c.h.bf16 %v8171_v43 }
 0x4f1   : > { %v7378_v37 = vmax.f32 %v7346_v17, 0.0  ;;  %v7347_v33 = vadd.f32 %v8107_v54, %v7177_v61  ;;  %v8126_v54 = vunpack.c.l.bf16 %v8171_v43  ;;  %v8178_v43 = vld [vmem:[%s12051_s21 + $0x78] sm:$0xff]  }
 0x4f2   : > { %v7376_v45 = vmax.f32 %v7344_v2, 0.0  ;;  %v7345_v36 = vadd.f32 %v8103_v32, %v7169_v23  ;;  %v8131_v32 = vunpack.c.h.bf16 %v8172_v18 }
 0x4f3   : > { %7410 = vst [vmem:[%s12069_s24 + $0x30] sm:$0xff] %v7378_v37  ;;  %v7379_v25 = vmax.f32 %v7347_v33, 0.0 }
 0x4f4   : > { %7408 = vst [vmem:[%s12069_s24 + $0x20] sm:$0xff] %v7376_v45  ;;  %v7377_v62 = vmax.f32 %v7345_v36, 0.0  ;;  %v8910_v10 = vpop.f32.mrb[176].mxu0 }
 0x4f5   : > { %7411 = vst [vmem:[%s12069_s24 + $0x38] sm:$0xff] %v7379_v25  ;;  %v7190_v47 = vadd.f32 %v8910_v10, %v12059_v49  ;;  %v7181_v57 = vpop.f32.mrb[177].mxu0  ;;  %v8173_v25 = vld [vmem:[%s12051_s21 + $0x50] sm:$0xff]  }
 0x4f6   : > { %7409 = vst [vmem:[%s12069_s24 + $0x28] sm:$0xff] %v7377_v62  ;;  %v7182_v41 = vadd.f32 %v12059_v49, %v7181_v57  ;;  %v8911_v6 = vpop.f32.mrb[178].mxu0 }
 0x4f7   : > { %v7350_v9 = vadd.f32 %v8114_v59, %v7190_v47  ;;  %v7193_v1 = vadd.f32 %v8911_v6, %v12059_v49  ;;  %v7184_v53 = vpop.f32.mrb[179].mxu0 }
 0x4f8   : > { %v7348_v3 = vadd.f32 %v8110_v58, %v7182_v41  ;;  %v7185_v24 = vadd.f32 %v12059_v49, %v7184_v53  ;;  %v8138_v58 = vunpack.c.l.bf16 %v8174_v4  ;;  %v8135_v53 = vunpack.c.h.bf16 %v8173_v25 }
 0x4f9   : > { %v7382_v46 = vmax.f32 %v7350_v9, 0.0  ;;  %v7351_v56 = vadd.f32 %v8115_v63, %v7193_v1  ;;  %v8134_v63 = vunpack.c.l.bf16 %v8173_v25 }
 0x4fa   : > { %v7380_v14 = vmax.f32 %v7348_v3, 0.0  ;;  %v7349_v16 = vadd.f32 %v8111_v12, %v7185_v24  ;;  %v8139_v12 = vunpack.c.h.bf16 %v8174_v4 }
 0x4fb   : > { %7414 = vst [vmem:[%s12069_s24 + $0x50] sm:$0xff] %v7382_v46  ;;  %v7383_v50 = vmax.f32 %v7351_v56, 0.0 }
 0x4fc   : > { %7412 = vst [vmem:[%s12069_s24 + $0x40] sm:$0xff] %v7380_v14  ;;  %v7381_v55 = vmax.f32 %v7349_v16, 0.0  ;;  %v8914_v0 = vpop.f32.mrb[180].mxu0 }
 0x4fd   : > { %7415 = vst [vmem:[%s12069_s24 + $0x58] sm:$0xff] %v7383_v50  ;;  %v7206_v38 = vadd.f32 %v8914_v0, %v12059_v49  ;;  %v7197_v13 = vpop.f32.mrb[181].mxu0  ;;  %v8175_v50 = vld [vmem:[%s12051_s21 + $0x60] sm:$0xff]  }
 0x4fe   : > { %7413 = vst [vmem:[%s12069_s24 + $0x48] sm:$0xff] %v7381_v55  ;;  %v7198_v5 = vadd.f32 %v12059_v49, %v7197_v13  ;;  %v8915_v20 = vpop.f32.mrb[182].mxu0 }
 0x4ff   : > { %v7354_v19 = vadd.f32 %v8122_v44, %v7206_v38  ;;  %v7209_v28 = vadd.f32 %v8915_v20, %v12059_v49  ;;  %v7200_v31 = vpop.f32.mrb[183].mxu0 }
 0x500   : > { %v7352_v21 = vadd.f32 %v8118_v40, %v7198_v5  ;;  %v7201_v48 = vadd.f32 %v12059_v49, %v7200_v31  ;;  %v8146_v40 = vunpack.c.l.bf16 %v8176_v51  ;;  %v8143_v31 = vunpack.c.h.bf16 %v8175_v50 }
 0x501   : > { %v7386_v35 = vmax.f32 %v7354_v19, 0.0  ;;  %v7355_v29 = vadd.f32 %v8123_v34, %v7209_v28  ;;  %v8142_v34 = vunpack.c.l.bf16 %v8175_v50 }
 0x502   : > { %v7384_v27 = vmax.f32 %v7352_v21, 0.0  ;;  %v7353_v30 = vadd.f32 %v8119_v11, %v7201_v48  ;;  %v8147_v11 = vunpack.c.h.bf16 %v8176_v51 }
 0x503   : > { %7418 = vst [vmem:[%s12069_s24 + $0x70] sm:$0xff] %v7386_v35  ;;  %v7387_v26 = vmax.f32 %v7355_v29, 0.0 }
 0x504   : > { %7416 = vst [vmem:[%s12069_s24 + $0x60] sm:$0xff] %v7384_v27  ;;  %v7385_v8 = vmax.f32 %v7353_v30, 0.0  ;;  %v8918_v39 = vpop.f32.mrb[184].mxu0 }
 0x505   : > { %7419 = vst [vmem:[%s12069_s24 + $0x78] sm:$0xff] %v7387_v26  ;;  %v7222_v52 = vadd.f32 %v8918_v39, %v12059_v49  ;;  %v7213_v7 = vpop.f32.mrb[185].mxu0  ;;  %v8177_v26 = vld [vmem:[%s12051_s21 + $0x70] sm:$0xff]   ;;  %s9382_s21 = sshll.u32 %s9446_s18, 4  ;;  %s9383_s21 = int_to_ptr.vmem [resolvable:$false] %s9382_s21 }
 0x506   : > { %7417 = vst [vmem:[%s12069_s24 + $0x68] sm:$0xff] %v7385_v8  ;;  %v7214_v17 = vadd.f32 %v12059_v49, %v7213_v7  ;;  %v8919_v61 = vpop.f32.mrb[186].mxu0  ;;  %s9384_s23 = scalar_lea.vmem %s9383_s21, 8192  ;;  %p9385_p0 = scmp.lt.s32.totalorder %s12147_s27, %s9383_s21 }
 0x507   : > { %v7358_v2 = vadd.f32 %v8130_v22, %v7222_v52  ;;  %v7225_v23 = vadd.f32 %v8919_v61, %v12059_v49  ;;  %v7216_v15 = vpop.f32.mrb[187].mxu0  ;;  %p9386_p1 = scmp.lt.s32.totalorder %s9384_s23, %s9378_s17 }
 0x508   : > { %v7356_v37 = vadd.f32 %v8126_v54, %v7214_v17  ;;  %v7217_v33 = vadd.f32 %v12059_v49, %v7216_v15  ;;  %v8154_v54 = vunpack.c.l.bf16 %v8178_v43  ;;  %v8151_v15 = vunpack.c.h.bf16 %v8177_v26 }
 0x509   : > { %v7390_v45 = vmax.f32 %v7358_v2, 0.0  ;;  %v7359_v36 = vadd.f32 %v8131_v32, %v7225_v23  ;;  %v8150_v32 = vunpack.c.l.bf16 %v8177_v26  ;;  %p9387_p2 = por %p9386_p1, %p9385_p0 }
 0x50a   : > { %v7388_v59 = vmax.f32 %v7356_v37, 0.0  ;;  %v7357_v62 = vadd.f32 %v8127_v60, %v7217_v33  ;;  %v8155_v60 = vunpack.c.h.bf16 %v8178_v43 }
 0x50b   : > { %7422 = vst [vmem:[%s12069_s24 + $0x90] sm:$0xff] %v7390_v45  ;;  %v7391_v10 = vmax.f32 %v7359_v36, 0.0  ;;  %p9388_p3 = pnand %p9387_p2, %p9381_p13 }
 0x50c   : > { %7420 = vst [vmem:[%s12069_s24 + $0x80] sm:$0xff] %v7388_v59  ;;  %v7389_v47 = vmax.f32 %v7357_v62, 0.0  ;;  %v8922_v57 = vpop.f32.mrb[188].mxu0 }
 0x50d   : > { %7423 = vst [vmem:[%s12069_s24 + $0x98] sm:$0xff] %v7391_v10  ;;  %v7238_v41 = vadd.f32 %v8922_v57, %v12059_v49  ;;  %v7229_v6 = vpop.f32.mrb[189].mxu0 }
 0x50e   : > { %7421 = vst [vmem:[%s12069_s24 + $0x88] sm:$0xff] %v7389_v47  ;;  %v7230_v9 = vadd.f32 %v12059_v49, %v7229_v6  ;;  %v8923_v1 = vpop.f32.mrb[190].mxu0 }
 0x50f   : > { %v7362_v3 = vadd.f32 %v8138_v58, %v7238_v41  ;;  %v7241_v24 = vadd.f32 %v8923_v1, %v12059_v49  ;;  %v7232_v42 = vpop.f32.mrb[191].mxu0 }
 0x510   : > { %v7360_v46 = vadd.f32 %v8134_v63, %v7230_v9  ;;  %v7233_v56 = vadd.f32 %v12059_v49, %v7232_v42 }
 0x511   : > { %v7394_v14 = vmax.f32 %v7362_v3, 0.0  ;;  %v7363_v16 = vadd.f32 %v8139_v12, %v7241_v24 }
 0x512   : > { %v7392_v44 = vmax.f32 %v7360_v46, 0.0  ;;  %v7361_v55 = vadd.f32 %v8135_v53, %v7233_v56 }
 0x513   : > { %7426 = vst [vmem:[%s12069_s24 + $0xb0] sm:$0xff] %v7394_v14  ;;  %v7395_v0 = vmax.f32 %v7363_v16, 0.0 }
 0x514   : > { %7424 = vst [vmem:[%s12069_s24 + $0xa0] sm:$0xff] %v7392_v44  ;;  %v7393_v38 = vmax.f32 %v7361_v55, 0.0  ;;  %v8926_v13 = vpop.f32.mrb[192].mxu0 }
 0x515   : > { %7427 = vst [vmem:[%s12069_s24 + $0xb8] sm:$0xff] %v7395_v0  ;;  %v7254_v5 = vadd.f32 %v8926_v13, %v12059_v49  ;;  %v7245_v20 = vpop.f32.mrb[193].mxu0 }
 0x516   : > { %7425 = vst [vmem:[%s12069_s24 + $0xa8] sm:$0xff] %v7393_v38  ;;  %v7246_v19 = vadd.f32 %v12059_v49, %v7245_v20  ;;  %v8927_v28 = vpop.f32.mrb[194].mxu0 }
 0x517   : > { %v7366_v21 = vadd.f32 %v8146_v40, %v7254_v5  ;;  %v7257_v48 = vadd.f32 %v8927_v28, %v12059_v49  ;;  %v7248_v18 = vpop.f32.mrb[195].mxu0 }
 0x518   : > { %v7364_v35 = vadd.f32 %v8142_v34, %v7246_v19  ;;  %v7249_v29 = vadd.f32 %v12059_v49, %v7248_v18 }
 0x519   : > { %v7398_v27 = vmax.f32 %v7366_v21, 0.0  ;;  %v7367_v30 = vadd.f32 %v8147_v11, %v7257_v48 }
 0x51a   : > { %v7396_v22 = vmax.f32 %v7364_v35, 0.0  ;;  %v7365_v8 = vadd.f32 %v8143_v31, %v7249_v29 }
 0x51b   : > { %7430 = vst [vmem:[%s12069_s24 + $0xd0] sm:$0xff] %v7398_v27  ;;  %v7399_v39 = vmax.f32 %v7367_v30, 0.0 }
 0x51c   : > { %7428 = vst [vmem:[%s12069_s24 + $0xc0] sm:$0xff] %v7396_v22  ;;  %v7397_v52 = vmax.f32 %v7365_v8, 0.0  ;;  %v8930_v7 = vpop.f32.mrb[196].mxu0 }
 0x51d   : > { %7431 = vst [vmem:[%s12069_s24 + $0xd8] sm:$0xff] %v7399_v39  ;;  %v7270_v17 = vadd.f32 %v8930_v7, %v12059_v49  ;;  %v7261_v61 = vpop.f32.mrb[197].mxu0 }
 0x51e   : > { %7429 = vst [vmem:[%s12069_s24 + $0xc8] sm:$0xff] %v7397_v52  ;;  %v7262_v2 = vadd.f32 %v12059_v49, %v7261_v61  ;;  %v8931_v23 = vpop.f32.mrb[198].mxu0 }
 0x51f   : > { %v7370_v37 = vadd.f32 %v8154_v54, %v7270_v17  ;;  %v7273_v33 = vadd.f32 %v8931_v23, %v12059_v49  ;;  %v7264_v4 = vpop.f32.mrb[199].mxu0 }
 0x520   : > { %v7368_v45 = vadd.f32 %v8150_v32, %v7262_v2  ;;  %v7265_v36 = vadd.f32 %v12059_v49, %v7264_v4 }
 0x521   : > { %v7402_v25 = vmax.f32 %v7370_v37, 0.0  ;;  %v7371_v59 = vadd.f32 %v8155_v60, %v7273_v33 }
 0x522   : > { %v7400_v62 = vmax.f32 %v7368_v45, 0.0  ;;  %v7369_v10 = vadd.f32 %v8151_v15, %v7265_v36 }
 0x523   : > { %7434 = vst [vmem:[%s12069_s24 + $0xf0] sm:$0xff] %v7402_v25  ;;  %v7403_v58 = vmax.f32 %v7371_v59, 0.0 }
 0x524   : > { %7432 = vst [vmem:[%s12069_s24 + $0xe0] sm:$0xff] %v7400_v62  ;;  %v7401_v49 = vmax.f32 %v7369_v10, 0.0 }
 0x525   : > { %7435 = vst [vmem:[%s12069_s24 + $0xf8] sm:$0xff] %v7403_v58 }
 0x526   : > { %7433 = vst [vmem:[%s12069_s24 + $0xe8] sm:$0xff] %v7401_v49 }
 0x527   : > { %9391 = shalt.err (!%p9388_p3)
}
 0x528   : > { %s9392_s22 = scalar_lea.hbm %s12145_s14, 4096  ;;  %s9396_s24 = scalar_lea.hbm %s12204_s9, 8192 }
 0x529   : > { %p9393_p4 = scmp.ne.s32.totalorder %s12145_s14, %s9392_s22  ;;  %p9397_p9 = scmp.lt.u32.totalorder %s12145_s14, %s12204_s9 }
 0x52a   : > { %p9398_p10 = scmp.lt.u32.totalorder %s9396_s24, %s9392_s22  ;;  %p9400_p12 = scmp.lt.u32.totalorder %s9392_s22, %s12145_s14 }
 0x52b   : > { %p9394_p7 = pnand %p9393_p4, %p9537_p5 }
 0x52c   : > { %p9399_p11 = por %p9398_p10, %p9397_p9 }
 0x52d   : > { %p9395_p8 = pneg %p9394_p7 }
 0x52e   : > { %p9401_p13 = por %p9400_p12, %p9399_p11 }
 0x530   : > { %p9402_p0 = pnand %p9401_p13, %p9395_p8 }
 0x532   : > { %9405 = shalt.err (!%p9402_p0)
}
 0x533   : > { %s9447_s29 = smov 128   ;;  %s9448_s17 = smov 8  }
 0x534   : > { %9109 = dma.vmem_to_hbm [thread:$0]  (%p9537_p5), %s12147_s27, 4096, %s12145_s14, %s12154_s13, %s9447_s29, %s9447_s29, %s9448_s17  }
 0x535 PF: > { %p9115_p1 = scmp.ge.s32.totalorder %s9440_s12, 2  ;;  %s7465_s18 = sand.u32 1, %s9428_s30  }
 0x536   : > { %s7466_s21 = scalar_lea.sflag [#allocation4], %s7465_s18 }
 0x537   : > { %p9112_p2 = pnand %p9115_p1, %p9541_p6 }
 0x539   : > { %9423 = dma.done.wait (!%p9112_p2), %s7466_s21, 4096  }
 0x53a   : > { %9425 = vsyncadd (!%p9112_p2), %s7466_s21, 4294963200  ;;  %s12302_s23 = sld [smem:[#allocation6_spill]]  ;;  %p19_p3 = scmp.ge.s32.totalorder %s9524_s15, 4  }
 0x53b   : > { %s12303_s30 = smov %s9432_s10  ;;  %s12304_s10 = smov %s9436_s11 }
 0x53c   : > { %s12306_s12 = smov %s9524_s15  ;;  %21 = sbr.rel (!%p19_p3) target bundleno = 3 (0x3), region = 98 }
 0x540   : > { %s12305_s11 = smov %s12302_s23 }
 0x543   :  { %7471 = vsyncpa [#allocation4], 1 }
 0x544   :  { %7473 = vsyncpa [#allocation4 + $0x1], 1 }

</bundles_post_ra>
